<compile_context>
chip_gen: v7x
topology: tpu7x:2x2x1
jax: 0.10.0
libtpu: 0.0.40
codegen_flags: <defaults>
</compile_context>

<pallas_src>
import functools

import jax
import jax.numpy as jnp
from jax import lax
from jax.experimental import pallas as pl
from jax.experimental.pallas import tpu as pltpu


# ---------------------------------------------------------------------------
# Kernel 1: fused {ConvTranspose2d(k2,s2) + concat(skip) + pad + Conv3x3 + bias}
#           + per-block BatchNorm partial statistics.
# ---------------------------------------------------------------------------
def _fused_upconv_conv_kernel(x_ref, skip_ref, wup_ref, bup_ref,
                              wconv_ref, bconv_ref, out_ref, stats_ref):
    # x_ref    : (1, H+2,  W+2,  Cin)  zero-padded input image (bf16), per-n resident
    # skip_ref : (1, Ho+2, Wo+2, Cs)   zero-padded skip image  (bf16), per-n resident
    # wup_ref  : (2, 2, Cin, Cout)     transposed-conv taps (bf16)
    # bup_ref  : (1, Cout)             f32
    # wconv_ref: (3, 3, Ct, Cout)      conv taps (bf16), Ct = Cout + Cs
    # bconv_ref: (1, Cout)             f32
    # out_ref  : (1, th, Wo, Cout)     conv output row block (bf16)
    # stats_ref: (1, 1, 2, Cout)       [sum, sum_sq] over this block (f32)
    i = pl.program_id(1)

    _, th, Wo, Cout = out_ref.shape
    Wp = x_ref.shape[2]                       # W + 2
    Cin = x_ref.shape[3]
    Ho = skip_ref.shape[1] - 2
    Ct = Cout + skip_ref.shape[3]
    th2 = th // 2
    P = th2 + 2                               # x rows needed (incl. 1-row halo)

    # ---- transposed conv (k=2,s=2) for this row block, incl. halo ----------
    x_blk = x_ref[0, pl.ds(pl.multiple_of(i * th2, th2), P), :, :]   # (P,Wp,Cin)
    xf = x_blk.reshape(P * Wp, Cin)

    ys = []
    for a in range(2):                        # sub-pixel row
        row = []
        for b in range(2):                    # sub-pixel col
            yab = jnp.dot(xf, wup_ref[a, b],
                          preferred_element_type=jnp.float32) + bup_ref[...]
            row.append(yab.reshape(P, Wp, Cout))
        ys.append(jnp.stack(row, axis=2))     # (P, Wp, 2, Cout)
    up = jnp.stack(ys, axis=1)                # (P, 2, Wp, 2, Cout)
    up = up.reshape(2 * P, 2 * Wp, Cout)      # sub-pixel interleave (C-order)
    # window covering conv rows [r0-1, r0+th], cols [-1, Wo]
    up = up[1:th + 3, 1:Wo + 3, :]            # (th+2, Wo+2, Cout)

    # zero out positions that are the 3x3 conv's zero padding
    r0 = i * th
    grow = lax.broadcasted_iota(jnp.int32, (th + 2, Wo + 2, 1), 0) + (r0 - 1)
    gcol = lax.broadcasted_iota(jnp.int32, (th + 2, Wo + 2, 1), 1) - 1
    valid = (grow >= 0) & (grow < Ho) & (gcol >= 0) & (gcol < Wo)
    up = jnp.where(valid, up, 0.0).astype(skip_ref.dtype)

    # ---- concat with the (pre-padded) skip window inside VMEM --------------
    skip_win = skip_ref[0, pl.ds(pl.multiple_of(i * th, th), th + 2), :, :]
    cat_win = jnp.concatenate([up, skip_win], axis=-1)     # (th+2, Wo+2, Ct)

    # ---- 3x3 conv as 9 MXU taps (bf16 inputs, f32 accumulation) ------------
    # TODO(synk): for production channel counts, pad Ct/Cout to 128 and/or
    # im2col to a single (rows, 9*Ct) matmul to raise MXU utilisation.
    acc = jnp.zeros((th * Wo, Cout), jnp.float32)
    for dy in range(3):
        for dx in range(3):
            patch = cat_win[dy:dy + th, dx:dx + Wo, :].reshape(th * Wo, Ct)
            acc = acc + jnp.dot(patch, wconv_ref[dy, dx],
                                preferred_element_type=jnp.float32)
    acc = acc + bconv_ref[...]

    out_ref[...] = acc.reshape(1, th, Wo, Cout).astype(out_ref.dtype)

    # per-block BatchNorm partial statistics (f32), reduced later in JAX
    ssum = jnp.sum(acc, axis=0, keepdims=True)              # (1, Cout)
    ssq = jnp.sum(acc * acc, axis=0, keepdims=True)         # (1, Cout)
    stats_ref[...] = jnp.concatenate([ssum, ssq], axis=0)[None, None]


# ---------------------------------------------------------------------------
# Kernel 2: BatchNorm affine + ReLU on a lane-dense (rows, Wo*Cout) view.
# ---------------------------------------------------------------------------
def _bn_relu_kernel(y_ref, scale_ref, shift_ref, o_ref):
    y = y_ref[...].astype(jnp.float32)        # elementwise math in f32 (v5e)
    o_ref[...] = jnp.maximum(y * scale_ref[...] + shift_ref[...], 0.0)


# ---------------------------------------------------------------------------
# Wrapper
# ---------------------------------------------------------------------------
def _tile_size(total, target, multiple=1):
    """Largest divisor of `total` that is <= target and a multiple of
    `multiple`; falls back to `total` (block == full dim)."""
    t = min(target, total)
    for d in range(t, 0, -1):
        if total % d == 0 and d % multiple == 0:
            return d
    return total


def decoder_block_forward(x_nchw, skip_nchw, params, eps=1e-5,
                          conv_row_tile=32, bn_row_tile=512):
    w_up, b_up = params["w_up"], params["b_up"]          # (Cin,Cout,2,2), (Cout,)
    w_conv, b_conv = params["w_conv"], params["b_conv"]  # (Cout,Ct,3,3), (Cout,)
    gamma, beta = params["gamma"], params["beta"]        # (Cout,), (Cout,)

    N, Cin, H, W = x_nchw.shape
    Cout = w_up.shape[1]
    Cs = skip_nchw.shape[1]
    Ct = Cout + Cs
    Ho, Wo = 2 * H, 2 * W

    cdt = jnp.bfloat16   # MXU compute dtype; all accumulation stays f32

    # NCHW -> NHWC (+bf16) with a 1-pixel zero pad so every row block can read
    # its halo with a plain dynamic slice. These are the only extra HBM
    # materialisations left (half precision, skip/x sized); the concatenated
    # `cat` / padded-`cat` tensors of the naive version never exist.
    x_pad = jnp.pad(jnp.transpose(x_nchw, (0, 2, 3, 1)).astype(cdt),
                    ((0, 0), (1, 1), (1, 1), (0, 0)))
    skip_pad = jnp.pad(jnp.transpose(skip_nchw, (0, 2, 3, 1)).astype(cdt),
                       ((0, 0), (1, 1), (1, 1), (0, 0)))

    # weight prep: transposed-conv taps (2,2,Cin,Cout), conv taps (3,3,Ct,Cout)
    w_up_r = jnp.transpose(w_up, (2, 3, 0, 1)).astype(cdt)
    b_up_r = b_up.reshape(1, Cout).astype(jnp.float32)
    w_conv_r = jnp.transpose(w_conv, (2, 3, 1, 0)).astype(cdt)
    b_conv_r = b_conv.reshape(1, Cout).astype(jnp.float32)

    th = _tile_size(Ho, conv_row_tile, multiple=2)       # conv rows per step
    n_rb = Ho // th

    conv_flops = (2 * N * H * W * Cin * 4 * Cout         # transposed conv
                  + 2 * N * Ho * Wo * 9 * Ct * Cout)     # 3x3 conv
    conv_bytes = (x_pad.size * 2 + skip_pad.size * 2
                  + N * Ho * Wo * Cout * 2 + N * n_rb * 2 * Cout * 4
                  + w_up_r.size * 2 + w_conv_r.size * 2)

    conv_out, stats = pl.pallas_call(
        _fused_upconv_conv_kernel,
        out_shape=(
            jax.ShapeDtypeStruct((N, Ho, Wo, Cout), cdt),
            jax.ShapeDtypeStruct((N, n_rb, 2, Cout), jnp.float32),
        ),
        grid=(N, n_rb),
        in_specs=[
            pl.BlockSpec((1, H + 2, W + 2, Cin), lambda n, i: (n, 0, 0, 0)),
            pl.BlockSpec((1, Ho + 2, Wo + 2, Cs), lambda n, i: (n, 0, 0, 0)),
            pl.BlockSpec((2, 2, Cin, Cout), lambda n, i: (0, 0, 0, 0)),
            pl.BlockSpec((1, Cout), lambda n, i: (0, 0)),
            pl.BlockSpec((3, 3, Ct, Cout), lambda n, i: (0, 0, 0, 0)),
            pl.BlockSpec((1, Cout), lambda n, i: (0, 0)),
        ],
        out_specs=(
            pl.BlockSpec((1, th, Wo, Cout), lambda n, i: (n, i, 0, 0)),
            pl.BlockSpec((1, 1, 2, Cout), lambda n, i: (n, i, 0, 0)),
        ),
        compiler_params=pltpu.CompilerParams(
            dimension_semantics=("parallel", "parallel"),
            vmem_limit_bytes=48 * 1024 * 1024),   # > 32MiB default, < v7x 64MiB
        cost_estimate=pl.CostEstimate(flops=conv_flops, transcendentals=0,
                                      bytes_accessed=conv_bytes),
    )(x_pad, skip_pad, w_up_r, b_up_r, w_conv_r, b_conv_r)

    # ---- BatchNorm2d batch statistics from the in-kernel partial sums ------
    cnt = jnp.float32(N * Ho * Wo)
    csum = jnp.sum(stats[:, :, 0, :], axis=(0, 1))
    csumsq = jnp.sum(stats[:, :, 1, :], axis=(0, 1))
    mean = csum / cnt
    # single-pass E[x^2]-E[x]^2 in f32 (biased var, as PyTorch BN training).
    # TODO(synk): switch to a two-pass / Welford reduction for very large N*Ho*Wo.
    var = jnp.maximum(csumsq / cnt - mean * mean, 0.0)
    scale = gamma * lax.rsqrt(var + eps)
    shift = beta - mean * scale

    # ---- BN + ReLU on a lane-dense (rows, Wo*Cout) view ---------------------
    WC = Wo * Cout
    R = N * Ho
    tr = _tile_size(R, bn_row_tile, multiple=8)
    y2d = conv_out.reshape(R, WC)                         # free XLA reshape
    scale_t = jnp.tile(scale, Wo).reshape(1, WC).astype(jnp.float32)
    shift_t = jnp.tile(shift, Wo).reshape(1, WC).astype(jnp.float32)

    out2d = pl.pallas_call(
        _bn_relu_kernel,
        out_shape=jax.ShapeDtypeStruct((R, WC), jnp.float32),
        grid=(R // tr,),
        in_specs=[
            pl.BlockSpec((tr, WC), lambda i: (i, 0)),
            pl.BlockSpec((1, WC), lambda i: (0, 0)),
            pl.BlockSpec((1, WC), lambda i: (0, 0)),
        ],
        out_specs=pl.BlockSpec((tr, WC), lambda i: (i, 0)),
        compiler_params=pltpu.CompilerParams(
            dimension_semantics=("parallel",),
            vmem_limit_bytes=48 * 1024 * 1024),
        cost_estimate=pl.CostEstimate(flops=3 * R * WC, transcendentals=0,
                                      bytes_accessed=R * WC * 6 + 2 * WC * 4),
    )(y2d, scale_t, shift_t)

    out = out2d.reshape(N, Ho, Wo, Cout)
    # Final NHWC -> NCHW only to match the PyTorch interface; an NHWC consumer
    # should take `out` directly and skip this XLA transpose.
    return jnp.transpose(out, (0, 3, 1, 2))


# ---------------------------------------------------------------------------
# Pure-JAX reference (f32) for correctness check
# ---------------------------------------------------------------------------
def reference_forward(x, skip, params, eps=1e-5):
    w_up, b_up = params["w_up"], params["b_up"]
    w_conv, b_conv = params["w_conv"], params["b_conv"]
    gamma, beta = params["gamma"], params["beta"]
    N, _, H, W = x.shape
    Cout = w_up.shape[1]

    up = jnp.einsum("ncij,cdab->ndiajb", x, w_up).reshape(N, Cout, 2 * H, 2 * W)
    up = up + b_up[None, :, None, None]
    cat = jnp.concatenate([up, skip], axis=1)
    conv = lax.conv_general_dilated(
        cat, w_conv, (1, 1), ((1, 1), (1, 1)),
        dimension_numbers=("NCHW", "OIHW", "NCHW")) + b_conv[None, :, None, None]
    mean = conv.mean(axis=(0, 2, 3), keepdims=True)
    var = conv.var(axis=(0, 2, 3), keepdims=True)
    out = (conv - mean) / jnp.sqrt(var + eps)
    out = out * gamma[None, :, None, None] + beta[None, :, None, None]
    return jnp.maximum(out, 0.0)


# ---------------------------------------------------------------------------
if __name__ == "__main__":
    key = jax.random.PRNGKey(0)
    N, Cin, Cout, Cs, H, W = 2, 8, 8, 4, 8, 8
    ks = jax.random.split(key, 6)

    x = jax.random.normal(ks[0], (N, Cin, H, W), jnp.float32)
    skip = jax.random.normal(ks[1], (N, Cs, 2 * H, 2 * W), jnp.float32)

    params = dict(
        w_up=0.1 * jax.random.normal(ks[2], (Cin, Cout, 2, 2), jnp.float32),
        b_up=0.1 * jax.random.normal(ks[3], (Cout,), jnp.float32),
        w_conv=0.1 * jax.random.normal(ks[4], (Cout, Cout + Cs, 3, 3), jnp.float32),
        b_conv=0.1 * jax.random.normal(ks[5], (Cout,), jnp.float32),
        gamma=jnp.ones((Cout,), jnp.float32),
        beta=jnp.zeros((Cout,), jnp.float32),
    )

    # small row tiles so the test exercises multi-block grids + halo masking
    fwd = jax.jit(functools.partial(decoder_block_forward,
                                    conv_row_tile=8, bn_row_tile=16))
    out = jax.block_until_ready(fwd(x, skip, params))
    ref = reference_forward(x, skip, params)

    assert out.shape == (N, Cout, 2 * H, 2 * W), out.shape
    max_err = float(jnp.max(jnp.abs(out - ref)))
    if max_err > 5e-2:   # bf16 MXU compute vs f32 reference
        raise AssertionError(f"mismatch vs reference: max_err={max_err}")
    print("KERNEL_OK")
</pallas_src>

<mosaic_0001>
module attributes {stable_mosaic.version = 11 : i64} {
  func.func @_fused_upconv_conv_kernel(%arg0: i32, %arg1: i32, %arg2: memref<1x10x10x8xbf16, #tpu.memory_space<vmem>>, %arg3: memref<1x18x18x4xbf16, #tpu.memory_space<vmem>>, %arg4: memref<2x2x8x8xbf16, #tpu.memory_space<vmem>>, %arg5: memref<1x8xf32, #tpu.memory_space<vmem>>, %arg6: memref<3x3x12x8xbf16, #tpu.memory_space<vmem>>, %arg7: memref<1x8xf32, #tpu.memory_space<vmem>>, %arg8: memref<1x8x16x8xbf16, #tpu.memory_space<vmem>>, %arg9: memref<1x1x2x8xf32, #tpu.memory_space<vmem>>) attributes {dimension_semantics = [#tpu.dimension_semantics<parallel>, #tpu.dimension_semantics<parallel>], iteration_bounds = array<i64: 2, 2>, scalar_prefetch = 0 : i64, scratch_operands = 0 : i64, tpu.core_type = #tpu.core_type<tc>, window_params = [{transform_indices = @transform_0, window_bounds = array<i64: 1, 10, 10, 8>}, {transform_indices = @transform_1, window_bounds = array<i64: 1, 18, 18, 4>}, {pipeline_mode = #tpu.pipeline_mode<synchronous>, transform_indices = @transform_2, window_bounds = array<i64: 2, 2, 8, 8>}, {pipeline_mode = #tpu.pipeline_mode<synchronous>, transform_indices = @transform_3, window_bounds = array<i64: 1, 8>}, {pipeline_mode = #tpu.pipeline_mode<synchronous>, transform_indices = @transform_4, window_bounds = array<i64: 3, 3, 12, 8>}, {pipeline_mode = #tpu.pipeline_mode<synchronous>, transform_indices = @transform_5, window_bounds = array<i64: 1, 8>}, {transform_indices = @transform_6, window_bounds = array<i64: 1, 8, 16, 8>}, {transform_indices = @transform_7, window_bounds = array<i64: 1, 1, 2, 8>}]} {
    %c4_i32 = arith.constant 4 : i32
    %0 = arith.muli %arg1, %c4_i32 : i32
    %1 = tpu.assume_multiple %0, 4 : i32
    %c0 = arith.constant 0 : index
    %2 = arith.index_cast %1 : i32 to index
    %c0_0 = arith.constant 0 : index
    %c0_1 = arith.constant 0 : index
    %3 = vector.load %arg2[%c0, %2, %c0_0, %c0_1] : memref<1x10x10x8xbf16, #tpu.memory_space<vmem>>, vector<1x6x10x8xbf16>
    %4 = vector.shape_cast %3 : vector<1x6x10x8xbf16> to vector<6x10x8xbf16>
    %5 = vector.shape_cast %4 : vector<6x10x8xbf16> to vector<60x8xbf16>
    %c0_2 = arith.constant 0 : index
    %c0_3 = arith.constant 0 : index
    %c0_4 = arith.constant 0 : index
    %c0_5 = arith.constant 0 : index
    %6 = vector.load %arg4[%c0_2, %c0_3, %c0_4, %c0_5] : memref<2x2x8x8xbf16, #tpu.memory_space<vmem>>, vector<1x1x8x8xbf16>
    %7 = vector.shape_cast %6 : vector<1x1x8x8xbf16> to vector<8x8xbf16>
    %cst = arith.constant dense<0.000000e+00> : vector<60x8xf32>
    %8 = tpu.matmul %5, %7, %cst {dimension_numbers = #tpu.dot_dimension_numbers<[1], [0], [0], [1], [0, 0, 1, 1], [], []>} : vector<60x8xbf16>, vector<8x8xbf16>, vector<60x8xf32> -> vector<60x8xf32>
    %c0_6 = arith.constant 0 : index
    %c0_7 = arith.constant 0 : index
    %9 = vector.load %arg5[%c0_6, %c0_7] : memref<1x8xf32, #tpu.memory_space<vmem>>, vector<1x8xf32>
    %10 = vector.broadcast %9 : vector<1x8xf32> to vector<60x8xf32>
    %11 = arith.addf %8, %10 : vector<60x8xf32>
    %12 = vector.shape_cast %11 : vector<60x8xf32> to vector<6x10x8xf32>
    %c0_8 = arith.constant 0 : index
    %c1 = arith.constant 1 : index
    %c0_9 = arith.constant 0 : index
    %c0_10 = arith.constant 0 : index
    %13 = vector.load %arg4[%c0_8, %c1, %c0_9, %c0_10] : memref<2x2x8x8xbf16, #tpu.memory_space<vmem>>, vector<1x1x8x8xbf16>
    %14 = vector.shape_cast %13 : vector<1x1x8x8xbf16> to vector<8x8xbf16>
    %cst_11 = arith.constant dense<0.000000e+00> : vector<60x8xf32>
    %15 = tpu.matmul %5, %14, %cst_11 {dimension_numbers = #tpu.dot_dimension_numbers<[1], [0], [0], [1], [0, 0, 1, 1], [], []>} : vector<60x8xbf16>, vector<8x8xbf16>, vector<60x8xf32> -> vector<60x8xf32>
    %c0_12 = arith.constant 0 : index
    %c0_13 = arith.constant 0 : index
    %16 = vector.load %arg5[%c0_12, %c0_13] : memref<1x8xf32, #tpu.memory_space<vmem>>, vector<1x8xf32>
    %17 = vector.broadcast %16 : vector<1x8xf32> to vector<60x8xf32>
    %18 = arith.addf %15, %17 : vector<60x8xf32>
    %19 = vector.shape_cast %18 : vector<60x8xf32> to vector<6x10x8xf32>
    %20 = vector.shape_cast %12 : vector<6x10x8xf32> to vector<6x10x1x8xf32>
    %21 = vector.shape_cast %19 : vector<6x10x8xf32> to vector<6x10x1x8xf32>
    %22 = tpu.concatenate %20, %21 in 2 : vector<6x10x1x8xf32>, vector<6x10x1x8xf32> -> vector<6x10x2x8xf32>
    %c1_14 = arith.constant 1 : index
    %c0_15 = arith.constant 0 : index
    %c0_16 = arith.constant 0 : index
    %c0_17 = arith.constant 0 : index
    %23 = vector.load %arg4[%c1_14, %c0_15, %c0_16, %c0_17] : memref<2x2x8x8xbf16, #tpu.memory_space<vmem>>, vector<1x1x8x8xbf16>
    %24 = vector.shape_cast %23 : vector<1x1x8x8xbf16> to vector<8x8xbf16>
    %cst_18 = arith.constant dense<0.000000e+00> : vector<60x8xf32>
    %25 = tpu.matmul %5, %24, %cst_18 {dimension_numbers = #tpu.dot_dimension_numbers<[1], [0], [0], [1], [0, 0, 1, 1], [], []>} : vector<60x8xbf16>, vector<8x8xbf16>, vector<60x8xf32> -> vector<60x8xf32>
    %c0_19 = arith.constant 0 : index
    %c0_20 = arith.constant 0 : index
    %26 = vector.load %arg5[%c0_19, %c0_20] : memref<1x8xf32, #tpu.memory_space<vmem>>, vector<1x8xf32>
    %27 = vector.broadcast %26 : vector<1x8xf32> to vector<60x8xf32>
    %28 = arith.addf %25, %27 : vector<60x8xf32>
    %29 = vector.shape_cast %28 : vector<60x8xf32> to vector<6x10x8xf32>
    %c1_21 = arith.constant 1 : index
    %c1_22 = arith.constant 1 : index
    %c0_23 = arith.constant 0 : index
    %c0_24 = arith.constant 0 : index
    %30 = vector.load %arg4[%c1_21, %c1_22, %c0_23, %c0_24] : memref<2x2x8x8xbf16, #tpu.memory_space<vmem>>, vector<1x1x8x8xbf16>
    %31 = vector.shape_cast %30 : vector<1x1x8x8xbf16> to vector<8x8xbf16>
    %cst_25 = arith.constant dense<0.000000e+00> : vector<60x8xf32>
    %32 = tpu.matmul %5, %31, %cst_25 {dimension_numbers = #tpu.dot_dimension_numbers<[1], [0], [0], [1], [0, 0, 1, 1], [], []>} : vector<60x8xbf16>, vector<8x8xbf16>, vector<60x8xf32> -> vector<60x8xf32>
    %c0_26 = arith.constant 0 : index
    %c0_27 = arith.constant 0 : index
    %33 = vector.load %arg5[%c0_26, %c0_27] : memref<1x8xf32, #tpu.memory_space<vmem>>, vector<1x8xf32>
    %34 = vector.broadcast %33 : vector<1x8xf32> to vector<60x8xf32>
    %35 = arith.addf %32, %34 : vector<60x8xf32>
    %36 = vector.shape_cast %35 : vector<60x8xf32> to vector<6x10x8xf32>
    %37 = vector.shape_cast %29 : vector<6x10x8xf32> to vector<6x10x1x8xf32>
    %38 = vector.shape_cast %36 : vector<6x10x8xf32> to vector<6x10x1x8xf32>
    %39 = tpu.concatenate %37, %38 in 2 : vector<6x10x1x8xf32>, vector<6x10x1x8xf32> -> vector<6x10x2x8xf32>
    %40 = vector.shape_cast %22 : vector<6x10x2x8xf32> to vector<6x1x10x2x8xf32>
    %41 = vector.shape_cast %39 : vector<6x10x2x8xf32> to vector<6x1x10x2x8xf32>
    %42 = tpu.concatenate %40, %41 in 1 : vector<6x1x10x2x8xf32>, vector<6x1x10x2x8xf32> -> vector<6x2x10x2x8xf32>
    %43 = vector.shape_cast %42 : vector<6x2x10x2x8xf32> to vector<12x20x8xf32>
    %44 = vector.extract_strided_slice %43 {offsets = [1, 1, 0], sizes = [10, 18, 8], strides = [1, 1, 1]} : vector<12x20x8xf32> to vector<10x18x8xf32>
    %c8_i32 = arith.constant 8 : i32
    %45 = arith.muli %arg1, %c8_i32 : i32
    %46 = tpu.iota {dimensions = array<i32: 0>} : vector<10x18x1xi32>
    %c1_i32 = arith.constant 1 : i32
    %47 = arith.subi %45, %c1_i32 : i32
    %48 = vector.broadcast %47 : i32 to vector<10x18x1xi32>
    %49 = arith.addi %46, %48 : vector<10x18x1xi32>
    %50 = tpu.iota {dimensions = array<i32: 1>} : vector<10x18x1xi32>
    %c1_i32_28 = arith.constant 1 : i32
    %51 = vector.broadcast %c1_i32_28 : i32 to vector<10x18x1xi32>
    %52 = arith.subi %50, %51 : vector<10x18x1xi32>
    %c0_i32 = arith.constant 0 : i32
    %53 = vector.broadcast %c0_i32 : i32 to vector<10x18x1xi32>
    %54 = arith.cmpi sge, %49, %53 : vector<10x18x1xi32>
    %c16_i32 = arith.constant 16 : i32
    %55 = vector.broadcast %c16_i32 : i32 to vector<10x18x1xi32>
    %56 = arith.cmpi slt, %49, %55 : vector<10x18x1xi32>
    %57 = arith.andi %54, %56 : vector<10x18x1xi1>
    %c0_i32_29 = arith.constant 0 : i32
    %58 = vector.broadcast %c0_i32_29 : i32 to vector<10x18x1xi32>
    %59 = arith.cmpi sge, %52, %58 : vector<10x18x1xi32>
    %60 = arith.andi %57, %59 : vector<10x18x1xi1>
    %c16_i32_30 = arith.constant 16 : i32
    %61 = vector.broadcast %c16_i32_30 : i32 to vector<10x18x1xi32>
    %62 = arith.cmpi slt, %52, %61 : vector<10x18x1xi32>
    %63 = arith.andi %60, %62 : vector<10x18x1xi1>
    %cst_31 = arith.constant 0.000000e+00 : f32
    %64 = vector.shape_cast %63 : vector<10x18x1xi1> to vector<10x18x1xi1>
    %65 = vector.broadcast %64 : vector<10x18x1xi1> to vector<10x18x8xi1>
    %66 = vector.broadcast %cst_31 : f32 to vector<10x18x8xf32>
    %67 = arith.select %65, %44, %66 : vector<10x18x8xi1>, vector<10x18x8xf32>
    %68 = arith.truncf %67 : vector<10x18x8xf32> to vector<10x18x8xbf16>
    %c8_i32_32 = arith.constant 8 : i32
    %69 = arith.muli %arg1, %c8_i32_32 : i32
    %70 = tpu.assume_multiple %69, 8 : i32
    %c0_33 = arith.constant 0 : index
    %71 = arith.index_cast %70 : i32 to index
    %c0_34 = arith.constant 0 : index
    %c0_35 = arith.constant 0 : index
    %72 = vector.load %arg3[%c0_33, %71, %c0_34, %c0_35] : memref<1x18x18x4xbf16, #tpu.memory_space<vmem>>, vector<1x10x18x4xbf16>
    %73 = vector.shape_cast %72 : vector<1x10x18x4xbf16> to vector<10x18x4xbf16>
    %74 = tpu.concatenate %68, %73 in 2 : vector<10x18x8xbf16>, vector<10x18x4xbf16> -> vector<10x18x12xbf16>
    %cst_36 = arith.constant 0.000000e+00 : f32
    %75 = vector.broadcast %cst_36 : f32 to vector<128x8xf32>
    %76 = vector.extract_strided_slice %74 {offsets = [0, 0, 0], sizes = [8, 16, 12], strides = [1, 1, 1]} : vector<10x18x12xbf16> to vector<8x16x12xbf16>
    %77 = vector.shape_cast %76 : vector<8x16x12xbf16> to vector<128x12xbf16>
    %c0_37 = arith.constant 0 : index
    %c0_38 = arith.constant 0 : index
    %c0_39 = arith.constant 0 : index
    %c0_40 = arith.constant 0 : index
    %78 = vector.load %arg6[%c0_37, %c0_38, %c0_39, %c0_40] : memref<3x3x12x8xbf16, #tpu.memory_space<vmem>>, vector<1x1x12x8xbf16>
    %79 = vector.shape_cast %78 : vector<1x1x12x8xbf16> to vector<12x8xbf16>
    %cst_41 = arith.constant dense<0.000000e+00> : vector<128x8xf32>
    %80 = tpu.matmul %77, %79, %cst_41 {dimension_numbers = #tpu.dot_dimension_numbers<[1], [0], [0], [1], [0, 0, 1, 1], [], []>} : vector<128x12xbf16>, vector<12x8xbf16>, vector<128x8xf32> -> vector<128x8xf32>
    %81 = arith.addf %75, %80 : vector<128x8xf32>
    %82 = vector.extract_strided_slice %74 {offsets = [0, 1, 0], sizes = [8, 16, 12], strides = [1, 1, 1]} : vector<10x18x12xbf16> to vector<8x16x12xbf16>
    %83 = vector.shape_cast %82 : vector<8x16x12xbf16> to vector<128x12xbf16>
    %c0_42 = arith.constant 0 : index
    %c1_43 = arith.constant 1 : index
    %c0_44 = arith.constant 0 : index
    %c0_45 = arith.constant 0 : index
    %84 = vector.load %arg6[%c0_42, %c1_43, %c0_44, %c0_45] : memref<3x3x12x8xbf16, #tpu.memory_space<vmem>>, vector<1x1x12x8xbf16>
    %85 = vector.shape_cast %84 : vector<1x1x12x8xbf16> to vector<12x8xbf16>
    %cst_46 = arith.constant dense<0.000000e+00> : vector<128x8xf32>
    %86 = tpu.matmul %83, %85, %cst_46 {dimension_numbers = #tpu.dot_dimension_numbers<[1], [0], [0], [1], [0, 0, 1, 1], [], []>} : vector<128x12xbf16>, vector<12x8xbf16>, vector<128x8xf32> -> vector<128x8xf32>
    %87 = arith.addf %81, %86 : vector<128x8xf32>
    %88 = vector.extract_strided_slice %74 {offsets = [0, 2, 0], sizes = [8, 16, 12], strides = [1, 1, 1]} : vector<10x18x12xbf16> to vector<8x16x12xbf16>
    %89 = vector.shape_cast %88 : vector<8x16x12xbf16> to vector<128x12xbf16>
    %c0_47 = arith.constant 0 : index
    %c2 = arith.constant 2 : index
    %c0_48 = arith.constant 0 : index
    %c0_49 = arith.constant 0 : index
    %90 = vector.load %arg6[%c0_47, %c2, %c0_48, %c0_49] : memref<3x3x12x8xbf16, #tpu.memory_space<vmem>>, vector<1x1x12x8xbf16>
    %91 = vector.shape_cast %90 : vector<1x1x12x8xbf16> to vector<12x8xbf16>
    %cst_50 = arith.constant dense<0.000000e+00> : vector<128x8xf32>
    %92 = tpu.matmul %89, %91, %cst_50 {dimension_numbers = #tpu.dot_dimension_numbers<[1], [0], [0], [1], [0, 0, 1, 1], [], []>} : vector<128x12xbf16>, vector<12x8xbf16>, vector<128x8xf32> -> vector<128x8xf32>
    %93 = arith.addf %87, %92 : vector<128x8xf32>
    %94 = vector.extract_strided_slice %74 {offsets = [1, 0, 0], sizes = [8, 16, 12], strides = [1, 1, 1]} : vector<10x18x12xbf16> to vector<8x16x12xbf16>
    %95 = vector.shape_cast %94 : vector<8x16x12xbf16> to vector<128x12xbf16>
    %c1_51 = arith.constant 1 : index
    %c0_52 = arith.constant 0 : index
    %c0_53 = arith.constant 0 : index
    %c0_54 = arith.constant 0 : index
    %96 = vector.load %arg6[%c1_51, %c0_52, %c0_53, %c0_54] : memref<3x3x12x8xbf16, #tpu.memory_space<vmem>>, vector<1x1x12x8xbf16>
    %97 = vector.shape_cast %96 : vector<1x1x12x8xbf16> to vector<12x8xbf16>
    %cst_55 = arith.constant dense<0.000000e+00> : vector<128x8xf32>
    %98 = tpu.matmul %95, %97, %cst_55 {dimension_numbers = #tpu.dot_dimension_numbers<[1], [0], [0], [1], [0, 0, 1, 1], [], []>} : vector<128x12xbf16>, vector<12x8xbf16>, vector<128x8xf32> -> vector<128x8xf32>
    %99 = arith.addf %93, %98 : vector<128x8xf32>
    %100 = vector.extract_strided_slice %74 {offsets = [1, 1, 0], sizes = [8, 16, 12], strides = [1, 1, 1]} : vector<10x18x12xbf16> to vector<8x16x12xbf16>
    %101 = vector.shape_cast %100 : vector<8x16x12xbf16> to vector<128x12xbf16>
    %c1_56 = arith.constant 1 : index
    %c1_57 = arith.constant 1 : index
    %c0_58 = arith.constant 0 : index
    %c0_59 = arith.constant 0 : index
    %102 = vector.load %arg6[%c1_56, %c1_57, %c0_58, %c0_59] : memref<3x3x12x8xbf16, #tpu.memory_space<vmem>>, vector<1x1x12x8xbf16>
    %103 = vector.shape_cast %102 : vector<1x1x12x8xbf16> to vector<12x8xbf16>
    %cst_60 = arith.constant dense<0.000000e+00> : vector<128x8xf32>
    %104 = tpu.matmul %101, %103, %cst_60 {dimension_numbers = #tpu.dot_dimension_numbers<[1], [0], [0], [1], [0, 0, 1, 1], [], []>} : vector<128x12xbf16>, vector<12x8xbf16>, vector<128x8xf32> -> vector<128x8xf32>
    %105 = arith.addf %99, %104 : vector<128x8xf32>
    %106 = vector.extract_strided_slice %74 {offsets = [1, 2, 0], sizes = [8, 16, 12], strides = [1, 1, 1]} : vector<10x18x12xbf16> to vector<8x16x12xbf16>
    %107 = vector.shape_cast %106 : vector<8x16x12xbf16> to vector<128x12xbf16>
    %c1_61 = arith.constant 1 : index
    %c2_62 = arith.constant 2 : index
    %c0_63 = arith.constant 0 : index
    %c0_64 = arith.constant 0 : index
    %108 = vector.load %arg6[%c1_61, %c2_62, %c0_63, %c0_64] : memref<3x3x12x8xbf16, #tpu.memory_space<vmem>>, vector<1x1x12x8xbf16>
    %109 = vector.shape_cast %108 : vector<1x1x12x8xbf16> to vector<12x8xbf16>
    %cst_65 = arith.constant dense<0.000000e+00> : vector<128x8xf32>
    %110 = tpu.matmul %107, %109, %cst_65 {dimension_numbers = #tpu.dot_dimension_numbers<[1], [0], [0], [1], [0, 0, 1, 1], [], []>} : vector<128x12xbf16>, vector<12x8xbf16>, vector<128x8xf32> -> vector<128x8xf32>
    %111 = arith.addf %105, %110 : vector<128x8xf32>
    %112 = vector.extract_strided_slice %74 {offsets = [2, 0, 0], sizes = [8, 16, 12], strides = [1, 1, 1]} : vector<10x18x12xbf16> to vector<8x16x12xbf16>
    %113 = vector.shape_cast %112 : vector<8x16x12xbf16> to vector<128x12xbf16>
    %c2_66 = arith.constant 2 : index
    %c0_67 = arith.constant 0 : index
    %c0_68 = arith.constant 0 : index
    %c0_69 = arith.constant 0 : index
    %114 = vector.load %arg6[%c2_66, %c0_67, %c0_68, %c0_69] : memref<3x3x12x8xbf16, #tpu.memory_space<vmem>>, vector<1x1x12x8xbf16>
    %115 = vector.shape_cast %114 : vector<1x1x12x8xbf16> to vector<12x8xbf16>
    %cst_70 = arith.constant dense<0.000000e+00> : vector<128x8xf32>
    %116 = tpu.matmul %113, %115, %cst_70 {dimension_numbers = #tpu.dot_dimension_numbers<[1], [0], [0], [1], [0, 0, 1, 1], [], []>} : vector<128x12xbf16>, vector<12x8xbf16>, vector<128x8xf32> -> vector<128x8xf32>
    %117 = arith.addf %111, %116 : vector<128x8xf32>
    %118 = vector.extract_strided_slice %74 {offsets = [2, 1, 0], sizes = [8, 16, 12], strides = [1, 1, 1]} : vector<10x18x12xbf16> to vector<8x16x12xbf16>
    %119 = vector.shape_cast %118 : vector<8x16x12xbf16> to vector<128x12xbf16>
    %c2_71 = arith.constant 2 : index
    %c1_72 = arith.constant 1 : index
    %c0_73 = arith.constant 0 : index
    %c0_74 = arith.constant 0 : index
    %120 = vector.load %arg6[%c2_71, %c1_72, %c0_73, %c0_74] : memref<3x3x12x8xbf16, #tpu.memory_space<vmem>>, vector<1x1x12x8xbf16>
    %121 = vector.shape_cast %120 : vector<1x1x12x8xbf16> to vector<12x8xbf16>
    %cst_75 = arith.constant dense<0.000000e+00> : vector<128x8xf32>
    %122 = tpu.matmul %119, %121, %cst_75 {dimension_numbers = #tpu.dot_dimension_numbers<[1], [0], [0], [1], [0, 0, 1, 1], [], []>} : vector<128x12xbf16>, vector<12x8xbf16>, vector<128x8xf32> -> vector<128x8xf32>
    %123 = arith.addf %117, %122 : vector<128x8xf32>
    %124 = vector.extract_strided_slice %74 {offsets = [2, 2, 0], sizes = [8, 16, 12], strides = [1, 1, 1]} : vector<10x18x12xbf16> to vector<8x16x12xbf16>
    %125 = vector.shape_cast %124 : vector<8x16x12xbf16> to vector<128x12xbf16>
    %c2_76 = arith.constant 2 : index
    %c2_77 = arith.constant 2 : index
    %c0_78 = arith.constant 0 : index
    %c0_79 = arith.constant 0 : index
    %126 = vector.load %arg6[%c2_76, %c2_77, %c0_78, %c0_79] : memref<3x3x12x8xbf16, #tpu.memory_space<vmem>>, vector<1x1x12x8xbf16>
    %127 = vector.shape_cast %126 : vector<1x1x12x8xbf16> to vector<12x8xbf16>
    %cst_80 = arith.constant dense<0.000000e+00> : vector<128x8xf32>
    %128 = tpu.matmul %125, %127, %cst_80 {dimension_numbers = #tpu.dot_dimension_numbers<[1], [0], [0], [1], [0, 0, 1, 1], [], []>} : vector<128x12xbf16>, vector<12x8xbf16>, vector<128x8xf32> -> vector<128x8xf32>
    %129 = arith.addf %123, %128 : vector<128x8xf32>
    %c0_81 = arith.constant 0 : index
    %c0_82 = arith.constant 0 : index
    %130 = vector.load %arg7[%c0_81, %c0_82] : memref<1x8xf32, #tpu.memory_space<vmem>>, vector<1x8xf32>
    %131 = vector.broadcast %130 : vector<1x8xf32> to vector<128x8xf32>
    %132 = arith.addf %129, %131 : vector<128x8xf32>
    %133 = vector.shape_cast %132 : vector<128x8xf32> to vector<1x8x16x8xf32>
    %134 = arith.truncf %133 : vector<1x8x16x8xf32> to vector<1x8x16x8xbf16>
    %c0_83 = arith.constant 0 : index
    %c0_84 = arith.constant 0 : index
    %c0_85 = arith.constant 0 : index
    %c0_86 = arith.constant 0 : index
    %135 = vector.load %arg8[%c0_83, %c0_84, %c0_85, %c0_86] : memref<1x8x16x8xbf16, #tpu.memory_space<vmem>>, vector<1x8x16x8xbf16>
    tpu.vector_store %arg8[%c0_83, %c0_84, %c0_85, %c0_86], %134 {strides = array<i32>} : memref<1x8x16x8xbf16, #tpu.memory_space<vmem>>, vector<1x8x16x8xbf16>,
    %cst_87 = arith.constant dense<0.000000e+00> : vector<8xf32>
    %136 = vector.multi_reduction <add>, %132, %cst_87 [0] : vector<128x8xf32> to vector<8xf32>
    %137 = vector.shape_cast %136 : vector<8xf32> to vector<1x8xf32>
    %138 = arith.mulf %132, %132 : vector<128x8xf32>
    %cst_88 = arith.constant dense<0.000000e+00> : vector<8xf32>
    %139 = vector.multi_reduction <add>, %138, %cst_88 [0] : vector<128x8xf32> to vector<8xf32>
    %140 = vector.shape_cast %139 : vector<8xf32> to vector<1x8xf32>
    %141 = tpu.concatenate %137, %140 in 0 : vector<1x8xf32>, vector<1x8xf32> -> vector<2x8xf32>
    %142 = vector.shape_cast %141 : vector<2x8xf32> to vector<1x1x2x8xf32>
    %c0_89 = arith.constant 0 : index
    %c0_90 = arith.constant 0 : index
    %c0_91 = arith.constant 0 : index
    %c0_92 = arith.constant 0 : index
    %143 = vector.load %arg9[%c0_89, %c0_90, %c0_91, %c0_92] : memref<1x1x2x8xf32, #tpu.memory_space<vmem>>, vector<1x1x2x8xf32>
    tpu.vector_store %arg9[%c0_89, %c0_90, %c0_91, %c0_92], %142 {strides = array<i32>} : memref<1x1x2x8xf32, #tpu.memory_space<vmem>>, vector<1x1x2x8xf32>,
    return
  }
  func.func @transform_0(%arg0: i32, %arg1: i32) -> (i32, i32, i32, i32) {
    %c0_i32 = arith.constant 0 : i32
    %c0_i32_0 = arith.constant 0 : i32
    %c0_i32_1 = arith.constant 0 : i32
    %c0_i32_2 = arith.constant 0 : i32
    return %arg0, %c0_i32, %c0_i32_0, %c0_i32_1 : i32, i32, i32, i32
  }
  func.func @transform_1(%arg0: i32, %arg1: i32) -> (i32, i32, i32, i32) {
    %c0_i32 = arith.constant 0 : i32
    %c0_i32_0 = arith.constant 0 : i32
    %c0_i32_1 = arith.constant 0 : i32
    %c0_i32_2 = arith.constant 0 : i32
    return %arg0, %c0_i32, %c0_i32_0, %c0_i32_1 : i32, i32, i32, i32
  }
  func.func @transform_2(%arg0: i32, %arg1: i32) -> (i32, i32, i32, i32) {
    %c0_i32 = arith.constant 0 : i32
    %c0_i32_0 = arith.constant 0 : i32
    %c0_i32_1 = arith.constant 0 : i32
    %c0_i32_2 = arith.constant 0 : i32
    %c0_i32_3 = arith.constant 0 : i32
    return %c0_i32, %c0_i32_0, %c0_i32_1, %c0_i32_2 : i32, i32, i32, i32
  }
  func.func @transform_3(%arg0: i32, %arg1: i32) -> (i32, i32) {
    %c0_i32 = arith.constant 0 : i32
    %c0_i32_0 = arith.constant 0 : i32
    %c0_i32_1 = arith.constant 0 : i32
    return %c0_i32, %c0_i32_0 : i32, i32
  }
  func.func @transform_4(%arg0: i32, %arg1: i32) -> (i32, i32, i32, i32) {
    %c0_i32 = arith.constant 0 : i32
    %c0_i32_0 = arith.constant 0 : i32
    %c0_i32_1 = arith.constant 0 : i32
    %c0_i32_2 = arith.constant 0 : i32
    %c0_i32_3 = arith.constant 0 : i32
    return %c0_i32, %c0_i32_0, %c0_i32_1, %c0_i32_2 : i32, i32, i32, i32
  }
  func.func @transform_5(%arg0: i32, %arg1: i32) -> (i32, i32) {
    %c0_i32 = arith.constant 0 : i32
    %c0_i32_0 = arith.constant 0 : i32
    %c0_i32_1 = arith.constant 0 : i32
    return %c0_i32, %c0_i32_0 : i32, i32
  }
  func.func @transform_6(%arg0: i32, %arg1: i32) -> (i32, i32, i32, i32) {
    %c0_i32 = arith.constant 0 : i32
    %c0_i32_0 = arith.constant 0 : i32
    %c0_i32_1 = arith.constant 0 : i32
    return %arg0, %arg1, %c0_i32, %c0_i32_0 : i32, i32, i32, i32
  }
  func.func @transform_7(%arg0: i32, %arg1: i32) -> (i32, i32, i32, i32) {
    %c0_i32 = arith.constant 0 : i32
    %c0_i32_0 = arith.constant 0 : i32
    %c0_i32_1 = arith.constant 0 : i32
    return %arg0, %arg1, %c0_i32, %c0_i32_0 : i32, i32, i32, i32
  }
}

module attributes {stable_mosaic.version = 11 : i64} {
  func.func @_bn_relu_kernel(%arg0: i32, %arg1: memref<16x128xbf16, #tpu.memory_space<vmem>>, %arg2: memref<1x128xf32, #tpu.memory_space<vmem>>, %arg3: memref<1x128xf32, #tpu.memory_space<vmem>>, %arg4: memref<16x128xf32, #tpu.memory_space<vmem>>) attributes {dimension_semantics = [#tpu.dimension_semantics<parallel>], iteration_bounds = array<i64: 2>, scalar_prefetch = 0 : i64, scratch_operands = 0 : i64, tpu.core_type = #tpu.core_type<tc>, window_params = [{transform_indices = @transform_0, window_bounds = array<i64: 16, 128>}, {pipeline_mode = #tpu.pipeline_mode<synchronous>, transform_indices = @transform_1, window_bounds = array<i64: 1, 128>}, {pipeline_mode = #tpu.pipeline_mode<synchronous>, transform_indices = @transform_2, window_bounds = array<i64: 1, 128>}, {transform_indices = @transform_3, window_bounds = array<i64: 16, 128>}]} {
    %c0 = arith.constant 0 : index
    %c0_0 = arith.constant 0 : index
    %0 = vector.load %arg1[%c0, %c0_0] : memref<16x128xbf16, #tpu.memory_space<vmem>>, vector<16x128xbf16>
    %1 = arith.extf %0 : vector<16x128xbf16> to vector<16x128xf32>
    %c0_1 = arith.constant 0 : index
    %c0_2 = arith.constant 0 : index
    %2 = vector.load %arg2[%c0_1, %c0_2] : memref<1x128xf32, #tpu.memory_space<vmem>>, vector<1x128xf32>
    %3 = vector.broadcast %2 : vector<1x128xf32> to vector<16x128xf32>
    %4 = arith.mulf %1, %3 : vector<16x128xf32>
    %c0_3 = arith.constant 0 : index
    %c0_4 = arith.constant 0 : index
    %5 = vector.load %arg3[%c0_3, %c0_4] : memref<1x128xf32, #tpu.memory_space<vmem>>, vector<1x128xf32>
    %6 = vector.broadcast %5 : vector<1x128xf32> to vector<16x128xf32>
    %7 = arith.addf %4, %6 : vector<16x128xf32>
    %cst = arith.constant 0.000000e+00 : f32
    %8 = vector.broadcast %cst : f32 to vector<16x128xf32>
    %9 = arith.maximumf %7, %8 : vector<16x128xf32>
    %c0_5 = arith.constant 0 : index
    %c0_6 = arith.constant 0 : index
    %10 = vector.load %arg4[%c0_5, %c0_6] : memref<16x128xf32, #tpu.memory_space<vmem>>, vector<16x128xf32>
    tpu.vector_store %arg4[%c0_5, %c0_6], %9 {strides = array<i32>} : memref<16x128xf32, #tpu.memory_space<vmem>>, vector<16x128xf32>,
    return
  }
  func.func @transform_0(%arg0: i32) -> (i32, i32) {
    %c0_i32 = arith.constant 0 : i32
    %c0_i32_0 = arith.constant 0 : i32
    return %arg0, %c0_i32 : i32, i32
  }
  func.func @transform_1(%arg0: i32) -> (i32, i32) {
    %c0_i32 = arith.constant 0 : i32
    %c0_i32_0 = arith.constant 0 : i32
    %c0_i32_1 = arith.constant 0 : i32
    return %c0_i32, %c0_i32_0 : i32, i32
  }
  func.func @transform_2(%arg0: i32) -> (i32, i32) {
    %c0_i32 = arith.constant 0 : i32
    %c0_i32_0 = arith.constant 0 : i32
    %c0_i32_1 = arith.constant 0 : i32
    return %c0_i32, %c0_i32_0 : i32, i32
  }
  func.func @transform_3(%arg0: i32) -> (i32, i32) {
    %c0_i32 = arith.constant 0 : i32
    %c0_i32_0 = arith.constant 0 : i32
    return %arg0, %c0_i32 : i32, i32
  }
}

</mosaic_0001>

<bundles_post_ra>
// kernel: tile.18
= control target key start
LH: loop header
LB: loop body
LE: loop exit
PB: predicated region body
PF: predicated region fallthrough
CT: control target
= control target key end

     0   :  { %s28_s0 = inlined_call_operand.vmem [shape: f32[8], index: 0, kind: input, shape index: {}]   ;;  %s29_s1 = inlined_call_operand.vmem [shape: f32[16,8], index: 1, kind: output, shape index: {}]  }
   0x1   :  { %v4_v0 = vld [vmem:[%s28_s0] ss:$0 sm:$0xff] }
   0x2   :  { %5 = vst [vmem:[%s29_s1] sm:$0xff] %v4_v0  ;;  %8 = vst [vmem:[%s29_s1 + $0x8] sm:$0xff] %v4_v0 }

// kernel: tile.19
= control target key start
LH: loop header
LB: loop body
LE: loop exit
PB: predicated region body
PF: predicated region fallthrough
CT: control target
= control target key end

     0   :  { %s131_s10 = smov 120   ;;  %s132_s11 = smov 104   ;;  %vm3_vm0 = vcmask 64512   ;;  %vm9_vm1 = vcmask 1048512   ;;  %vm15_vm2 = vcmask 982912   ;;  %vm21_vm3 = vcmask 917312   ;;  %s207_s0 = inlined_call_operand.vmem [shape: f32[16,8], index: 0, kind: input, shape index: {}]   ;;  %s208_s1 = inlined_call_operand.vmem [shape: f32[1,128], index: 1, kind: output, shape index: {}]  }
   0x1   :  { %v101_v0 = vld [vmem:[%s207_s0 + $0xf] sm:$0x1]   ;;  %v103_v1 = vld [vmem:[%s207_s0 + $0xd] sm:$0x1]   ;;  %v102_v2 = vld [vmem:[%s207_s0 + $0xe] sm:$0x1]  }
   0x2   :  { %7 = vrot.lane.b32.xlu0 %v101_v0, %s131_s10  ;;  %19 = vrot.lane.b32.xlu1 %v103_v1, %s132_s11  ;;  %v104_v3 = vld [vmem:[%s207_s0 + $0xc] sm:$0x1]   ;;  %s133_s16 = smov 112   ;;  %s134_s17 = smov 96   ;;  %v105_v4 = vld [vmem:[%s207_s0 + $0xb] sm:$0x1]  }
   0x3   :  { %v106_v5 = vld [vmem:[%s207_s0 + $0xa] sm:$0x1]   ;;  %v2_v6 = vld [vmem:[%s207_s0] sm:$0x1]   ;;  %s135_s24 = smov 88   ;;  %s136_s25 = smov 80  }
   0x4   :  { %4 = vst.msk [vmem:[#allocation0] sm:$0x1] %vm3_vm0, %v2_v6   ;;  %v107_v7 = vld [vmem:[%s207_s0 + $0x9] sm:$0x1]   ;;  %v108_v8 = vld [vmem:[%s207_s0 + $0x8] sm:$0x1]  }
   0x5   :  { %s137_s30 = smov 72   ;;  %s138_s2 = smov 64   ;;  %v109_v9 = vld [vmem:[%s207_s0 + $0x7] sm:$0x1]   ;;  %v110_v10 = vld [vmem:[%s207_s0 + $0x6] sm:$0x1]  }
   0x6   :  { %13 = vrot.lane.b32.xlu0 %v102_v2, %s133_s16  ;;  %25 = vrot.lane.b32.xlu1 %v104_v3, %s134_s17  ;;  %s139_s7 = smov 56   ;;  %s140_s8 = smov 48   ;;  %v111_v11 = vld [vmem:[%s207_s0 + $0x5] sm:$0x1]   ;;  %v112_v12 = vld [vmem:[%s207_s0 + $0x4] sm:$0x1]  }
   0x7   :  { %s141_s13 = smov 40   ;;  %s142_s14 = smov 32   ;;  %v113_v13 = vld [vmem:[%s207_s0 + $0x3] sm:$0x1]   ;;  %v114_v14 = vld [vmem:[%s207_s0 + $0x2] sm:$0x1]  }
   0x8   :  { %s143_s19 = smov 24   ;;  %s144_s20 = smov 16   ;;  %v115_v15 = vld [vmem:[%s207_s0 + $0x1] sm:$0x1]   ;;  %vm27_vm4 = vcmask 851712   ;;  %vm33_vm5 = vcmask 786112  }
   0x9   :  { %s145_s0 = smov 8   ;;  %vm39_vm6 = vcmask 720512   ;;  %vm45_vm7 = vcmask 654912   ;;  %vm51_vm8 = vcmask 589312   ;;  %vm57_vm9 = vcmask 523712  }
   0xa   :  { %31 = vrot.lane.b32.xlu0 %v105_v4, %s135_s24  ;;  %37 = vrot.lane.b32.xlu1 %v106_v5, %s136_s25  ;;  %vm63_vm10 = vcmask 458112   ;;  %vm69_vm11 = vcmask 392512   ;;  %vm75_vm12 = vcmask 326912   ;;  %vm81_vm13 = vcmask 261312  }
   0xb   :  { %vm87_vm14 = vcmask 195712   ;;  %vm93_vm15 = vcmask 130112  }
   0xe   :  { %43 = vrot.lane.b32.xlu0 %v107_v7, %s137_s30  ;;  %49 = vrot.lane.b32.xlu1 %v108_v8, %s138_s2 }
  0x12   :  { %55 = vrot.lane.b32.xlu0 %v109_v9, %s139_s7  ;;  %61 = vrot.lane.b32.xlu1 %v110_v10, %s140_s8 }
  0x16   :  { %67 = vrot.lane.b32.xlu0 %v111_v11, %s141_s13  ;;  %73 = vrot.lane.b32.xlu1 %v112_v12, %s142_s14 }
  0x1a   :  { %79 = vrot.lane.b32.xlu0 %v113_v13, %s143_s19  ;;  %85 = vrot.lane.b32.xlu1 %v114_v14, %s144_s20 }
  0x1e   :  { %91 = vrot.lane.b32.xlu0 %v115_v15, %s145_s0 }
  0x74   :  { %v8_v16 = vpop.permute.xlu0 %7   ;;  %v20_v17 = vpop.permute.xlu1 %19  }
  0x75   :  { %10 = vst.msk [vmem:[#allocation0] sm:$0x1] %vm9_vm1, %v8_v16  }
  0x78   :  { %v14_v18 = vpop.permute.xlu0 %13   ;;  %v26_v19 = vpop.permute.xlu1 %25  }
  0x79   :  { %16 = vst.msk [vmem:[#allocation0] sm:$0x1] %vm15_vm2, %v14_v18  }
  0x7a   :  { %22 = vst.msk [vmem:[#allocation0] sm:$0x1] %vm21_vm3, %v20_v17  }
  0x7b   :  { %28 = vst.msk [vmem:[#allocation0] sm:$0x1] %vm27_vm4, %v26_v19  }
  0x7c   :  { %v32_v20 = vpop.permute.xlu0 %31   ;;  %v38_v21 = vpop.permute.xlu1 %37  }
  0x7d   :  { %34 = vst.msk [vmem:[#allocation0] sm:$0x1] %vm33_vm5, %v32_v20  }
  0x7e   :  { %40 = vst.msk [vmem:[#allocation0] sm:$0x1] %vm39_vm6, %v38_v21  }
  0x80   :  { %v44_v22 = vpop.permute.xlu0 %43   ;;  %v50_v23 = vpop.permute.xlu1 %49  }
  0x81   :  { %46 = vst.msk [vmem:[#allocation0] sm:$0x1] %vm45_vm7, %v44_v22  }
  0x82   :  { %52 = vst.msk [vmem:[#allocation0] sm:$0x1] %vm51_vm8, %v50_v23  }
  0x84   :  { %v56_v24 = vpop.permute.xlu0 %55   ;;  %v62_v25 = vpop.permute.xlu1 %61  }
  0x85   :  { %58 = vst.msk [vmem:[#allocation0] sm:$0x1] %vm57_vm9, %v56_v24  }
  0x86   :  { %64 = vst.msk [vmem:[#allocation0] sm:$0x1] %vm63_vm10, %v62_v25  }
  0x88   :  { %v68_v26 = vpop.permute.xlu0 %67   ;;  %v74_v27 = vpop.permute.xlu1 %73  }
  0x89   :  { %70 = vst.msk [vmem:[#allocation0] sm:$0x1] %vm69_vm11, %v68_v26  }
  0x8a   :  { %76 = vst.msk [vmem:[#allocation0] sm:$0x1] %vm75_vm12, %v74_v27  }
  0x8c   :  { %v80_v28 = vpop.permute.xlu0 %79   ;;  %v86_v29 = vpop.permute.xlu1 %85  }
  0x8d   :  { %82 = vst.msk [vmem:[#allocation0] sm:$0x1] %vm81_vm13, %v80_v28  }
  0x8e   :  { %88 = vst.msk [vmem:[#allocation0] sm:$0x1] %vm87_vm14, %v86_v29  }
  0x90   :  { %v92_v30 = vpop.permute.xlu0 %91  }
  0x91   :  { %94 = vst.msk [vmem:[#allocation0] sm:$0x1] %vm93_vm15, %v92_v30  }
  0x98   :  { %v98_v31 = vld [vmem:[#allocation0] sm:$0x1] }
  0x99   :  { %100 = vst [vmem:[%s208_s1] sm:$0x1] %v98_v31 }

// kernel: decoder_block_forward.3
= control target key start
LH: loop header
LB: loop body
LE: loop exit
PB: predicated region body
PF: predicated region fallthrough
CT: control target
= control target key end

     0   :  { %s309_s12 = smov 0   ;;  %s332_s0 = inlined_call_operand.vmem [shape: bf16[32,128], index: 0, kind: input, shape index: {}]   ;;  %s333_s1 = inlined_call_operand.vmem [shape: f32[1,128], index: 1, kind: input, shape index: {}]   ;;  %s334_s2 = inlined_call_operand.vmem [shape: f32[1,128], index: 2, kind: input, shape index: {}]   ;;  %s335_s3 = inlined_call_operand.vmem [shape: f32[32,128], index: 3, kind: output, shape index: {}]  }
   0x1 LB: > { %s256_s13 = sadd.s32 4294967295, %s287_s12   ;;  %p260_p0 = scmp.ge.s32.totalorder %s287_s12, 1  ;;  %s287_s12 = sphi %s309_s12, %s13_s12  }
   0x2   : > { %p138_p1 = scmp.lt.s32.totalorder %s287_s12, 3 }
   0x4   : > { %p139_p2 = pnand %p260_p0, %p138_p1 }
   0x5   : > { %s261_s14 = sshll.u32 (!%p139_p2), %s256_s13, 1  ;;  %v265_v1 = vld [vmem:[%s333_s1] ss:$0 sm:$0xff] (!%p139_p2) }
   0x6   : > { %142 = sbr.rel (%p139_p2) target bundleno = 26 (0x1a), region = 32  ;;  %p163_p3 = scmp.lt.s32.totalorder (!%p139_p2), %s261_s14, 3  ;;  %v266_v4 = vld [vmem:[%s334_s2] ss:$0 sm:$0xff] (!%p139_p2) }
   0xd   : > { %s337_s14 = smov (!%p163_p3, %s261_s14), 3 }
   0xe   : > { %s262_s15 = sshll.u32 %s337_s14, 2  ;;  %s264_s23 = sshll.u32 %s337_s14, 3 }
   0xf   : > { %s166_s18 = scalar_lea.vmem %s332_s0, %s262_s15  ;;  %s172_s26 = scalar_lea.vmem %s335_s3, %s264_s23 }
  0x10   : > { %v270_v0 = vld [vmem:[%s166_s18] sm:$0xff]  }
  0x11   : > { %v271_v2 = vunpack.c.l.bf16 %v270_v0  ;;  %v272_v3 = vunpack.c.h.bf16 %v270_v0 }
  0x13   : > { %v185_v5 = vmul.f32 %v271_v2, %v265_v1  ;;  %v186_v6 = vmul.f32 %v272_v3, %v265_v1 }
  0x15   : > { %v194_v7 = vadd.f32 %v266_v4, %v185_v5  ;;  %v195_v8 = vadd.f32 %v266_v4, %v186_v6 }
  0x17   : > { %v196_v9 = vmax.f32 %v194_v7, 0.0  ;;  %v197_v10 = vmax.f32 %v195_v8, 0.0 }
  0x19   : > { %198 = vst [vmem:[%s172_s26] sm:$0xff] %v196_v9  ;;  %199 = vst [vmem:[%s172_s26 + $0x8] sm:$0xff] %v197_v10 }
  0x1a PF: > { %s13_s12 = sadd.s32 1, %s287_s12  }
  0x1b   : > { %p10_p4 = scmp.ge.s32.totalorder %s13_s12, 4  }
  0x1d   :  { %12 = sbr.rel (!%p10_p4) target bundleno = 1 (0x1), region = 62 }

// kernel: decoder_block_forward.2
= control target key start
LH: loop header
LB: loop body
LE: loop exit
PB: predicated region body
PF: predicated region fallthrough
CT: control target
= control target key end

     0   :  { %s6603_s24 = smov 0   ;;  %s6605_s25 = smov 0   ;;  %s8727_s0 = inlined_call_operand.vmem [shape: bf16[2,10,10,8], index: 0, kind: input, shape index: {}]   ;;  %s8728_s1 = inlined_call_operand.vmem [shape: bf16[2,18,18,4], index: 1, kind: input, shape index: {}]   ;;  %s8729_s2 = inlined_call_operand.vmem [shape: bf16[2,2,8,8], index: 2, kind: input, shape index: {}]   ;;  %s8730_s3 = inlined_call_operand.vmem [shape: f32[1,8], index: 3, kind: input, shape index: {}]   ;;  %s8731_s4 = inlined_call_operand.vmem [shape: bf16[3,3,12,8], index: 4, kind: input, shape index: {}]   ;;  %s8732_s5 = inlined_call_operand.vmem [shape: f32[1,8], index: 5, kind: input, shape index: {}]   ;;  %s8733_s6 = inlined_call_operand.vmem [shape: bf16[2,16,16,8], index: 6, kind: output, shape index: {0}]   ;;  %s8734_s7 = inlined_call_operand.vmem [shape: f32[2,2,2,8], index: 7, kind: output, shape index: {1}]  }
   0x1   :  { %s6607_s26 = smov 0   ;;  %s6609_s27 = smov 0  }
   0x2   :  { %s6611_s28 = smov 0  }
   0x3 LB: > { %s27_s29 = sadd.s32 1, %s6550_s26  ;;  %s30_s30 = sadd.s32 1, %s6554_s27  ;;  %s6558_s28 = sphi %s6611_s28, %s18_s28   ;;  %s6554_s27 = sphi %s6609_s27, %s8923_s27   ;;  %s6550_s26 = sphi %s6607_s26, %s8922_s26   ;;  %s6546_s25 = sphi %s6605_s25, %s8921_s25   ;;  %s6542_s24 = sphi %s6603_s24, %s8920_s24  }
   0x4   : > { %p28_p0 = scmp.ge.s32.totalorder %s27_s29, 2  ;;  %p5792_p1 = scmp.ge.s32.totalorder %s6558_s28, 1 }
   0x5   : > { %p266_p2 = scmp.lt.s32.totalorder %s6558_s28, 5 }
   0x6   : > { %s8925_s29 = smov (%p28_p0, %s27_s29), 0  ;;  %s8927_s30 = smov (!%p28_p0, %s30_s30), %s6554_s27 }
   0x7   : > { %p267_p3 = pnand %p5792_p1, %p266_p2  ;;  %p32_p4 = scmp.ge.s32.totalorder %s8927_s30, 2 }
   0x9   : > { %s8929_s30 = smov (%p32_p4, %s8927_s30), 0  ;;  %270 = sbr.rel (%p267_p3) target bundleno = 870 (0x366), region = 44 }
  0x10   : > { %v602_v0 = vld [vmem:[%s8729_s2] sm:$0xf]  ;;  %vm810_vm0 = vcmask 1043456   ;;  %p316_p5 = scmp.lt.s32.totalorder %s6546_s25, 1  ;;  %s5983_s10 = sshll.u32 %s6542_s24, 5  ;;  %v385_v1 = vlaneseq  ;;  %vm797_vm1 = vcmask 64512  }
  0x11   : > { %6432 = vmatprep.subr.msk.bf16.mxu1 %vm810_vm0, %v602_v0  ;;  %v812_v2 = vsel %vm810_vm0, %v602_v0, 0  ;;  %s5984_s11 = smul.u32 96, %s6542_s24  ;;  %v5824_v3 = vld [vmem:[%s8729_s2 + $0x4] sm:$0xf]  ;;  %v6560_v4 = vmov 1966171168  }
  0x12   : > { %6103 = vmatpush3.bf16.msra.mxu1 %v812_v2  ;;  %s8931_s25 = smov (!%p316_p5, %s6546_s25), 1  ;;  %v383_v5 = vunpack.c.l.s4 %v6560_v4  ;;  %v6647_v6 = vshrl.u32 %v385_v1, 7  ;;  %v6651_v7 = vsel %vm810_vm0, %v5824_v3, 0  ;;  %v5829_v8 = vld [vmem:[%s8729_s2 + $0x8] sm:$0xf]  ;;  %s6807_s15 = sshll.u32 %s6542_s24, 3 }
  0x13   : > { %6433 = vmatprep.subr.msk.bf16.mxu1 %vm810_vm0, %v5824_v3  ;;  %s6445_s16 = smul.u32 80, %s8931_s25  ;;  %6434 = vmatprep.subr.msk.bf16.mxu0 %vm810_vm0, %v5829_v8  ;;  %v1951_v10 = vsel %vm810_vm0, %v5829_v8, 0  ;;  %vm1897_vm2 = vcmask 1040384   ;;  %vm3777_vm6 = vcmask 1046528   ;;  %p329_p6 = scmp.lt.s32.totalorder %s6807_s15, 15 }
  0x14   : > { %v384_v9 = vunpack.c.0.s8 %v383_v5  ;;  %s6446_s17 = smul.u32 216, %s8931_s25  ;;  %6123 = vmatpush3.bf16.msra.mxu0 %v1951_v10  ;;  %p339_p7 = scmp.lt.s32.totalorder %s6542_s24, 1 }
  0x15   : > { %s320_s20 = scalar_lea.vmem %s8727_s0, %s6445_s16  ;;  %s5840_s16 = sadd.s32 4294967295, %s6807_s15 }
  0x16   : > { %s325_s23 = scalar_lea.vmem %s8728_s1, %s6446_s17  ;;  %s6666_s8 = scalar_lea.vmem %s320_s20, %s5983_s10  ;;  %v6669_v11 = vsub.s32 %v384_v9, %v6647_v6 }
  0x17   : > { %v5804_v12 = vld.sshfl [vmem:[%s6666_s8] sm:$0x33 pattern:$0x75316420]  ;;  %s6672_s9 = scalar_lea.vmem %s325_s23, %s5984_s11  ;;  %s6561_s10 = smov 8  }
  0x18   : > { %v5805_v13 = vld.sshfl [vmem:[%s6666_s8 + $0x4] sm:$0x1 pattern:$0x75316420]  ;;  %v381_v14 = vcombine.high %v5804_v12, %v5804_v12  ;;  %v388_v15 = vrot.slane %v5804_v12, %v6669_v11  ;;  %v6491_v24 = vld [vmem:[%s6672_s9 + $0xc] sm:$0xff]   ;;  %v6493_v25 = vld [vmem:[%s6672_s9 + $0x18] sm:$0xff]  }
  0x19   : > { %v5806_v16 = vld.sshfl [vmem:[%s6666_s8 + $0x8] sm:$0x33 pattern:$0x75316420]  ;;  %v411_v17 = vrot.slane %v5805_v13, %v6669_v11  ;;  %4025 = vrot.lane.b32.xlu0 %v6491_v24, %s6561_s10  ;;  %s8933_s15 = smov (!%p329_p6, %s6807_s15), 15  ;;  %s5797_s23 = sshll.u32 %s8931_s25, 5 }
  0x1a   : > { %v395_v18 = vrot.slane %v381_v14, %v6669_v11  ;;  %v419_v19 = vcombine.high %v5806_v16, %v5806_v16  ;;  %v426_v20 = vrot.slane %v5806_v16, %v6669_v11  ;;  %v5807_v21 = vld.sshfl [vmem:[%s6666_s8 + $0xc] sm:$0x1 pattern:$0x75316420]  ;;  %v6495_v60 = vld [vmem:[%s6672_s9 + $0x24] sm:$0xff]   ;;  %s5796_s22 = sshll.u32 %s8933_s15, 1 }
  0x1b   : > { %v5808_v22 = vld.sshfl [vmem:[%s6666_s8 + $0x10] sm:$0x33 pattern:$0x75316420]  ;;  %v449_v23 = vrot.slane %v5807_v21, %v6669_v11  ;;  %s8935_s24 = smov (!%p339_p7, %s6542_s24), 1  ;;  %s5799_s14 = sshll.u32 %s8931_s25, 1 }
  0x1c   : > { %v433_v26 = vrot.slane %v419_v19, %v6669_v11  ;;  %v434_v27 = vcombine.high %v426_v20, %v426_v20  ;;  %v610_v28 = vcombine.low %v388_v15, %v395_v18  ;;  %v5817_v29 = vcombine.high %v388_v15, %v395_v18  ;;  %v5809_v30 = vld.sshfl [vmem:[%s6666_s8 + $0x14] sm:$0x1 pattern:$0x75316420] }
  0x1d   : > { %v612_v31 = vcombine.low %v411_v17, %v426_v20  ;;  %v5810_v32 = vld.sshfl [vmem:[%s6666_s8 + $0x18] sm:$0x33 pattern:$0x75316420]  ;;  %v457_v33 = vcombine.high %v5808_v22, %v5808_v22  ;;  %v464_v34 = vrot.slane %v5808_v22, %v6669_v11  ;;  %v487_v35 = vrot.slane %v5809_v30, %v6669_v11  ;;  %4029 = vrot.lane.b32.xlu0 %v6493_v25, %s6561_s10 }
  0x1e   : > { %v613_v36 = vcombine.low %v433_v26, %v434_v27  ;;  %v620_v37 = vrot.slane %v610_v28, %v6669_v11  ;;  %v627_v38 = vrot.slane %v5817_v29, %v6669_v11  ;;  %v435_v39 = vcombine.high %v433_v26, %v433_v26  ;;  %v5811_v40 = vld.sshfl [vmem:[%s6666_s8 + $0x1c] sm:$0x1 pattern:$0x75316420]  ;;  %v5834_v28 = vld [vmem:[%s8729_s2 + $0xc] sm:$0xf] }
  0x1f   : > { %v634_v41 = vrot.slane %v612_v31, %v6669_v11  ;;  %v471_v42 = vrot.slane %v457_v33, %v6669_v11  ;;  %v502_v43 = vrot.slane %v5810_v32, %v6669_v11  ;;  %v5812_v44 = vld.sshfl [vmem:[%s6666_s8 + $0x20] sm:$0x33 pattern:$0x75316420]  ;;  %v495_v45 = vcombine.high %v5810_v32, %v5810_v32  ;;  %v6494_v33 = vld [vmem:[%s6672_s9 + $0x30] sm:$0xff]  }
  0x20   : > { %v641_v46 = vrot.slane %v613_v36, %v6669_v11  ;;  %v642_v47 = vcombine.low %v620_v37, %v627_v38  ;;  %v659_v48 = vcombine.low %v435_v39, %v449_v23  ;;  %v525_v49 = vrot.slane %v5811_v40, %v6669_v11  ;;  %v5813_v50 = vld.sshfl [vmem:[%s6666_s8 + $0x24] sm:$0x1 pattern:$0x75316420] }
  0x21   : > { %v660_v51 = vcombine.low %v464_v34, %v471_v42  ;;  %v5818_v52 = vcombine.high %v464_v34, %v471_v42  ;;  %v662_v53 = vcombine.low %v487_v35, %v502_v43  ;;  %v509_v54 = vrot.slane %v495_v45, %v6669_v11  ;;  %v5814_v55 = vld.sshfl [vmem:[%s6666_s8 + $0x28] sm:$0x33 pattern:$0x75316420]  ;;  %4033 = vrot.lane.b32.xlu0 %v6495_v60, %s6561_s10  ;;  %v6499_v34 = vld [vmem:[%s6672_s9 + $0x3c] sm:$0xff]   ;;  %v6509_v60 = vld [vmem:[%s6672_s9 + $0x6c] sm:$0xff]  }
  0x22   : > { %v643_v56 = vcombine.low %v634_v41, %v641_v46  ;;  %v650_v57 = vrot.slane %v642_v47, %v6669_v11  ;;  %v669_v58 = vrot.slane %v659_v48, %v6669_v11  ;;  %v510_v59 = vcombine.high %v502_v43, %v502_v43  ;;  %v5815_v1 = vld.sshfl [vmem:[%s6666_s8 + $0x2c] sm:$0x1 pattern:$0x75316420]  ;;  %s333_s8 = sadd.s32 %s5797_s23, %s5796_s22 }
  0x23   : > { %v676_v61 = vrot.slane %v660_v51, %v6669_v11  ;;  %v683_v62 = vrot.slane %v5818_v52, %v6669_v11  ;;  %v690_v63 = vrot.slane %v662_v53, %v6669_v11  ;;  %v511_v0 = vcombine.high %v509_v54, %v509_v54  ;;  %v6490_v2 = vld [vmem:[%s6672_s9 + $0x14] ss:$0 sps:$4 sm:$0x11]   ;;  %v6492_v14 = vld [vmem:[%s6672_s9 + $0x20] ss:$0 sps:$4 sm:$0x11]  }
  0x24   : > { %v657_v3 = vrot.slane %v643_v56, %v6669_v11  ;;  %v533_v4 = vcombine.high %v5812_v44, %v5812_v44  ;;  %v540_v5 = vrot.slane %v5812_v44, %v6669_v11  ;;  %v708_v8 = vcombine.low %v509_v54, %v510_v59  ;;  %4027 = vrot.lane.b32.xlu1 %v6490_v2, %s6561_s10  ;;  %v6497_v15 = vld [vmem:[%s6672_s9 + $0x2c] ss:$0 sps:$4 sm:$0x11]   ;;  %v6496_v44 = vld [vmem:[%s6672_s9 + $0x38] ss:$0 sps:$4 sm:$0x11]  }
  0x25   : > { %v691_v9 = vcombine.low %v669_v58, %v676_v61  ;;  %v692_v10 = vcombine.low %v683_v62, %v690_v63  ;;  %v709_v12 = vcombine.low %v511_v0, %v525_v49  ;;  %v563_v13 = vrot.slane %v5813_v50, %v6669_v11  ;;  %4035 = vrot.lane.b32.xlu0 %v6497_v15, %s6561_s10  ;;  %v6498_v52 = vld [vmem:[%s6672_s9 + $0x48] sm:$0xff]   ;;  %v6503_v53 = vld [vmem:[%s6672_s9 + $0x54] sm:$0xff]   ;;  %v6500_v54 = vld [vmem:[%s6672_s9 + $0x50] ss:$0 sps:$4 sm:$0x11]   ;;  %s5798_s11 = sshll.u32 %s333_s8, 2 }
  0x26   : > { %v6718_v16 = vcombine.low %v650_v57, %v657_v3  ;;  %v547_v17 = vrot.slane %v533_v4, %v6669_v11  ;;  %v718_v18 = vrot.slane %v708_v8, %v6669_v11  ;;  %v571_v19 = vcombine.high %v5814_v55, %v5814_v55  ;;  %v6502_v57 = vld [vmem:[%s6672_s9 + $0x60] sm:$0xff]   ;;  %v6504_v59 = vld [vmem:[%s6672_s9 + $0x68] ss:$0 sps:$4 sm:$0x11]   ;;  %s8616_s15 = scalar_lea.vmem %s8733_s6, %s5798_s11 }
  0x27   : > { %v699_v20 = vrot.slane %v691_v9, %v6669_v11  ;;  %v706_v21 = vrot.slane %v692_v10, %v6669_v11  ;;  %v725_v22 = vrot.slane %v709_v12, %v6669_v11  ;;  %v578_v23 = vrot.slane %v5814_v55, %v6669_v11  ;;  %v6505_v55 = vld [vmem:[%s6672_s9 + $0x5c] ss:$0 sps:$4 sm:$0x11]   ;;  %v6507_v58 = vld [vmem:[%s6672_s9] sm:$0xff]  }
  0x28   : > { %6104 = vmatprep.mubr.msk.bf16.mxu1 %vm797_vm1, %v6718_v16  ;;  %v710_v24 = vcombine.low %v540_v5, %v547_v17  ;;  %v5819_v25 = vcombine.high %v540_v5, %v547_v17  ;;  %v585_v26 = vrot.slane %v571_v19, %v6669_v11  ;;  %v601_v27 = vrot.slane %v5815_v1, %v6669_v11  ;;  %v6506_v61 = vld [vmem:[%s6672_s9 + $0x8] ss:$0 sps:$4 sm:$0x11]   ;;  %v6508_v62 = vld [vmem:[%s6672_s9 + $0x74] ss:$0 sps:$4 sm:$0x11]  }
  0x29   : > { %v6734_v29 = vcombine.low %v699_v20, %v706_v21  ;;  %v740_v30 = vcombine.low %v718_v18, %v725_v22  ;;  %v586_v31 = vcombine.high %v578_v23, %v578_v23  ;;  %v757_v32 = vcombine.low %v563_v13, %v578_v23  ;;  %6124 = vmatprep.mubr.msk.bf16.mxu0 %vm797_vm1, %v6718_v16  ;;  %v6803_v63 = vld [vmem:[%s8730_s3] ss:$0 sm:$0xff] }
  0x2a   : > { %v732_v35 = vrot.slane %v710_v24, %v6669_v11  ;;  %v739_v36 = vrot.slane %v5819_v25, %v6669_v11  ;;  %v587_v37 = vcombine.high %v585_v26, %v585_v26  ;;  %4031 = vrot.lane.b32.xlu1 %v6492_v14, %s6561_s10  ;;  %4041 = vrot.lane.b32.xlu0 %v6499_v34, %s6561_s10  ;;  %v2020_v56 = vsel %vm810_vm0, %v5834_v28, 0 }
  0x2b   : > { %6105 = vmatmul.mubr.msk.bf16.vlgmr.msra.gmra.mrb[0].mxu1 %vm797_vm1, %v6734_v29  ;;  %v758_v38 = vcombine.low %v585_v26, %v586_v31  ;;  %v766_v39 = vrot.slane %v757_v32, %v6669_v11  ;;  %6125 = vmatmul.mubr.msk.bf16.vlgmr.msra.gmra.mrb[0].mxu0 %vm797_vm1, %v6734_v29  ;;  %v748_v41 = vrot.slane %v740_v30, %v6669_v11  ;;  %v6562_v4 = vmov 1983009808  }
  0x2c   : > { %6113 = vmatpush3.bf16.msra.mxu1 %v6651_v7  ;;  %v741_v40 = vcombine.low %v732_v35, %v739_v36  ;;  %v759_v42 = vcombine.low %v587_v37, %v601_v27  ;;  %v6501_v7 = vld [vmem:[%s6672_s9 + $0x44] ss:$0 sps:$4 sm:$0x11]   ;;  %v3360_v5 = vunpack.c.l.s4 %v6562_v4  ;;  %v6820_v24 = vsub.s32 0, %v6647_v6 }
  0x2d   : > { %v773_v43 = vrot.slane %v758_v38, %v6669_v11  ;;  %6435 = vmatprep.subr.msk.bf16.mxu1 %vm810_vm0, %v5834_v28  ;;  %v6822_v25 = vstv %s5840_s16  ;;  %v3097_v26 = vadd.s32 16, %v6647_v6  ;;  %s342_s16 = sadd.s32 %s5799_s14, %s8935_s24 }
  0x2e   : > { %v755_v45 = vrot.slane %v741_v40, %v6669_v11  ;;  %v780_v46 = vrot.slane %v759_v42, %v6669_v11  ;;  %4037 = vrot.lane.b32.xlu1 %v6494_v33, %s6561_s10  ;;  %4043 = vrot.lane.b32.xlu0 %v6501_v7, %s6561_s10  ;;  %v3361_v20 = vunpack.c.0.s8 %v3360_v5  ;;  %8763 = vst [vmem:[#allocation3_spill] sm:$0xff] %v6822_v25  ;;  %v6839_v34 = vadd.s32 3, %v6822_v25  ;;  %s5800_s17 = sshll.u32 %s342_s16, 1 }
  0x2f   : > { %v781_v47 = vcombine.low %v766_v39, %v773_v43  ;;  %v6845_v39 = vadd.s32 4294967295, %v6647_v6  ;;  %v6850_v42 = vadd.s32 4294967295, %v3097_v26  ;;  %v6853_v43 = vadd.s32 5, %v6822_v25  ;;  %s344_s20 = scalar_lea.vmem %s8734_s7, %s5800_s17 }
  0x30   : > { %v756_v48 = vcombine.low %v748_v41, %v755_v45  ;;  %v795_v49 = vrot.slane %v780_v46, %v6669_v11  ;;  %v6836_v33 = vsub.s32 %v3361_v20, %v6647_v6  ;;  %vm3104_vm3 = vcmp.ge.s32.totalorder %v6839_v34, 0 }
  0x31   : > { %v788_v50 = vrot.slane %v781_v47, %v6669_v11  ;;  %8764 = vst [vmem:[#allocation4_spill] sm:$0xff] %v6850_v42  ;;  %vm3114_vm4 = vcmp.lt.s32.totalorder %v6839_v34, 16  ;;  %vm3131_vm5 = vcmp.ge.s32.totalorder %v6845_v39, 0  ;;  %vm3106_vm9 = vcmp.ge.s32.totalorder %v6853_v43, 0 }
  0x32   : > { %6108 = vmatprep.mubr.msk.bf16.mxu1 %vm797_vm1, %v756_v48  ;;  %6128 = vmatprep.mubr.msk.bf16.mxu0 %vm797_vm1, %v756_v48  ;;  %vm7132_vm7 = vmand %vm3104_vm3, %vm3114_vm4  ;;  %vm3116_vm10 = vcmp.lt.s32.totalorder %v6853_v43, 16  ;;  %vm3166_vm11 = vcmp.lt.s32.totalorder %v6850_v42, 16 }
  0x33   : > { %v796_v51 = vcombine.low %v788_v50, %v795_v49  ;;  %4039 = vrot.lane.b32.xlu1 %v6496_v44, %s6561_s10  ;;  %4049 = vrot.lane.b32.xlu0 %v6503_v53, %s6561_s10  ;;  %vm7143_vm8 = vmand %vm7132_vm7, %vm3131_vm5 }
  0x34   : > { %vm7410_vm12 = vmand %vm3106_vm9, %vm3116_vm10 }
  0x35   : > { %6109 = vmatmul.mubr.msk.bf16.gmra.mrb[4].mxu1 %vm797_vm1, %v796_v51  ;;  %6129 = vmatmul.mubr.msk.bf16.gmra.mrb[4].mxu0 %vm797_vm1, %v796_v51  ;;  %vm3178_vm13 = vmand %vm7132_vm7, %vm3166_vm11  ;;  %v8829_v42 = vld [vmem:[#allocation3_spill] sm:$0xff] }
  0x36   : > { %6114 = vmatprep.mubr.msk.bf16.mxu1 %vm797_vm1, %v6718_v16  ;;  %vm7431_vm14 = vmand %vm7410_vm12, %vm3131_vm5  ;;  %vm3111_vm9 = vcmp.lt.s32.totalorder %v8829_v42, 16 }
  0x37   : > { %4045 = vrot.lane.b32.xlu1 %v6498_v52, %s6561_s10  ;;  %4051 = vrot.lane.b32.xlu0 %v6505_v55, %s6561_s10 }
  0x3b   : > { %4047 = vrot.lane.b32.xlu1 %v6500_v54, %s6561_s10  ;;  %4021 = vrot.lane.b32.xlu0 %v6507_v58, %s6561_s10 }
  0x3d   : > { %6115 = vmatmul.mubr.msk.bf16.vlgmr.msra.gmra.mrb[8].mxu1 %vm797_vm1, %v6734_v29 }
  0x3e   : > { %6133 = vmatpush3.bf16.msra.mxu1 %v2020_v56  ;;  %6118 = vmatprep.mubr.msk.bf16.mxu1 %vm797_vm1, %v756_v48 }
  0x3f   : > { %4053 = vrot.lane.b32.xlu1 %v6502_v57, %s6561_s10  ;;  %4057 = vrot.lane.b32.xlu0 %v6509_v60, %s6561_s10 }
  0x43   : > { %4055 = vrot.lane.b32.xlu1 %v6504_v59, %s6561_s10 }
  0x45   : > { %6119 = vmatmul.mubr.msk.bf16.gmra.mrb[12].mxu1 %vm797_vm1, %v796_v51 }
  0x46   : > { %6134 = vmatprep.mubr.msk.bf16.mxu1 %vm797_vm1, %v6718_v16 }
  0x47   : > { %4023 = vrot.lane.b32.xlu1 %v6506_v61, %s6561_s10 }
  0x4b   : > { %4059 = vrot.lane.b32.xlu1 %v6508_v62, %s6561_s10 }
  0x4d   : > { %6135 = vmatmul.mubr.msk.bf16.vlgmr.msra.gmra.mrb[16].mxu1 %vm797_vm1, %v6734_v29 }
  0x4e   : > { %6138 = vmatprep.mubr.msk.bf16.mxu1 %vm797_vm1, %v756_v48 }
  0x55   : > { %6139 = vmatmul.mubr.msk.bf16.gmra.mrb[20].mxu1 %vm797_vm1, %v796_v51 }
  0xfe   : > { %v6106_v0 = vpop.f32.mrb[0].mxu1  ;;  %v6126_v1 = vpop.f32.mrb[0].mxu0 }
  0xff   : > { %v856_v2 = vadd.f32 %v6106_v0, %v6803_v63  ;;  %v848_v3 = vpop.f32.mrb[1].mxu1  ;;  %v1987_v8 = vpop.f32.mrb[1].mxu0  ;;  %v1996_v18 = vadd.f32 %v6126_v1, %v6803_v63 }
 0x100   : > { %v6107_v9 = vpop.f32.mrb[2].mxu1  ;;  %v6809_v10 = vpop.f32.mrb[2].mxu0  ;;  %v6830_v30 = vadd.f32 %v6803_v63, %v1987_v8 }
 0x101   : > { %v1003_v12 = vcombine.high %v856_v2, %v856_v2  ;;  %v1010_v13 = vrot.slane %v856_v2, %v6669_v11  ;;  %v859_v14 = vadd.f32 %v6107_v9, %v6803_v63  ;;  %v850_v15 = vpop.f32.mrb[3].mxu1  ;;  %v6813_v16 = vpop.f32.mrb[3].mxu0  ;;  %v2191_v29 = vcombine.high %v1996_v18, %v1996_v18 }
 0x102   : > { %8762 = vst [vmem:[#allocation2_spill] sm:$0xff] %v6813_v16  ;;  %v851_v17 = vadd.f32 %v6803_v63, %v850_v15  ;;  %v6856_v44 = vrot.slane %v1996_v18, %v6669_v11 }
 0x103   : > { %v1017_v19 = vrot.slane %v1003_v12, %v6669_v11  ;;  %v1052_v21 = vcombine.high %v859_v14, %v859_v14  ;;  %v1018_v23 = vcombine.high %v1010_v13, %v1010_v13  ;;  %v6826_v27 = vrot.slane %v1010_v13, %v6669_v11 }
 0x104   : > { %v954_v22 = vcombine.high %v851_v17, %v851_v17  ;;  %v1059_v28 = vrot.slane %v859_v14, %v6669_v11  ;;  %v961_v36 = vrot.slane %v851_v17, %v6669_v11  ;;  %v6861_v6 = vrot.slane %v2191_v29, %v6669_v11 }
 0x105   : > { %v1019_v31 = vcombine.high %v1017_v19, %v1017_v19  ;;  %v6833_v32 = vrot.slane %v1017_v19, %v6669_v11  ;;  %v1066_v35 = vrot.slane %v1052_v21, %v6669_v11  ;;  %v6848_v40 = vrot.slane %v1018_v23, %v6669_v11 }
 0x106   : > { %v968_v37 = vrot.slane %v954_v22, %v6669_v11  ;;  %v1067_v46 = vcombine.high %v1059_v28, %v1059_v28  ;;  %v6871_v50 = vrot.slane %v1059_v28, %v6669_v11  ;;  %v969_v54 = vcombine.high %v961_v36, %v961_v36 }
 0x107   : > { %v6866_v48 = vrot.slane %v1019_v31, %v6669_v11  ;;  %v1068_v53 = vcombine.high %v1066_v35, %v1066_v35  ;;  %v6878_v58 = vrot.slane %v1066_v35, %v6669_v11  ;;  %v6885_v62 = vrot.slane %v961_v36, %v6669_v11 }
 0x108   : > { %v6110_v38 = vpop.f32.mrb[4].mxu1  ;;  %v970_v55 = vcombine.high %v968_v37, %v968_v37  ;;  %v6882_v61 = vrot.slane %v1067_v46, %v6669_v11  ;;  %v6898_v9 = vrot.slane %v968_v37, %v6669_v11  ;;  %v6901_v12 = vrot.slane %v969_v54, %v6669_v11  ;;  %v6922_v29 = vpop.f32.mrb[4].mxu0 }
 0x109   : > { %v863_v41 = vpop.f32.mrb[5].mxu1  ;;  %v872_v51 = vadd.f32 %v6110_v38, %v6803_v63  ;;  %v6895_v8 = vrot.slane %v1068_v53, %v6669_v11  ;;  %8765 = vst [vmem:[#allocation5_spill] sm:$0xff] %v6922_v29  ;;  %v6997_v15 = vpop.f32.mrb[5].mxu0  ;;  %v2207_v43 = vcombine.high %v6861_v6, %v6861_v6 }
 0x10a   : > { %v6111_v7 = vpop.f32.mrb[6].mxu1  ;;  %v864_v56 = vadd.f32 %v6803_v63, %v863_v41  ;;  %v6904_v13 = vrot.slane %v970_v55, %v6669_v11  ;;  %8767 = vst [vmem:[#allocation7_spill] sm:$0xff] %v6997_v15  ;;  %v6131_v2 = vpop.f32.mrb[6].mxu0 }
 0x10b   : > { %v866_v52 = vpop.f32.mrb[7].mxu1  ;;  %v1199_v59 = vcombine.high %v872_v51, %v872_v51  ;;  %v1206_v60 = vrot.slane %v872_v51, %v6669_v11  ;;  %v875_v1 = vadd.f32 %v6111_v7, %v6803_v63 }
 0x10c   : > { %v1101_v0 = vcombine.high %v864_v56, %v864_v56  ;;  %v1108_v5 = vrot.slane %v864_v56, %v6669_v11  ;;  %v6910_v19 = vadd.f32 %v6803_v63, %v866_v52 }
 0x10d   : > { %v1213_v4 = vrot.slane %v1199_v59, %v6669_v11  ;;  %v1214_v17 = vcombine.high %v1206_v60, %v1206_v60  ;;  %v6917_v23 = vrot.slane %v1206_v60, %v6669_v11  ;;  %v6920_v26 = vrot.slane %v875_v1, %v6669_v11 }
 0x10e   : > { %v1115_v18 = vrot.slane %v1101_v0, %v6669_v11  ;;  %v1116_v36 = vcombine.high %v1108_v5, %v1108_v5  ;;  %v6928_v37 = vrot.slane %v1108_v5, %v6669_v11 }
 0x10f   : > { %v1215_v31 = vcombine.high %v1213_v4, %v1213_v4  ;;  %v6925_v35 = vrot.slane %v1213_v4, %v6669_v11  ;;  %v6941_v52 = vrot.slane %v1214_v17, %v6669_v11  ;;  %v6977_v17 = vrot.slane %v6920_v26, %v6669_v11 }
 0x110   : > { %v6116_v14 = vpop.f32.mrb[8].mxu1  ;;  %v1117_v53 = vcombine.high %v1115_v18, %v1115_v18  ;;  %v6944_v54 = vrot.slane %v1115_v18, %v6669_v11  ;;  %v6960_v5 = vrot.slane %v1116_v36, %v6669_v11  ;;  %v6990_v36 = vrot.slane %v6910_v19, %v6669_v11 }
 0x111   : > { %v917_v20 = vpop.f32.mrb[9].mxu1  ;;  %v925_v60 = vadd.f32 %v6116_v14, %v6803_v63  ;;  %v6955_v1 = vrot.slane %v1215_v31, %v6669_v11  ;;  %8766 = vst [vmem:[#allocation6_spill] sm:$0xff] %v6977_v17 }
 0x112   : > { %v6117_v28 = vpop.f32.mrb[10].mxu1  ;;  %v6971_v31 = vrot.slane %v1117_v53, %v6669_v11 }
 0x113   : > { %v6930_v38 = vpop.f32.mrb[11].mxu1  ;;  %v928_v0 = vadd.f32 %v6117_v28, %v6803_v63  ;;  %v1378_v18 = vcombine.high %v925_v60, %v925_v60  ;;  %v1385_v20 = vrot.slane %v925_v60, %v6669_v11 }
 0x115   : > { %v1427_v47 = vcombine.high %v928_v0, %v928_v0  ;;  %v1434_v14 = vrot.slane %v928_v0, %v6669_v11  ;;  %v1392_v60 = vrot.slane %v1378_v18, %v6669_v11  ;;  %v1393_v0 = vcombine.high %v1385_v20, %v1385_v20 }
 0x116   : > { %v1401_v56 = vrot.slane %v1385_v20, %v6669_v11 }
 0x117   : > { %v1441_v51 = vrot.slane %v1427_v47, %v6669_v11  ;;  %v1442_v46 = vcombine.high %v1434_v14, %v1434_v14  ;;  %v1450_v7 = vrot.slane %v1434_v14, %v6669_v11  ;;  %v1394_v18 = vcombine.high %v1392_v60, %v1392_v60 }
 0x118   : > { %v6966_v59 = vpop.f32.mrb[12].mxu1  ;;  %v1408_v41 = vrot.slane %v1392_v60, %v6669_v11  ;;  %v1415_v20 = vrot.slane %v1393_v0, %v6669_v11  ;;  %v1423_v47 = vcombine.high %v1401_v56, %v1401_v56  ;;  %v1674_v21 = vrot.slane %v1401_v56, %v6820_v24 }
 0x119   : > { %v6979_v4 = vpop.f32.mrb[13].mxu1  ;;  %v1443_v53 = vcombine.high %v1441_v51, %v1441_v51  ;;  %v1457_v3 = vrot.slane %v1441_v51, %v6669_v11  ;;  %v1464_v55 = vrot.slane %v1442_v46, %v6669_v11  ;;  %v1422_v14 = vrot.slane %v1394_v18, %v6669_v11 }
 0x11a   : > { %v6984_v28 = vpop.f32.mrb[14].mxu1  ;;  %v1424_v49 = vcombine.high %v1408_v41, %v1408_v41  ;;  %v1425_v57 = vcombine.high %v1415_v20, %v1415_v20  ;;  %v1678_v45 = vrot.slane %v1415_v20, %v6820_v24  ;;  %v1682_v60 = vrot.slane %v1423_v47, %v6820_v24 }
 0x11b   : > { %v6993_v22 = vpop.f32.mrb[15].mxu1  ;;  %v1690_v0 = vrot.slane %v1408_v41, %v6820_v24  ;;  %v7008_v15 = vsel %vm1897_vm2, %v6826_v27, %v1674_v21  ;;  %v1471_v56 = vrot.slane %v1443_v53, %v6669_v11  ;;  %v1426_v51 = vcombine.high %v1422_v14, %v1422_v14 }
 0x11c   : > { %v1686_v46 = vrot.slane %v1425_v57, %v6820_v24  ;;  %v1694_v2 = vrot.slane %v1422_v14, %v6820_v24  ;;  %v1698_v18 = vrot.slane %v1424_v49, %v6820_v24  ;;  %v1905_v20 = vsel %vm1897_vm2, %v6848_v40, %v1678_v45 }
 0x11d   : > { %v8768_v41 = vcombine.high %v6826_v27, %v6826_v27  ;;  %v1908_v53 = vsel %vm1897_vm2, %v6833_v32, %v1690_v0  ;;  %v1472_v47 = vcombine.high %v1450_v7, %v1450_v7  ;;  %v1702_v14 = vrot.slane %v1426_v51, %v6820_v24 }
 0x11e   : > { %v8770_v49 = vcombine.high %v6848_v40, %v6848_v40  ;;  %v1909_v27 = vsel %vm1897_vm2, %v6866_v48, %v1694_v2  ;;  %v8771_v45 = vcombine.high %v6833_v32, %v6833_v32  ;;  %v1473_v40 = vcombine.high %v1457_v3, %v1457_v3 }
 0x11f   : > { %v7022_v21 = vsel %vm1897_vm2, %v8768_v41, %v1682_v60  ;;  %v3417_v41 = vcombine.low %v7008_v15, %v1905_v20  ;;  %v3483_v16 = vcombine.low %v1908_v53, %v1909_v27  ;;  %v1475_v32 = vcombine.high %v1471_v56, %v1471_v56 }
 0x120   : > { %v7014_v29 = vpop.f32.mrb[16].mxu1  ;;  %v7033_v25 = vsel %vm1897_vm2, %v8770_v49, %v1686_v46  ;;  %v1910_v60 = vsel %vm1897_vm2, %v8771_v45, %v1698_v18  ;;  %v8772_v46 = vcombine.high %v6866_v48, %v6866_v48  ;;  %v1474_v49 = vcombine.high %v1464_v55, %v1464_v55 }
 0x121   : > { %v7026_v57 = vpop.f32.mrb[17].mxu1  ;;  %v1706_v18 = vrot.slane %v1450_v7, %v6820_v24  ;;  %v8773_v15 = vcombine.high %v6910_v19, %v6910_v19  ;;  %v1714_v7 = vrot.slane %v1472_v47, %v6820_v24  ;;  %v1722_v45 = vrot.slane %v1457_v3, %v6820_v24 }
 0x122   : > { %8769 = vst [vmem:[#allocation8_spill] sm:$0xff] %v7026_v57  ;;  %v7041_v0 = vpop.f32.mrb[18].mxu1  ;;  %v1911_v2 = vsel %vm1897_vm2, %v8772_v46, %v1702_v14  ;;  %v1710_v14 = vrot.slane %v1464_v55, %v6820_v24  ;;  %v1718_v27 = vrot.slane %v1474_v49, %v6820_v24  ;;  %v1726_v46 = vrot.slane %v1471_v56, %v6820_v24 }
 0x123   : > { %v7046_v57 = vpop.f32.mrb[19].mxu1  ;;  %v7059_v20 = vrot.slane %v8773_v15, %v6669_v11  ;;  %v3484_v48 = vcombine.low %v1910_v60, %v1911_v2  ;;  %v1730_v19 = vrot.slane %v1473_v40, %v6820_v24  ;;  %v1734_v15 = vrot.slane %v1475_v32, %v6820_v24 }
 0x124   : > { %v1912_v60 = vsel %vm1897_vm2, %v6871_v50, %v1706_v18  ;;  %v1913_v55 = vsel %vm1897_vm2, %v6882_v61, %v1710_v14  ;;  %v8774_v47 = vcombine.high %v6871_v50, %v6871_v50  ;;  %v8775_v3 = vcombine.high %v6882_v61, %v6882_v61 }
 0x125   : > { %v1916_v40 = vsel %vm1897_vm2, %v6878_v58, %v1722_v45  ;;  %v1917_v49 = vsel %vm1897_vm2, %v6895_v8, %v1726_v46  ;;  %v8776_v18 = vcombine.high %v6878_v58, %v6878_v58  ;;  %v8777_v14 = vcombine.high %v6895_v8, %v6895_v8 }
 0x126   : > { %v1914_v2 = vsel %vm1897_vm2, %v8774_v47, %v1714_v7  ;;  %v1915_v56 = vsel %vm1897_vm2, %v8775_v3, %v1718_v27  ;;  %v3500_v7 = vcombine.low %v1912_v60, %v1913_v55  ;;  %v3517_v47 = vcombine.low %v1916_v40, %v1917_v49  ;;  %v7122_v40 = vpop.f32.mrb[7].mxu0 }
 0x127   : > { %v7093_v50 = vsel %vm1897_vm2, %v8776_v18, %v1730_v19  ;;  %v7099_v61 = vsel %vm1897_vm2, %v8777_v14, %v1734_v15  ;;  %v3501_v27 = vcombine.low %v1914_v2, %v1915_v56  ;;  %v920_v58 = vadd.f32 %v6803_v63, %v6930_v38  ;;  %8779 = vst [vmem:[#allocation10_spill] sm:$0xff] %v7122_v40 }
 0x128   : > { %v7087_v32 = vpop.f32.mrb[20].mxu1  ;;  %v3491_v19 = vrot.slane %v3483_v16, %v6836_v33  ;;  %v3508_v18 = vrot.slane %v3500_v7, %v6836_v33  ;;  %v3498_v8 = vrot.slane %v3484_v48, %v6836_v33  ;;  %v941_v60 = vadd.f32 %v6966_v59, %v6803_v63 }
 0x129   : > { %v7101_v45 = vpop.f32.mrb[21].mxu1  ;;  %v3515_v15 = vrot.slane %v3501_v27, %v6836_v33  ;;  %v7116_v2 = vrot.slane %v3417_v41, %v6836_v33  ;;  %v1329_v56 = vcombine.high %v920_v58, %v920_v58  ;;  %v1336_v38 = vrot.slane %v920_v58, %v6669_v11 }
 0x12a   : > { %v6141_v3 = vpop.f32.mrb[22].mxu1  ;;  %v7120_v16 = vrot.slane %v3517_v47, %v6836_v33  ;;  %v3499_v49 = vcombine.low %v3491_v19, %v3498_v8  ;;  %v1574_v14 = vcombine.high %v941_v60, %v941_v60  ;;  %v1581_v7 = vrot.slane %v941_v60, %v6669_v11 }
 0x12b   : > { %v7113_v55 = vpop.f32.mrb[23].mxu1  ;;  %v3516_v48 = vcombine.low %v3508_v18, %v3515_v15  ;;  %v1343_v59 = vrot.slane %v1329_v56, %v6669_v11  ;;  %v1344_v27 = vcombine.high %v1336_v38, %v1336_v38  ;;  %v1352_v3 = vrot.slane %v1336_v38, %v6669_v11 }
 0x12c   : > { %8778 = vst [vmem:[#allocation9_spill] sm:$0xff] %v7113_v55  ;;  %v8737_v41 = vrot.slane %v7120_v16, 1  ;;  %v3793_v58 = vrot.slane %v3499_v49, 1  ;;  %v1588_v18 = vrot.slane %v1574_v14, %v6669_v11  ;;  %v1589_v8 = vcombine.high %v1581_v7, %v1581_v7 }
 0x12d   : > { %v3794_v19 = vrot.slane %v3516_v48, 1  ;;  %v1345_v15 = vcombine.high %v1343_v59, %v1343_v59  ;;  %v1359_v60 = vrot.slane %v1343_v59, %v6669_v11  ;;  %v1366_v56 = vrot.slane %v1344_v27, %v6669_v11 }
 0x12e   : > { %v1374_v38 = vcombine.high %v1352_v3, %v1352_v3  ;;  %v1590_v14 = vcombine.high %v1588_v18, %v1588_v18  ;;  %v1597_v59 = vrot.slane %v1581_v7, %v6669_v11  ;;  %v1604_v55 = vrot.slane %v1588_v18, %v6669_v11 }
 0x12f   : > { %v3795_v49 = vsel %vm3777_vm6, %v3793_v58, %v3794_v19  ;;  %v3797_v48 = vsel %vm3777_vm6, %v3794_v19, %v8737_v41  ;;  %v1373_v27 = vrot.slane %v1345_v15, %v6669_v11  ;;  %v1375_v3 = vcombine.high %v1359_v60, %v1359_v60 }
 0x130   : > { %v1376_v51 = vcombine.high %v1366_v56, %v1366_v56  ;;  %v1650_v46 = vrot.slane %v1374_v38, %v6820_v24  ;;  %v1658_v53 = vrot.slane %v1359_v60, %v6820_v24  ;;  %v3867_v40 = vsel %vm7143_vm8, %v3795_v49, 0.0 }
 0x131   : > { %v3868_v58 = vsel %vm7132_vm7, %v3797_v48, 0.0  ;;  %v1377_v19 = vcombine.high %v1373_v27, %v1373_v27  ;;  %v1662_v7 = vrot.slane %v1373_v27, %v6820_v24  ;;  %v1666_v15 = vrot.slane %v1375_v3, %v6820_v24  ;;  %vm3184_vm7 = vmand %vm7410_vm12, %vm3166_vm11 }
 0x132   : > { %v1654_v41 = vrot.slane %v1376_v51, %v6820_v24  ;;  %v8784_v56 = vcombine.high %v6885_v62, %v6885_v62  ;;  %v1900_v38 = vsel %vm1897_vm2, %v6898_v9, %v1658_v53  ;;  %v7169_v34 = vpack.c.bf16 %v3868_v58, %v3867_v40 }
 0x133   : > { %v1611_v49 = vrot.slane %v1589_v8, %v6669_v11  ;;  %v1670_v18 = vrot.slane %v1377_v19, %v6820_v24  ;;  %v8785_v51 = vcombine.high %v6901_v12, %v6901_v12  ;;  %v1901_v27 = vsel %vm1897_vm2, %v6904_v13, %v1662_v7 }
 0x134   : > { %v1898_v60 = vsel %vm1897_vm2, %v8784_v56, %v1650_v46  ;;  %v8786_v62 = vcombine.high %v6898_v9, %v6898_v9  ;;  %v3400_v40 = vcombine.low %v1900_v38, %v1901_v27  ;;  %v1618_v3 = vrot.slane %v1590_v14, %v6669_v11 }
 0x135   : > { %v1899_v48 = vsel %vm1897_vm2, %v8785_v51, %v1654_v41  ;;  %v933_v8 = vadd.f32 %v6803_v63, %v6979_v4  ;;  %v8787_v12 = vcombine.high %v6904_v13, %v6904_v13  ;;  %v1619_v58 = vcombine.high %v1597_v59, %v1597_v59 }
 0x136   : > { %v1902_v46 = vsel %vm1897_vm2, %v8786_v62, %v1666_v15  ;;  %v3399_v53 = vcombine.low %v1898_v60, %v1899_v48  ;;  %v1620_v19 = vcombine.high %v1604_v55, %v1604_v55  ;;  %v1621_v7 = vcombine.high %v1611_v49, %v1611_v49 }
 0x137   : > { %v1903_v41 = vsel %vm1897_vm2, %v8787_v12, %v1670_v18  ;;  %v3414_v9 = vrot.slane %v3400_v40, %v6836_v33  ;;  %v1622_v60 = vcombine.high %v1618_v3, %v1618_v3  ;;  %v1802_v38 = vrot.slane %v1597_v59, %v6820_v24 }
 0x138   : > { %v3407_v56 = vrot.slane %v3399_v53, %v6836_v33  ;;  %v3416_v15 = vcombine.low %v1902_v46, %v1903_v41  ;;  %v1806_v14 = vrot.slane %v1611_v49, %v6820_v24  ;;  %v1810_v4 = vrot.slane %v1619_v58, %v6820_v24 }
 0x139   : > { %v1814_v51 = vrot.slane %v1621_v7, %v6820_v24  ;;  %v1818_v48 = vrot.slane %v1604_v55, %v6820_v24  ;;  %v1822_v27 = vrot.slane %v1618_v3, %v6820_v24  ;;  %v1826_v62 = vrot.slane %v1620_v19, %v6820_v24 }
 0x13a   : > { %v3415_v13 = vcombine.low %v3407_v56, %v3414_v9  ;;  %v3424_v18 = vrot.slane %v3416_v15, %v6836_v33  ;;  %v1830_v46 = vrot.slane %v1622_v60, %v6820_v24  ;;  %v7203_v59 = vsel %vm1897_vm2, %v6917_v23, %v1802_v38 }
 0x13b   : > { %v7207_v49 = vsel %vm1897_vm2, %v6941_v52, %v1806_v14  ;;  %v8788_v55 = vcombine.high %v6917_v23, %v6917_v23  ;;  %v8790_v12 = vcombine.high %v6941_v52, %v6941_v52  ;;  %v7224_v58 = vsel %vm1897_vm2, %v6925_v35, %v1818_v48 }
 0x13c   : > { %v3432_v53 = vcombine.low %v3424_v18, %v7116_v2  ;;  %v3783_v40 = vrot.slane %v3415_v13, 1  ;;  %8792 = vst [vmem:[#allocation13_spill] sm:$0xff] %v7224_v58  ;;  %v7228_v2 = vsel %vm1897_vm2, %v6955_v1, %v1822_v27  ;;  %v8794_v23 = vcombine.high %v6925_v35, %v6925_v35 }
 0x13d   : > { %v7214_v3 = vsel %vm1897_vm2, %v8788_v55, %v1810_v4  ;;  %v7220_v41 = vsel %vm1897_vm2, %v8790_v12, %v1814_v51  ;;  %8793 = vst [vmem:[#allocation14_spill] sm:$0xff] %v7228_v2  ;;  %v8796_v52 = vcombine.high %v6955_v1, %v6955_v1  ;;  %v1476_v38 = vcombine.high %v933_v8, %v933_v8 }
 0x13e   : > { %8789 = vst [vmem:[#allocation11_spill] sm:$0xff] %v7214_v3  ;;  %8791 = vst [vmem:[#allocation12_spill] sm:$0xff] %v7220_v41  ;;  %v7234_v19 = vsel %vm1897_vm2, %v8794_v23, %v1826_v62  ;;  %v7242_v56 = vrot.slane %v3432_v53, 1  ;;  %v1483_v1 = vrot.slane %v933_v8, %v6669_v11  ;;  %v944_v14 = vadd.f32 %v6984_v28, %v6803_v63 }
 0x13f   : > { %8795 = vst [vmem:[#allocation15_spill] sm:$0xff] %v7234_v19  ;;  %v7240_v7 = vsel %vm1897_vm2, %v8796_v52, %v1830_v46  ;;  %v1148_v4 = vcombine.high %v6960_v5, %v6960_v5  ;;  %v8799_v13 = vcombine.high %v6920_v26, %v6920_v26  ;;  %v1490_v8 = vrot.slane %v1476_v38, %v6669_v11 }
 0x140   : > { %8797 = vst [vmem:[#allocation16_spill] sm:$0xff] %v7240_v7  ;;  %8798 = vst [vmem:[#allocation17_spill] sm:$0xff] %v7242_v56  ;;  %v7267_v48 = vsel %vm3777_vm6, %v3783_v40, %v7242_v56  ;;  %v1491_v27 = vcombine.high %v1483_v1, %v1483_v1  ;;  %v1499_v28 = vrot.slane %v1483_v1, %v6669_v11  ;;  %vm3101_vm8 = vcmp.ge.s32.totalorder %v8829_v42, 0 }
 0x141   : > { %v7263_v18 = vrot.slane %v8799_v13, %v6669_v11  ;;  %8800 = vst [vmem:[#allocation18_spill] sm:$0xff] %v7267_v48  ;;  %v1629_v62 = vrot.slane %v944_v14, %v6669_v11  ;;  %v1166_v46 = vcombine.high %v7059_v20, %v7059_v20  ;;  %v7276_v53 = vrot.slane %v6990_v36, %v6669_v11  ;;  %vm7984_vm10 = vmand %vm3101_vm8, %vm3111_vm9 }
 0x142   : > { %v7280_v26 = vrot.slane %v7059_v20, %v6669_v11  ;;  %v8801_v40 = vcombine.high %v6990_v36, %v6990_v36  ;;  %v1492_v12 = vcombine.high %v1490_v8, %v1490_v8  ;;  %v1506_v23 = vrot.slane %v1490_v8, %v6669_v11 }
 0x143   : > { %v1513_v52 = vrot.slane %v1491_v27, %v6669_v11  ;;  %v1521_v38 = vcombine.high %v1499_v28, %v1499_v28  ;;  %v1738_v1 = vrot.slane %v1499_v28, %v6820_v24  ;;  %v1630_v14 = vcombine.high %v1629_v62, %v1629_v62 }
 0x144   : > { %v7286_v55 = vrot.slane %v8801_v40, %v6669_v11  ;;  %v7292_v13 = vrot.slane %v1629_v62, %v6669_v11  ;;  %v936_v20 = vadd.f32 %v6803_v63, %v6993_v22  ;;  %v1520_v60 = vrot.slane %v1492_v12, %v6669_v11 }
 0x145   : > { %v1522_v36 = vcombine.high %v1506_v23, %v1506_v23  ;;  %v1523_v40 = vcombine.high %v1513_v52, %v1513_v52  ;;  %v1742_v35 = vrot.slane %v1513_v52, %v6820_v24  ;;  %v1746_v8 = vrot.slane %v1521_v38, %v6820_v24 }
 0x146   : > { %v1754_v27 = vrot.slane %v1506_v23, %v6820_v24  ;;  %v1920_v28 = vsel %vm1897_vm2, %v6928_v37, %v1738_v1  ;;  %v7303_v15 = vrot.slane %v1630_v14, %v6669_v11  ;;  %v1524_v62 = vcombine.high %v1520_v60, %v1520_v60 }
 0x147   : > { %v1750_v9 = vrot.slane %v1523_v40, %v6820_v24  ;;  %v1758_v22 = vrot.slane %v1520_v60, %v6820_v24  ;;  %v1762_v12 = vrot.slane %v1522_v36, %v6820_v24  ;;  %v1921_v52 = vsel %vm1897_vm2, %v6960_v5, %v1742_v35 }
 0x148   : > { %v8802_v38 = vcombine.high %v6928_v37, %v6928_v37  ;;  %v1924_v1 = vsel %vm1897_vm2, %v6944_v54, %v1754_v27  ;;  %v1525_v14 = vcombine.high %v936_v20, %v936_v20  ;;  %v8803_v60 = vcombine.high %v6944_v54, %v6944_v54 }
 0x149   : > { %v1923_v51 = vsel %vm1897_vm2, %v1148_v4, %v1750_v9  ;;  %v1925_v40 = vsel %vm1897_vm2, %v6971_v31, %v1758_v22  ;;  %v1532_v5 = vrot.slane %v936_v20, %v6669_v11  ;;  %v1194_v37 = vrot.slane %v1166_v46, %v6669_v11 }
 0x14a   : > { %v1922_v23 = vsel %vm1897_vm2, %v8802_v38, %v1746_v8  ;;  %v1926_v36 = vsel %vm1897_vm2, %v8803_v60, %v1762_v12  ;;  %v3568_v35 = vcombine.low %v1920_v28, %v1921_v52  ;;  %v3585_v38 = vcombine.low %v1924_v1, %v1925_v40 }
 0x14b   : > { %v3584_v8 = vcombine.low %v1922_v23, %v1923_v51  ;;  %v1195_v27 = vcombine.high %v7276_v53, %v7276_v53  ;;  %v1766_v9 = vrot.slane %v1524_v62, %v6820_v24  ;;  %v1834_v4 = vrot.slane %v7292_v13, %v6820_v24 }
 0x14c   : > { %v1838_v54 = vrot.slane %v7303_v15, %v6820_v24  ;;  %v1196_v46 = vcombine.high %v7280_v26, %v7280_v26  ;;  %v1197_v51 = vcombine.high %v7286_v55, %v7286_v55  ;;  %v3582_v20 = vrot.slane %v3568_v35, %v6836_v33 }
 0x14d   : > { %v1539_v28 = vrot.slane %v1525_v14, %v6669_v11  ;;  %v7342_v62 = vsel %vm1897_vm2, %v6977_v17, %v1834_v4  ;;  %v1540_v12 = vcombine.high %v1532_v5, %v1532_v5  ;;  %v8804_v52 = vcombine.low %v7093_v50, %v7099_v61 }
 0x14e   : > { %v7346_v22 = vsel %vm1897_vm2, %v7263_v18, %v1838_v54  ;;  %v1548_v14 = vrot.slane %v1532_v5, %v6669_v11  ;;  %v1198_v35 = vcombine.high %v1194_v37, %v1194_v37  ;;  %v8805_v54 = vcombine.high %v6971_v31, %v6971_v31 }
 0x14f   : > { %v3575_v23 = vrot.slane %v8804_v52, %v6836_v33  ;;  %v1541_v40 = vcombine.high %v1539_v28, %v1539_v28  ;;  %v1555_v60 = vrot.slane %v1539_v28, %v6669_v11  ;;  %v1562_v4 = vrot.slane %v1540_v12, %v6669_v11 }
 0x150   : > { %v1927_v56 = vsel %vm1897_vm2, %v8805_v54, %v1766_v9  ;;  %v1570_v61 = vcombine.high %v1548_v14, %v1548_v14  ;;  %v3592_v1 = vrot.slane %v3584_v8, %v6836_v33  ;;  %v1770_v5 = vrot.slane %v1548_v14, %v6820_v24 }
 0x151   : > { %v3583_v48 = vcombine.low %v3575_v23, %v3582_v20  ;;  %v1569_v50 = vrot.slane %v1541_v40, %v6669_v11  ;;  %v1571_v52 = vcombine.high %v1555_v60, %v1555_v60  ;;  %v1572_v7 = vcombine.high %v1562_v4, %v1562_v4 }
 0x152   : > { %v1774_v28 = vrot.slane %v1562_v4, %v6820_v24  ;;  %v1786_v19 = vrot.slane %v1555_v60, %v6820_v24  ;;  %v1778_v2 = vrot.slane %v1570_v61, %v6820_v24  ;;  %v7372_v23 = vsel %vm1897_vm2, %v7276_v53, %v1770_v5 }
 0x153   : > { %v1573_v12 = vcombine.high %v1569_v50, %v1569_v50  ;;  %v1790_v31 = vrot.slane %v1569_v50, %v6820_v24  ;;  %v1794_v9 = vrot.slane %v1571_v52, %v6820_v24  ;;  %v1782_v20 = vrot.slane %v1572_v7, %v6820_v24 }
 0x154   : > { %v7376_v8 = vsel %vm1897_vm2, %v7286_v55, %v1774_v28  ;;  %v7380_v40 = vsel %vm1897_vm2, %v7280_v26, %v1786_v19  ;;  %v7384_v60 = vsel %vm1897_vm2, %v1195_v27, %v1778_v2  ;;  %v3599_v26 = vrot.slane %v3585_v38, %v6836_v33  ;;  %v7489_v55 = vpop.permute.xlu0 %4025 }
 0x155   : > { %v1798_v14 = vrot.slane %v1573_v12, %v6820_v24  ;;  %v7387_v4 = vsel %vm1897_vm2, %v1194_v37, %v1790_v31  ;;  %v7390_v7 = vsel %vm1897_vm2, %v1196_v46, %v1794_v9  ;;  %v7393_v53 = vsel %vm1897_vm2, %v1197_v51, %v1782_v20 }
 0x156   : > { %v8806_v27 = vmov 0  ;;  %v3601_v46 = vcombine.low %v1926_v36, %v1927_v56  ;;  %v3600_v51 = vcombine.low %v3592_v1, %v3599_v26  ;;  %v3803_v56 = vrot.slane %v3583_v48, 1 }
 0x157   : > { %v7402_v2 = vsel %vm1897_vm2, %v1198_v35, %v1798_v14  ;;  %v8807_v27 = vsel %vm7410_vm12, 4294967295, %v8806_v27  ;;  %v2206_v35 = vcombine.high %v6856_v44, %v6856_v44  ;;  %v2100_v1 = vrot.slane %v6830_v30, %v6669_v11 }
 0x158   : > { %8808 = vst [vmem:[#allocation19_spill] sm:$0xff] %v8807_v27  ;;  %v7423_v54 = vrot.slane %v3601_v46, %v6836_v33  ;;  %v3804_v36 = vrot.slane %v3600_v51, 1  ;;  %v8812_v50 = vcombine.high %v6830_v30, %v6830_v30  ;;  %v8813_v52 = vrot.slane %v7120_v16, 1 }
 0x159   : > { %v2214_v12 = vrot.slane %v6856_v44, %v6669_v11  ;;  %v2221_v9 = vrot.slane %v6861_v6, %v6669_v11  ;;  %v2228_v30 = vrot.slane %v2206_v35, %v6669_v11  ;;  %v2235_v14 = vrot.slane %v2207_v43, %v6669_v11 }
 0x15a   : > { %8809 = vst [vmem:[#allocation20_spill] sm:$0xff] %v7423_v54  ;;  %v2107_v61 = vrot.slane %v8812_v50, %v6669_v11  ;;  %v7443_v5 = vsel %vm3178_vm13, %v8813_v52, 0.0  ;;  %v8742_v28 = vrot.slane %v7423_v54, 1  ;;  %v3805_v31 = vsel %vm3777_vm6, %v3803_v56, %v3804_v36  ;;  %vm8018_vm13 = vmand %vm7984_vm10, %vm3131_vm5 }
 0x15b   : > { %v3873_v20 = vsel %vm7431_vm14, %v3805_v31, 0.0  ;;  %v2065_v44 = vadd.f32 %v7014_v29, %v6803_v63  ;;  %v2108_v46 = vcombine.high %v2100_v1, %v2100_v1  ;;  %v2236_v56 = vcombine.high %v2214_v12, %v2214_v12  ;;  %v8814_v29 = vld [vmem:[#allocation8_spill] sm:$0xff] }
 0x15c   : > { %v3807_v16 = vsel %vm3777_vm6, %v3804_v36, %v8742_v28  ;;  %v2109_v51 = vcombine.high %v2107_v61, %v2107_v61  ;;  %v2237_v50 = vcombine.high %v2221_v9, %v2221_v9  ;;  %v2238_v52 = vcombine.high %v2228_v30, %v2228_v30  ;;  %8815 = vst [vmem:[#allocation8_spill] sm:$0xff] %v7489_v55 }
 0x15d   : > { %v3874_v6 = vsel %vm7410_vm12, %v3807_v16, 0.0  ;;  %v2564_v36 = vcombine.high %v2065_v44, %v2065_v44  ;;  %v2571_v47 = vrot.slane %v2065_v44, %v6669_v11  ;;  %v1999_v43 = vadd.f32 %v6809_v10, %v6803_v63  ;;  %vm3169_vm12 = vmand %vm7984_vm10, %vm3166_vm11 }
 0x15e   : > { %v7466_v35 = vpack.c.bf16 %v3874_v6, %v3873_v20  ;;  %v2057_v31 = vadd.f32 %v6803_v63, %v8814_v29  ;;  %v2239_v48 = vcombine.high %v2235_v14, %v2235_v14  ;;  %v7476_v20 = vrot.slane %v2100_v1, %v6669_v11 }
 0x15f   : > { %v2578_v28 = vrot.slane %v2564_v36, %v6669_v11  ;;  %v2579_v16 = vcombine.high %v2571_v47, %v2571_v47  ;;  %v2587_v38 = vrot.slane %v2571_v47, %v6669_v11  ;;  %v7479_v6 = vrot.slane %v2107_v61, %v6669_v11 }
 0x160   : > { %v7482_v44 = vrot.slane %v2108_v46, %v6669_v11  ;;  %v7485_v10 = vrot.slane %v2109_v51, %v6669_v11  ;;  %v2240_v47 = vcombine.high %v1999_v43, %v1999_v43  ;;  %v2247_v61 = vrot.slane %v1999_v43, %v6669_v11 }
 0x161   : > { %v2580_v19 = vcombine.high %v2578_v28, %v2578_v28  ;;  %v2594_v29 = vrot.slane %v2578_v28, %v6669_v11  ;;  %v2601_v36 = vrot.slane %v2579_v16, %v6669_v11  ;;  %v2609_v37 = vcombine.high %v2587_v38, %v2587_v38 }
 0x162   : > { %v2849_v1 = vrot.slane %v2587_v38, %v6820_v24  ;;  %v2466_v26 = vcombine.high %v2057_v31, %v2057_v31  ;;  %v2473_v55 = vrot.slane %v2057_v31, %v6669_v11 }
 0x163   : > { %v2608_v46 = vrot.slane %v2580_v19, %v6669_v11  ;;  %v2610_v58 = vcombine.high %v2594_v29, %v2594_v29  ;;  %v2611_v41 = vcombine.high %v2601_v36, %v2601_v36  ;;  %v2853_v51 = vrot.slane %v2601_v36, %v6820_v24 }
 0x164   : > { %v2857_v3 = vrot.slane %v2609_v37, %v6820_v24  ;;  %v2865_v28 = vrot.slane %v2594_v29, %v6820_v24  ;;  %v7498_v16 = vsel %vm1897_vm2, %v2214_v12, %v2849_v1  ;;  %v2254_v12 = vrot.slane %v2240_v47, %v6669_v11 }
 0x165   : > { %v2612_v38 = vcombine.high %v2608_v46, %v2608_v46  ;;  %v2861_v17 = vrot.slane %v2611_v41, %v6820_v24  ;;  %v2869_v43 = vrot.slane %v2608_v46, %v6820_v24  ;;  %v2873_v19 = vrot.slane %v2610_v58, %v6820_v24  ;;  %v7518_v58 = vpop.permute.xlu0 %4029 }
 0x166   : > { %v7505_v54 = vsel %vm1897_vm2, %v2228_v30, %v2853_v51  ;;  %v7508_v36 = vsel %vm1897_vm2, %v2236_v56, %v2857_v3  ;;  %v3052_v37 = vsel %vm1897_vm2, %v2221_v9, %v2865_v28  ;;  %8818 = vst [vmem:[#allocation23_spill] sm:$0xff] %v7518_v58  ;;  %v2255_v56 = vcombine.high %v2247_v61, %v2247_v61 }
 0x167   : > { %8816 = vst [vmem:[#allocation21_spill] sm:$0xff] %v7508_v36  ;;  %v2877_v29 = vrot.slane %v2612_v38, %v6820_v24  ;;  %v7514_v31 = vsel %vm1897_vm2, %v2238_v52, %v2861_v17  ;;  %v3053_v41 = vsel %vm1897_vm2, %v2235_v14, %v2869_v43  ;;  %v3054_v1 = vsel %vm1897_vm2, %v2237_v50, %v2873_v19  ;;  %v8819_v52 = vld [vmem:[#allocation2_spill] sm:$0xff] }
 0x168   : > { %8817 = vst [vmem:[#allocation22_spill] sm:$0xff] %v7514_v31  ;;  %v3525_v9 = vcombine.low %v3052_v37, %v3053_v41  ;;  %v2138_v47 = vcombine.high %v7476_v20, %v7476_v20  ;;  %v2139_v17 = vcombine.high %v7479_v6, %v7479_v6  ;;  %v1991_v50 = vadd.f32 %v6803_v63, %v8819_v52 }
 0x169   : > { %v3055_v14 = vsel %vm1897_vm2, %v2239_v48, %v2877_v29  ;;  %v2140_v46 = vcombine.high %v7482_v44, %v7482_v44  ;;  %v2141_v51 = vcombine.high %v7485_v10, %v7485_v10  ;;  %v7536_v38 = vrot.slane %v2247_v61, %v6669_v11 }
 0x16a   : > { %v3526_v28 = vcombine.low %v3054_v1, %v3055_v14  ;;  %v2256_v43 = vcombine.high %v2254_v12, %v2254_v12  ;;  %v7539_v19 = vrot.slane %v2254_v12, %v6669_v11  ;;  %v2480_v37 = vrot.slane %v2466_v26, %v6669_v11  ;;  %v7550_v12 = vpop.permute.xlu0 %4033 }
 0x16b   : > { %v2481_v48 = vcombine.high %v2473_v55, %v2473_v55  ;;  %v3533_v29 = vrot.slane %v3525_v9, %v6836_v33  ;;  %v7545_v52 = vrot.slane %v2255_v56, %v6669_v11  ;;  %v2489_v3 = vrot.slane %v2473_v55, %v6669_v11 }
 0x16c   : > { %v3540_v41 = vrot.slane %v3526_v28, %v6836_v33  ;;  %v2482_v1 = vcombine.high %v2480_v37, %v2480_v37  ;;  %v2496_v61 = vrot.slane %v2480_v37, %v6669_v11  ;;  %v2142_v30 = vcombine.high %v1991_v50, %v1991_v50 }
 0x16d   : > { %v2503_v14 = vrot.slane %v2481_v48, %v6669_v11  ;;  %v2511_v26 = vcombine.high %v2489_v3, %v2489_v3  ;;  %v2785_v31 = vrot.slane %v2489_v3, %v6820_v24  ;;  %v2149_v9 = vrot.slane %v1991_v50, %v6669_v11 }
 0x16e   : > { %v3541_v58 = vcombine.low %v3533_v29, %v3540_v41  ;;  %v2510_v28 = vrot.slane %v2482_v1, %v6669_v11  ;;  %v2512_v56 = vcombine.high %v2496_v61, %v2496_v61  ;;  %v2801_v37 = vrot.slane %v2496_v61, %v6820_v24 }
 0x16f   : > { %v2513_v36 = vcombine.high %v2503_v14, %v2503_v14  ;;  %v2789_v55 = vrot.slane %v2503_v14, %v6820_v24  ;;  %v2793_v27 = vrot.slane %v2511_v26, %v6820_v24  ;;  %v7560_v48 = vsel %vm1897_vm2, %v7476_v20, %v2785_v31 }
 0x170   : > { %v2068_v29 = vadd.f32 %v7041_v0, %v6803_v63  ;;  %v2514_v3 = vcombine.high %v2510_v28, %v2510_v28  ;;  %v2805_v41 = vrot.slane %v2510_v28, %v6820_v24  ;;  %v2809_v1 = vrot.slane %v2512_v56, %v6820_v24 }
 0x171   : > { %v2797_v50 = vrot.slane %v2513_v36, %v6820_v24  ;;  %v7569_v14 = vsel %vm1897_vm2, %v7482_v44, %v2789_v55  ;;  %v7572_v61 = vsel %vm1897_vm2, %v2138_v47, %v2793_v27  ;;  %v7576_v20 = vsel %vm1897_vm2, %v7479_v6, %v2801_v37  ;;  %v4036_v27 = vpop.permute.xlu0 %4035 }
 0x172   : > { %8820 = vst [vmem:[#allocation2_spill] sm:$0xff] %v7572_v61  ;;  %8821 = vst [vmem:[#allocation24_spill] sm:$0xff] %v7576_v20  ;;  %v2156_v63 = vrot.slane %v2142_v30, %v6669_v11  ;;  %v2813_v0 = vrot.slane %v2514_v3, %v6820_v24  ;;  %v7585_v31 = vsel %vm1897_vm2, %v7485_v10, %v2805_v41  ;;  %v7624_v41 = vrot.slane %v3541_v58, 1 }
 0x173   : > { %v7581_v36 = vsel %vm1897_vm2, %v2140_v46, %v2797_v50  ;;  %8823 = vst [vmem:[#allocation26_spill] sm:$0xff] %v7585_v31  ;;  %v7588_v44 = vsel %vm1897_vm2, %v2139_v17, %v2809_v1  ;;  %v2284_v47 = vrot.slane %v2256_v43, %v6669_v11  ;;  %v8825_v26 = vpack.c.bf16 %v7443_v5, %v7443_v5 }
 0x174   : > { %8822 = vst [vmem:[#allocation25_spill] sm:$0xff] %v7581_v36  ;;  %8824 = vst [vmem:[#allocation27_spill] sm:$0xff] %v7588_v44  ;;  %v8827_v17 = vcombine.low %v7372_v23, %v7376_v8  ;;  %v7610_v28 = vsel %vm1897_vm2, %v2141_v51, %v2813_v0  ;;  %v2157_v56 = vcombine.high %v2149_v9, %v2149_v9 }
 0x175   : > { %v7601_v10 = vsel %vm797_vm1, %v8825_v26, %v4036_v27  ;;  %8828 = vst [vmem:[#allocation29_spill] sm:$0xff] %v7610_v28  ;;  %v2158_v37 = vcombine.high %v2156_v63, %v2156_v63  ;;  %v7615_v3 = vrot.slane %v2149_v9, %v6669_v11  ;;  %v2613_v5 = vcombine.high %v2068_v29, %v2068_v29  ;;  %v7630_v9 = vld [vmem:[%s8730_s3] ss:$0 sm:$0xff] }
 0x176   : > { %8826 = vst [vmem:[#allocation28_spill] sm:$0xff] %v7601_v10  ;;  %v7607_v43 = vrot.slane %v8827_v17, %v6836_v33  ;;  %v2285_v50 = vcombine.high %v7536_v38, %v7536_v38  ;;  %v2286_v23 = vcombine.high %v7539_v19, %v7539_v19  ;;  %v2287_v8 = vcombine.high %v7545_v52, %v7545_v52 }
 0x177   : > { %v2620_v51 = vrot.slane %v2068_v29, %v6669_v11  ;;  %v2288_v1 = vcombine.high %v2284_v47, %v2284_v47  ;;  %v2627_v0 = vrot.slane %v2613_v5, %v6669_v11  ;;  %v2060_v27 = vadd.f32 %v7630_v9, %v7046_v57 }
 0x178   : > { %v7635_v26 = vrot.slane %v2156_v63, %v6669_v11  ;;  %v7638_v17 = vrot.slane %v2157_v56, %v6669_v11  ;;  %v7642_v55 = vrot.slane %v2158_v37, %v6669_v11  ;;  %v2187_v5 = vcombine.high %v7615_v3, %v7615_v3 }
 0x179   : > { %v2628_v29 = vcombine.high %v2620_v51, %v2620_v51  ;;  %v2636_v58 = vrot.slane %v2620_v51, %v6669_v11  ;;  %v2629_v46 = vcombine.high %v2627_v0, %v2627_v0  ;;  %v2643_v30 = vrot.slane %v2627_v0, %v6669_v11 }
 0x17a   : > { %v2515_v28 = vcombine.high %v2060_v27, %v2060_v27  ;;  %v2522_v37 = vrot.slane %v2060_v27, %v6669_v11 }
 0x17b   : > { %v2650_v57 = vrot.slane %v2628_v29, %v6669_v11  ;;  %v2658_v6 = vcombine.high %v2636_v58, %v2636_v58  ;;  %v2881_v63 = vrot.slane %v2636_v58, %v6820_v24  ;;  %v2657_v56 = vrot.slane %v2629_v46, %v6669_v11 }
 0x17c   : > { %v2659_v44 = vcombine.high %v2643_v30, %v2643_v30  ;;  %v2897_v51 = vrot.slane %v2643_v30, %v6820_v24  ;;  %v2188_v30 = vcombine.high %v7635_v26, %v7635_v26 }
 0x17d   : > { %v2660_v31 = vcombine.high %v2650_v57, %v2650_v57  ;;  %v2885_v20 = vrot.slane %v2650_v57, %v6820_v24  ;;  %v2889_v36 = vrot.slane %v2658_v6, %v6820_v24  ;;  %v3056_v0 = vsel %vm1897_vm2, %v7536_v38, %v2881_v63 }
 0x17e   : > { %v2661_v29 = vcombine.high %v2657_v56, %v2657_v56  ;;  %v2901_v61 = vrot.slane %v2657_v56, %v6820_v24  ;;  %v2905_v58 = vrot.slane %v2659_v44, %v6820_v24  ;;  %v7660_v46 = vsel %vm1897_vm2, %v7539_v19, %v2897_v51 }
 0x17f   : > { %v2893_v27 = vrot.slane %v2660_v31, %v6820_v24  ;;  %v3057_v6 = vsel %vm1897_vm2, %v7545_v52, %v2885_v20  ;;  %v3058_v57 = vsel %vm1897_vm2, %v2285_v50, %v2889_v36  ;;  %v2529_v31 = vrot.slane %v2515_v28, %v6669_v11 }
 0x180   : > { %v2909_v38 = vrot.slane %v2661_v29, %v6820_v24  ;;  %v7670_v63 = vsel %vm1897_vm2, %v2284_v47, %v2901_v61  ;;  %v7673_v44 = vsel %vm1897_vm2, %v2286_v23, %v2905_v58  ;;  %v3542_v19 = vcombine.low %v3056_v0, %v3057_v6 }
 0x181   : > { %v3059_v56 = vsel %vm1897_vm2, %v2287_v8, %v2893_v27  ;;  %v3091_v52 = vadd.s32 7, %v8829_v42  ;;  %v2189_v20 = vcombine.high %v7638_v17, %v7638_v17  ;;  %v2530_v47 = vcombine.high %v2522_v37, %v2522_v37 }
 0x182   : > { %v7683_v36 = vsel %vm1897_vm2, %v2288_v1, %v2909_v38  ;;  %v3543_v61 = vcombine.low %v3058_v57, %v3059_v56  ;;  %v2190_v50 = vcombine.high %v7642_v55, %v7642_v55  ;;  %v2531_v8 = vcombine.high %v2529_v31, %v2529_v31 }
 0x183   : > { %v2538_v0 = vrot.slane %v2522_v37, %v6669_v11  ;;  %v3550_v28 = vrot.slane %v3542_v19, %v6836_v33  ;;  %v2545_v58 = vrot.slane %v2529_v31, %v6669_v11  ;;  %v7694_v1 = vrot.slane %v2530_v47, %v6669_v11 }
 0x184   : > { %v3557_v29 = vrot.slane %v3543_v61, %v6836_v33  ;;  %v2559_v27 = vrot.slane %v2531_v8, %v6669_v11  ;;  %vm3108_vm15 = vcmp.ge.s32.totalorder %v3091_v52, 0  ;;  %vm3118_vm0 = vcmp.lt.s32.totalorder %v3091_v52, 16 }
 0x185   : > { %v2560_v6 = vcombine.high %v2538_v0, %v2538_v0  ;;  %v2817_v57 = vrot.slane %v2538_v0, %v6820_v24  ;;  %v2561_v56 = vcombine.high %v2545_v58, %v2545_v58  ;;  %v2562_v37 = vcombine.high %v7694_v1, %v7694_v1  ;;  %vm7771_vm3 = vmand %vm3108_vm15, %vm3118_vm0 }
 0x186   : > { %v3558_v38 = vcombine.low %v3550_v28, %v3557_v29  ;;  %v2563_v19 = vcombine.high %v2559_v27, %v2559_v27  ;;  %v2833_v31 = vrot.slane %v2545_v58, %v6820_v24  ;;  %v2837_v47 = vrot.slane %v2559_v27, %v6820_v24  ;;  %v7717_v27 = vpop.permute.xlu1 %4027  ;;  %vm7785_vm4 = vmand %vm7771_vm3, %vm3131_vm5 }
 0x187   : > { %v2825_v61 = vrot.slane %v2560_v6, %v6820_v24  ;;  %v2829_v8 = vrot.slane %v2562_v37, %v6820_v24  ;;  %v2841_v0 = vrot.slane %v2561_v56, %v6820_v24  ;;  %v7709_v28 = vsel %vm1897_vm2, %v7615_v3, %v2817_v57  ;;  %vm8109_vm8 = vmand %vm7771_vm3, %vm3166_vm11 }
 0x188   : > { %v7703_v51 = vrot.slane %v3558_v38, 1  ;;  %v2845_v29 = vrot.slane %v2563_v19, %v6820_v24  ;;  %v3044_v6 = vsel %vm1897_vm2, %v7635_v26, %v2833_v31  ;;  %v3045_v58 = vsel %vm1897_vm2, %v7642_v55, %v2837_v47  ;;  %v8835_v47 = vld [vmem:[#allocation5_spill] sm:$0xff] }
 0x189   : > { %v3042_v23 = vsel %vm1897_vm2, %v2187_v5, %v2825_v61  ;;  %v3043_v3 = vsel %vm1897_vm2, %v2189_v20, %v2829_v8  ;;  %v3046_v57 = vsel %vm1897_vm2, %v2188_v30, %v2841_v0  ;;  %v3442_v56 = vcombine.low %v3044_v6, %v3045_v58 }
 0x18a   : > { %v7722_v38 = vsel %vm3777_vm6, %v7624_v41, %v7703_v51  ;;  %v3047_v5 = vsel %vm1897_vm2, %v2190_v50, %v2845_v29  ;;  %v3441_v37 = vcombine.low %v3042_v23, %v3043_v3  ;;  %v8830_v26 = vcombine.low %v7384_v60, %v7393_v53  ;;  %v7777_v0 = vpop.permute.xlu1 %4031 }
 0x18b   : > { %v8831_v19 = vcombine.low %v7380_v40, %v7387_v4  ;;  %v7736_v41 = vrot.slane %v3442_v56, %v6836_v33  ;;  %v3458_v20 = vcombine.low %v3046_v57, %v3047_v5  ;;  %v8832_v30 = vcombine.low %v7390_v7, %v7402_v2 }
 0x18c   : > { %v3666_v55 = vrot.slane %v8830_v26, %v6836_v33  ;;  %v8833_v23 = vcombine.low %v7203_v59, %v7207_v49  ;;  %v7749_v53 = vrot.slane %v3441_v37, %v6836_v33  ;;  %v2081_v4 = vadd.f32 %v7630_v9, %v7087_v32 }
 0x18d   : > { %v3676_v61 = vrot.slane %v8831_v19, %v6836_v33  ;;  %v3683_v50 = vrot.slane %v8832_v30, %v6836_v33  ;;  %v2073_v31 = vadd.f32 %v7630_v9, %v7101_v45  ;;  %v8834_v7 = vcombine.low %v7498_v16, %v7505_v54 }
 0x18e   : > { %v7746_v60 = vrot.slane %v8833_v23, %v6836_v33  ;;  %v3667_v40 = vcombine.low %v7607_v43, %v3666_v55  ;;  %v7763_v59 = vrot.slane %v3458_v20, %v6836_v33  ;;  %v2012_v8 = vadd.f32 %v7630_v9, %v8835_v47  ;;  %v7821_v52 = vpop.permute.xlu1 %4037 }
 0x18f   : > { %v7760_v2 = vrot.slane %v8834_v7, %v6836_v33  ;;  %v3684_v49 = vcombine.low %v3676_v61, %v3683_v50  ;;  %v2766_v54 = vrot.slane %v2081_v4, %v6669_v11  ;;  %v2662_v16 = vcombine.high %v2073_v31, %v2073_v31 }
 0x190   : > { %v8760_v45 = vrot.slane %v7746_v60, 1  ;;  %v3813_v6 = vrot.slane %v3667_v40, 1  ;;  %v2669_v3 = vrot.slane %v2073_v31, %v6669_v11  ;;  %v2393_v37 = vrot.slane %v2012_v8, %v6669_v11 }
 0x191   : > { %v3814_v58 = vrot.slane %v3684_v49, 1  ;;  %v2767_v57 = vcombine.high %v2766_v54, %v2766_v54  ;;  %v2774_v56 = vrot.slane %v2766_v54, %v6669_v11  ;;  %v2676_v5 = vrot.slane %v2662_v16, %v6669_v11 }
 0x192   : > { %v1645_v26 = vcombine.high %v7292_v13, %v7292_v13  ;;  %v2677_v61 = vcombine.high %v2669_v3, %v2669_v3  ;;  %v1646_v20 = vcombine.high %v7303_v15, %v7303_v15  ;;  %v4160_v13 = vshll.u32 %v7601_v10, 16 }
 0x193   : > { %v3815_v55 = vsel %vm3777_vm6, %v3813_v6, %v3814_v58  ;;  %v3817_v19 = vsel %vm3777_vm6, %v3814_v58, %v8760_v45  ;;  %v2781_v23 = vrot.slane %v2767_v57, %v6669_v11  ;;  %v2678_v4 = vcombine.high %v2676_v5, %v2676_v5 }
 0x194   : > { %v3879_v30 = vsel %vm7785_vm4, %v3815_v55, 0.0  ;;  %v3880_v50 = vsel %vm7771_vm3, %v3817_v19, 0.0  ;;  %v2685_v31 = vrot.slane %v2669_v3, %v6669_v11  ;;  %v2977_v7 = vrot.slane %v2774_v56, %v6820_v24  ;;  %v4042_v56 = vpop.permute.xlu0 %4041 }
 0x195   : > { %v7807_v40 = vpack.c.bf16 %v3880_v50, %v3879_v30  ;;  %v2692_v49 = vrot.slane %v2676_v5, %v6669_v11  ;;  %v2394_v15 = vcombine.high %v2393_v37, %v2393_v37  ;;  %v2401_v47 = vrot.slane %v2393_v37, %v6669_v11 }
 0x196   : > { %v8840_v54 = vcombine.low %v7022_v21, %v7033_v25  ;;  %v7826_v6 = vsel %vm797_vm1, %v7169_v34, %v7550_v12  ;;  %v2699_v58 = vrot.slane %v2677_v61, %v6669_v11  ;;  %v7830_v3 = vrot.slane %v1645_v26, %v6820_v24 }
 0x197   : > { %v7833_v57 = vrot.slane %v1646_v20, %v6820_v24  ;;  %v2981_v25 = vrot.slane %v2781_v23, %v6820_v24  ;;  %v2706_v21 = vrot.slane %v2678_v4, %v6669_v11  ;;  %v8841_v5 = vcombine.low %v7342_v62, %v7346_v22 }
 0x198   : > { %v7819_v16 = vrot.slane %v8840_v54, %v6836_v33  ;;  %v7843_v34 = vrot.slane %v4160_v13, 1  ;;  %v7847_v12 = vsel %vm797_vm1, %v7466_v35, %v4042_v56  ;;  %v2707_v26 = vcombine.high %v2685_v31, %v2685_v31  ;;  %v8844_v35 = vld [vmem:[#allocation7_spill] sm:$0xff]  ;;  %v7869_v54 = vpop.permute.xlu1 %4039 }
 0x199   : > { %v7841_v37 = vrot.slane %v8841_v5, %v6836_v33  ;;  %v8843_v55 = vcombine.low %v7560_v48, %v7569_v14  ;;  %v2708_v61 = vcombine.high %v2692_v49, %v2692_v49  ;;  %v2408_v20 = vrot.slane %v2394_v15, %v6669_v11  ;;  %v8845_v14 = vld [vmem:[#allocation9_spill] sm:$0xff] }
 0x19a   : > { %8842 = vst [vmem:[#allocation3_spill] sm:$0xff] %v7843_v34  ;;  %v7857_v62 = vsel %vm1897_vm2, %v2401_v47, %v2977_v7  ;;  %v2709_v22 = vcombine.high %v2699_v58, %v2699_v58  ;;  %v2913_v30 = vrot.slane %v2685_v31, %v6820_v24  ;;  %v2917_v50 = vrot.slane %v2699_v58, %v6820_v24 }
 0x19b   : > { %v7853_v19 = vrot.slane %v8843_v55, %v6836_v33  ;;  %v2004_v23 = vadd.f32 %v7630_v9, %v8844_v35  ;;  %v2710_v13 = vcombine.high %v2706_v21, %v2706_v21  ;;  %v2929_v4 = vrot.slane %v2692_v49, %v6820_v24 }
 0x19c   : > { %v7865_v48 = vsel %vm1897_vm2, %v2408_v20, %v2981_v25  ;;  %v2076_v15 = vadd.f32 %v7630_v9, %v8845_v14  ;;  %v2921_v7 = vrot.slane %v2707_v26, %v6820_v24  ;;  %v2933_v56 = vrot.slane %v2706_v21, %v6820_v24 }
 0x19d   : > { %v2289_v47 = vcombine.high %v2004_v23, %v2004_v23  ;;  %v2296_v58 = vrot.slane %v2004_v23, %v6669_v11  ;;  %v2937_v49 = vrot.slane %v2708_v61, %v6820_v24  ;;  %v2925_v55 = vrot.slane %v2709_v22, %v6820_v24 }
 0x19e   : > { %v2711_v5 = vcombine.high %v2076_v15, %v2076_v15  ;;  %v2718_v25 = vrot.slane %v2076_v15, %v6669_v11  ;;  %v2941_v14 = vrot.slane %v2710_v13, %v6820_v24  ;;  %v8846_v23 = vcombine.low %v7673_v44, %v7683_v36  ;;  %v7896_v44 = vpop.permute.xlu1 %4045 }
 0x19f   : > { %v2303_v20 = vrot.slane %v2289_v47, %v6669_v11  ;;  %v2304_v35 = vcombine.high %v2296_v58, %v2296_v58  ;;  %v2312_v26 = vrot.slane %v2296_v58, %v6669_v11  ;;  %8847 = vst [vmem:[#allocation5_spill] sm:$0xff] %v7896_v44  ;;  %vm4237_vm4 = vcmask 1045504  }
 0x1a0   : > { %v3617_v45 = vrot.slane %v8846_v23, %v6836_v33  ;;  %v2725_v21 = vrot.slane %v2711_v5, %v6669_v11  ;;  %v2726_v61 = vcombine.high %v2718_v25, %v2718_v25  ;;  %v7890_v47 = vrot.slane %v2718_v25, %v6669_v11 }
 0x1a1   : > { %v2305_v31 = vcombine.high %v2303_v20, %v2303_v20  ;;  %v2319_v15 = vrot.slane %v2303_v20, %v6669_v11  ;;  %v2326_v22 = vrot.slane %v2304_v35, %v6669_v11  ;;  %v2334_v43 = vcombine.high %v2312_v26, %v2312_v26 }
 0x1a2   : > { %v3064_v58 = vsel %vm1897_vm2, %v2312_v26, %v2913_v30  ;;  %v2727_v13 = vcombine.high %v2725_v21, %v2725_v21  ;;  %v7894_v29 = vrot.slane %v2725_v21, %v6669_v11  ;;  %v7903_v10 = vrot.slane %v2726_v61, %v6669_v11  ;;  %v7927_v61 = vpop.permute.xlu0 %4043 }
 0x1a3   : > { %v2333_v36 = vrot.slane %v2305_v31, %v6669_v11  ;;  %v2335_v5 = vcombine.high %v2319_v15, %v2319_v15  ;;  %v2336_v23 = vcombine.high %v2326_v22, %v2326_v22  ;;  %v3065_v20 = vsel %vm1897_vm2, %v2326_v22, %v2917_v50 }
 0x1a4   : > { %v3066_v35 = vsel %vm1897_vm2, %v2334_v43, %v2921_v7  ;;  %v3068_v25 = vsel %vm1897_vm2, %v2319_v15, %v2929_v4  ;;  %v3610_v8 = vcombine.low %v3064_v58, %v3065_v20  ;;  %v7916_v7 = vrot.slane %v2727_v13, %v6669_v11 }
 0x1a5   : > { %v2337_v30 = vcombine.high %v2333_v36, %v2333_v36  ;;  %v3067_v26 = vsel %vm1897_vm2, %v2336_v23, %v2925_v55  ;;  %v3069_v21 = vsel %vm1897_vm2, %v2333_v36, %v2933_v56  ;;  %v7908_v44 = vsel %vm1897_vm2, %v2335_v5, %v2937_v49 }
 0x1a6   : > { %v3624_v43 = vrot.slane %v3610_v8, %v6836_v33  ;;  %v3626_v50 = vcombine.low %v3066_v35, %v3067_v26  ;;  %v3627_v4 = vcombine.low %v3068_v25, %v3069_v21  ;;  %v2821_v55 = vrot.slane %v7694_v1, %v6820_v24  ;;  %v7933_v1 = vpop.permute.xlu1 %4047 }
 0x1a7   : > { %v7921_v56 = vsel %vm1897_vm2, %v2337_v30, %v2941_v14  ;;  %v2756_v49 = vcombine.high %v7890_v47, %v7890_v47  ;;  %v2758_v34 = vcombine.high %v7903_v10, %v7903_v10  ;;  %8850 = vst [vmem:[#allocation7_spill] sm:$0xff] %v7933_v1  ;;  %v8851_v14 = vld [vmem:[#allocation20_spill] sm:$0xff]  ;;  %v2757_v5 = vcombine.high %v7894_v29, %v7894_v29 }
 0x1a8   : > { %v3625_v8 = vcombine.low %v3617_v45, %v3624_v43  ;;  %v3634_v15 = vrot.slane %v3626_v50, %v6836_v33  ;;  %v3641_v22 = vrot.slane %v3627_v4, %v6836_v33  ;;  %v8852_v13 = vrot.slane %v8851_v14, 1  ;;  %v8853_v4 = vld [vmem:[#allocation10_spill] sm:$0xff] }
 0x1a9   : > { %v2759_v23 = vcombine.high %v7916_v7, %v7916_v7  ;;  %v2945_v20 = vrot.slane %v7890_v47, %v6820_v24  ;;  %v2949_v35 = vrot.slane %v7903_v10, %v6820_v24  ;;  %v2953_v30 = vrot.slane %v2756_v49, %v6820_v24  ;;  %v8854_v47 = vld [vmem:[#allocation2_spill] sm:$0xff] }
 0x1aa   : > { %v7937_v36 = vsel %vm3184_vm7, %v8852_v13, 0.0  ;;  %v3642_v45 = vcombine.low %v3634_v15, %v3641_v22  ;;  %v3808_v25 = vrot.slane %v3625_v8, 1  ;;  %v2957_v26 = vrot.slane %v2758_v34, %v6820_v24  ;;  %v8855_v22 = vld [vmem:[#allocation25_spill] sm:$0xff]  ;;  %v8858_v14 = vld [vmem:[#allocation26_spill] sm:$0xff] }
 0x1ab   : > { %v2961_v21 = vrot.slane %v7894_v29, %v6820_v24  ;;  %v3041_v50 = vsel %vm1897_vm2, %v7638_v17, %v2821_v55  ;;  %v2007_v15 = vadd.f32 %v7630_v9, %v8853_v4  ;;  %v8856_v10 = vcombine.low %v8854_v47, %v8855_v22  ;;  %v8857_v29 = vld [vmem:[#allocation24_spill] sm:$0xff]  ;;  %v8860_v17 = vld [vmem:[#allocation27_spill] sm:$0xff]  ;;  %v8861_v55 = vld [vmem:[#allocation29_spill] sm:$0xff]  ;;  %v7974_v4 = vpop.permute.xlu0 %4049 }
 0x1ac   : > { %v7953_v43 = vrot.slane %v3642_v45, 1  ;;  %v2965_v49 = vrot.slane %v7916_v7, %v6820_v24  ;;  %v3391_v34 = vcombine.low %v7709_v28, %v3041_v50  ;;  %v8859_v13 = vcombine.low %v8857_v29, %v8858_v14 }
 0x1ad   : > { %v3372_v8 = vrot.slane %v8856_v10, %v6836_v33  ;;  %v8862_v58 = vcombine.low %v8860_v17, %v8861_v55  ;;  %v2338_v7 = vcombine.high %v2007_v15, %v2007_v15  ;;  %v2345_v50 = vrot.slane %v2007_v15, %v6669_v11 }
 0x1ae   : > { %v3382_v45 = vrot.slane %v8859_v13, %v6836_v33  ;;  %v7978_v47 = vsel %vm3777_vm6, %v3808_v25, %v7953_v43  ;;  %v2969_v10 = vrot.slane %v2757_v5, %v6820_v24  ;;  %v2973_v25 = vrot.slane %v2759_v23, %v6820_v24  ;;  %v8867_v5 = vld [vmem:[#allocation6_spill] sm:$0xff] }
 0x1af   : > { %v3389_v9 = vrot.slane %v8862_v58, %v6836_v33  ;;  %8863 = vst [vmem:[#allocation9_spill] sm:$0xff] %v7978_v47  ;;  %v3373_v22 = vcombine.low %v7853_v19, %v3372_v8  ;;  %v7990_v58 = vpop.permute.xlu1 %4053  ;;  %v3398_v29 = vrot.slane %v3391_v34, %v6836_v33  ;;  %v2352_v13 = vrot.slane %v2338_v7, %v6669_v11 }
 0x1b0   : > { %8866 = vst [vmem:[#allocation4_spill] sm:$0xff] %v7990_v58  ;;  %v2353_v17 = vcombine.high %v2345_v50, %v2345_v50  ;;  %v2361_v55 = vrot.slane %v2345_v50, %v6669_v11  ;;  %v8868_v24 = vcombine.high %v8867_v5, %v8867_v5  ;;  %v8869_v8 = vcombine.high %v7263_v18, %v7263_v18 }
 0x1b1   : > { %v3390_v14 = vcombine.low %v3382_v45, %v3389_v9  ;;  %v3778_v1 = vrot.slane %v3373_v22, 1  ;;  %v3781_v19 = vrot.slane %v3398_v29, 1  ;;  %v2354_v45 = vcombine.high %v2352_v13, %v2352_v13 }
 0x1b2   : > { %v1946_v23 = vsel %vm1897_vm2, %v8868_v24, %v7830_v3  ;;  %v1947_v34 = vsel %vm1897_vm2, %v8869_v8, %v7833_v57  ;;  %v2368_v9 = vrot.slane %v2352_v13, %v6669_v11  ;;  %v2375_v7 = vrot.slane %v2353_v17, %v6669_v11 }
 0x1b3   : > { %v3779_v15 = vrot.slane %v3390_v14, 1  ;;  %v2383_v50 = vcombine.high %v2361_v55, %v2361_v55  ;;  %v3072_v22 = vsel %vm1897_vm2, %v2361_v55, %v2945_v20  ;;  %v3093_v29 = vadd.s32 9, %v8829_v42  ;;  %v8025_v14 = vpop.permute.xlu0 %4051  ;;  %v8030_v24 = vpop.permute.xlu1 %4055 }
 0x1b4   : > { %8872 = vst [vmem:[#allocation19_spill] sm:$0xff] %v8025_v14  ;;  %v3860_v13 = vsel %vm3169_vm12, %v3781_v19, 0.0  ;;  %v2382_v17 = vrot.slane %v2354_v45, %v6669_v11  ;;  %v2384_v20 = vcombine.high %v2368_v9, %v2368_v9  ;;  %v2385_v55 = vcombine.high %v2375_v7, %v2375_v7  ;;  %8873 = vst [vmem:[#allocation20_spill] sm:$0xff] %v8030_v24 }
 0x1b5   : > { %v3780_v18 = vsel %vm3777_vm6, %v3778_v1, %v3779_v15  ;;  %v3782_v57 = vsel %vm3777_vm6, %v3779_v15, %v3781_v19  ;;  %v3899_v5 = vpack.c.bf16 %v7937_v36, %v7937_v36  ;;  %v3073_v8 = vsel %vm1897_vm2, %v2375_v7, %v2949_v35 }
 0x1b6   : > { %v3074_v1 = vsel %vm1897_vm2, %v2383_v50, %v2953_v30  ;;  %v3076_v15 = vsel %vm1897_vm2, %v2368_v9, %v2961_v21  ;;  %v2386_v58 = vcombine.high %v2382_v17, %v2382_v17  ;;  %v3075_v47 = vsel %vm1897_vm2, %v2385_v55, %v2957_v26  ;;  %v8880_v55 = vld [vmem:[#allocation15_spill] sm:$0xff] }
 0x1b7   : > { %v3077_v19 = vsel %vm1897_vm2, %v2382_v17, %v2965_v49  ;;  %v3858_v11 = vsel %vm8018_vm13, %v3780_v18, 0.0  ;;  %v3889_v45 = vpack.c.bf16 %v3860_v13, %v3860_v13  ;;  %v3078_v14 = vsel %vm1897_vm2, %v2384_v20, %v2969_v10  ;;  %v4022_v3 = vpop.permute.xlu0 %4021  ;;  %v8875_v18 = vld [vmem:[#allocation12_spill] sm:$0xff]  ;;  %v8878_v13 = vld [vmem:[#allocation14_spill] sm:$0xff] }
 0x1b8   : > { %v3693_v36 = vcombine.low %v3072_v22, %v3073_v8  ;;  %vm3110_vm14 = vcmp.ge.s32.totalorder %v3093_v29, 0  ;;  %v3079_v24 = vsel %vm1897_vm2, %v2386_v58, %v2973_v25  ;;  %v3694_v35 = vcombine.low %v3074_v1, %v3075_v47  ;;  %v8874_v22 = vld [vmem:[#allocation11_spill] sm:$0xff]  ;;  %v4024_v25 = vpop.permute.xlu1 %4023  ;;  %v6510_v8 = vld [vmem:[%s8731_s4 + $0x20] sm:$0x3f]  }
 0x1b9   : > { %v3710_v7 = vcombine.low %v3076_v15, %v3077_v19  ;;  %v3859_v30 = vsel %vm7984_vm10, %v3782_v57, 0.0  ;;  %v3711_v26 = vcombine.low %v3078_v14, %v3079_v24  ;;  %vm3120_vm15 = vcmp.lt.s32.totalorder %v3093_v29, 16  ;;  %v8877_v14 = vld [vmem:[#allocation13_spill] sm:$0xff]  ;;  %v8881_v24 = vld [vmem:[#allocation16_spill] sm:$0xff]  ;;  %v6511_v1 = vld [vmem:[%s8731_s4 + $0x8] sm:$0x3f]   ;;  %6440 = vmatprep.subr.msk.bf16.mxu0 %vm4237_vm4, %v6510_v8 }
 0x1ba   : > { %v3701_v21 = vrot.slane %v3693_v36, %v6836_v33  ;;  %v3888_v9 = vpack.c.bf16 %v3859_v30, %v3858_v11  ;;  %v3708_v49 = vrot.slane %v3694_v35, %v6836_v33  ;;  %v3769_v10 = vcombine.low %v1946_v23, %v1947_v34  ;;  %vm8082_vm0 = vmand %vm3110_vm14, %vm3120_vm15  ;;  %6436 = vmatprep.subr.msk.bf16.mxu1 %vm4237_vm4, %v6511_v1 }
 0x1bb   : > { %v3718_v50 = vrot.slane %v3710_v7, %v6836_v33  ;;  %v8876_v58 = vcombine.low %v8874_v22, %v8875_v18  ;;  %v3725_v28 = vrot.slane %v3711_v26, %v6836_v33  ;;  %v8879_v17 = vcombine.low %v8877_v14, %v8878_v13  ;;  %vm8099_vm7 = vmand %vm8082_vm0, %vm3131_vm5  ;;  %v8891_v14 = vld [vmem:[#allocation21_spill] sm:$0xff]  ;;  %v8892_v13 = vld [vmem:[#allocation22_spill] sm:$0xff] }
 0x1bc   : > { %v8052_v57 = vsel %vm797_vm1, %v3888_v9, %v4022_v3  ;;  %v8882_v23 = vcombine.low %v8880_v55, %v8881_v24  ;;  %v8070_v15 = vsel %vm797_vm1, %v3899_v5, %v7927_v61  ;;  %v8073_v19 = vsel %vm797_vm1, %v3889_v45, %v4024_v25  ;;  %v8090_v45 = vld [vmem:[%s8731_s4 + $0x28] sm:$0x3f]  }
 0x1bd   : > { %v3743_v47 = vrot.slane %v8876_v58, %v6836_v33  ;;  %v3750_v20 = vrot.slane %v8879_v17, %v6836_v33  ;;  %v3709_v11 = vcombine.low %v3701_v21, %v3708_v49  ;;  %v4126_v36 = vshll.u32 %v8052_v57, 16 }
 0x1be   : > { %v3760_v34 = vrot.slane %v8882_v23, %v6836_v33  ;;  %v3726_v35 = vcombine.low %v3718_v50, %v3725_v28  ;;  %v8077_v7 = vrot.slane %v3769_v10, %v6836_v33  ;;  %v3085_v5 = vadd.s32 1, %v8829_v42 }
 0x1bf   : > { %v3751_v30 = vcombine.low %v3743_v47, %v3750_v20  ;;  %v3818_v9 = vrot.slane %v3709_v11, 1  ;;  %v4128_v3 = vrot.slane %v4126_v36, 1  ;;  %v4130_v22 = vshll.u32 %v8073_v19, 16 }
 0x1c0   : > { %v3768_v26 = vcombine.low %v3760_v34, %v7841_v37  ;;  %v8092_v21 = vrot.slane %v3726_v35, 1  ;;  %v3826_v37 = vrot.slane %v8077_v7, 1  ;;  %v4796_v18 = vsel %vm4237_vm4, %v6510_v8, 0  ;;  %v8150_v8 = vld [vmem:[%s8731_s4] sm:$0x3f]  }
 0x1c1   : > { %v3823_v49 = vrot.slane %v3751_v30, 1  ;;  %vm3102_vm9 = vcmp.ge.s32.totalorder %v3085_v5, 0  ;;  %vm3112_vm10 = vcmp.lt.s32.totalorder %v3085_v5, 16  ;;  %v4124_v47 = vshrl.u32 %v8052_v57, 16  ;;  %6215 = vmatpush3.bf16.msra.mxu0 %v4796_v18  ;;  %v8896_v30 = vld [vmem:[#allocation18_spill] sm:$0xff]  ;;  %v8898_v5 = vld [vmem:[#allocation17_spill] sm:$0xff] }
 0x1c2   : > { %v3824_v50 = vrot.slane %v3768_v26, 1  ;;  %v8117_v58 = vsel %vm3777_vm6, %v3818_v9, %v8092_v21  ;;  %vm8124_vm3 = vmand %vm3102_vm9, %vm3112_vm10  ;;  %v8893_v17 = vcombine.low %v8891_v14, %v8892_v13  ;;  %v3786_v34 = vrot.slane %v7819_v16, 1  ;;  %6441 = vmatprep.subr.msk.bf16.mxu0 %vm4237_vm4, %v8090_v45 }
 0x1c3   : > { %vm8140_vm12 = vmand %vm8124_vm3, %vm3131_vm5  ;;  %v4180_v11 = vshll.u32 %v8070_v15, 16  ;;  %v4129_v36 = vor.u32 %v4128_v3, %v4124_v47  ;;  %v8897_v26 = vcombine.low %v7763_v59, %v7760_v2  ;;  %v4239_v3 = vsel %vm4237_vm4, %v6511_v1, 0 }
 0x1c4   : > { %v3825_v25 = vsel %vm3777_vm6, %v3823_v49, %v3824_v50  ;;  %v3827_v32 = vsel %vm3777_vm6, %v3824_v50, %v3826_v37  ;;  %v3482_v20 = vrot.slane %v8893_v17, %v6836_v33  ;;  %vm3172_vm13 = vmand %vm8124_vm3, %vm3166_vm11  ;;  %v3861_v16 = vsel %vm8140_vm12, %v8896_v30, 0.0  ;;  %6143 = vmatpush3.bf16.msra.mxu1 %v4239_v3 }
 0x1c5   : > { %v3885_v55 = vsel %vm8099_vm7, %v3825_v25, 0.0  ;;  %v3886_v24 = vsel %vm8082_vm0, %v3827_v32, 0.0  ;;  %v3789_v9 = vrot.slane %v8897_v26, 1  ;;  %v3787_v29 = vsel %vm3777_vm6, %v8898_v5, %v3786_v34  ;;  %6437 = vmatprep.subr.msk.bf16.mxu1 %vm4237_vm4, %v8150_v8  ;;  %vm3196_vm7 = vmand %vm8082_vm0, %vm3166_vm11  ;;  %v4058_v5 = vpop.permute.xlu0 %4057 }
 0x1c6   : > { %v8153_v35 = vpack.c.bf16 %v3886_v24, %v3885_v55  ;;  %v3863_v49 = vsel %vm3172_vm13, %v3786_v34, 0.0  ;;  %v8899_v50 = vcombine.low %v7660_v46, %v7670_v63  ;;  %v8900_v47 = vcombine.low %v7749_v53, %v7736_v41 }
 0x1c7   : > { %v4132_v32 = vrot.slane %v4130_v22, 1  ;;  %v3862_v2 = vsel %vm8124_vm3, %v3787_v29, 0.0  ;;  %v8901_v59 = vcombine.low %v7857_v62, %v7865_v48  ;;  %v8902_v14 = vrot.slane %v7746_v60, 1  ;;  %v8903_v60 = vld [vmem:[#allocation8_spill] sm:$0xff] }
 0x1c8   : > { %v8172_v18 = vrot.slane %v8899_v50, %v6836_v33  ;;  %v3788_v25 = vrot.slane %v8900_v47, 1  ;;  %v3890_v63 = vpack.c.bf16 %v3862_v2, %v3861_v16  ;;  %vm4123_vm14 = vsmask.f32 7424 }
 0x1c9   : > { %v8183_v1 = vrot.slane %v8901_v59, %v6836_v33  ;;  %v8189_v46 = vsel %vm8109_vm8, %v8902_v14, 0.0  ;;  %v3891_v41 = vpack.c.bf16 %v3863_v49, %v3863_v49  ;;  %vm4212_vm15 = vcmask 97280  }
 0x1ca   : > { %v4133_v53 = vsel %vm4123_vm14, %v4129_v36, %v4132_v32  ;;  %v3086_v22 = vadd.s32 2, %v8829_v42  ;;  %v8198_v62 = vsel %vm797_vm1, %v7807_v40, %v7974_v4  ;;  %v8202_v48 = vsel %vm797_vm1, %v3890_v63, %v8903_v60 }
 0x1cb   : > { %6144 = vmatprep.mubr.msk.bf16.mxu1 %vm4212_vm15, %v4133_v53  ;;  %v3790_v10 = vsel %vm3777_vm6, %v3788_v25, %v3789_v9  ;;  %v3791_v28 = vrot.slane %v3482_v20, 1  ;;  %v3903_v13 = vpack.c.bf16 %v8189_v46, %v8189_v46  ;;  %v8214_v40 = vsel %vm797_vm1, %v3891_v41, %v7717_v27  ;;  %v8907_v25 = vld [vmem:[#allocation23_spill] sm:$0xff] }
 0x1cc   : > { %v4136_v4 = vshll.u32 %v8202_v48, 16  ;;  %vm3103_vm8 = vcmp.ge.s32.totalorder %v3086_v22, 0  ;;  %v3821_v17 = vrot.slane %v8183_v1, 1  ;;  %v4140_v55 = vshll.u32 %v8214_v40, 16 }
 0x1cd   : > { %vm3113_vm9 = vcmp.lt.s32.totalorder %v3086_v22, 16  ;;  %v3792_v20 = vsel %vm3777_vm6, %v3789_v9, %v3791_v28  ;;  %v8904_v24 = vcombine.low %v7908_v44, %v7921_v56  ;;  %v4134_v23 = vshrl.u32 %v8202_v48, 16 }
 0x1ce   : > { %v4138_v27 = vrot.slane %v4136_v4, 1  ;;  %vm3123_vm0 = vmand %vm3103_vm8, %vm3113_vm9  ;;  %v4156_v34 = vshll.u32 %v7826_v6, 16  ;;  %v8230_v36 = vsel %vm3196_vm7, %v3826_v37, 0.0  ;;  %v4142_v30 = vrot.slane %v4140_v55, 1 }
 0x1cf   : > { %v8224_v61 = vrot.slane %v8904_v24, %v6836_v33  ;;  %vm3140_vm10 = vmand %vm3123_vm0, %vm3131_vm5  ;;  %v3865_v16 = vsel %vm3123_vm0, %v3792_v20, 0.0  ;;  %v3088_v26 = vadd.s32 4, %v8829_v42  ;;  %v3801_v9 = vrot.slane %v8172_v18, 1 }
 0x1d0   : > { %v4139_v44 = vor.u32 %v4138_v27, %v4134_v23  ;;  %vm3175_vm3 = vmand %vm3123_vm0, %vm3166_vm11  ;;  %v3864_v33 = vsel %vm3140_vm10, %v3790_v10, 0.0  ;;  %v4158_v56 = vrot.slane %v4156_v34, 1  ;;  %v4154_v3 = vshrl.u32 %v7826_v6, 16 }
 0x1d1   : > { %v3866_v29 = vsel %vm3175_vm3, %v3791_v28, 0.0  ;;  %v3892_v7 = vpack.c.bf16 %v3865_v16, %v3864_v33  ;;  %vm3105_vm12 = vcmp.ge.s32.totalorder %v3088_v26, 0  ;;  %vm3115_vm13 = vcmp.lt.s32.totalorder %v3088_v26, 16  ;;  %v8911_v33 = vld [vmem:[#allocation9_spill] sm:$0xff] }
 0x1d2   : > { %v4143_v37 = vsel %vm4123_vm14, %v4139_v44, %v4142_v30  ;;  %v3893_v49 = vpack.c.bf16 %v3866_v29, %v3866_v29  ;;  %vm8240_vm7 = vmand %vm3105_vm12, %vm3115_vm13  ;;  %v3802_v47 = vsel %vm3777_vm6, %v7703_v51, %v3801_v9  ;;  %v3907_v18 = vpack.c.bf16 %v8230_v36, %v8230_v36  ;;  %v8910_v30 = vld [vmem:[#allocation3_spill] sm:$0xff] }
 0x1d3   : > { %6216 = vmatprep.mubr.msk.bf16.mxu0 %vm4212_vm15, %v4143_v37  ;;  %6145 = vmatmul.mubr.msk.bf16.vlgmr.msra.gmra.mrb[24].mxu1 %vm4212_vm15, %v4143_v37  ;;  %v8252_v32 = vsel %vm797_vm1, %v3892_v7, %v8907_v25  ;;  %vm3146_vm8 = vmand %vm8240_vm7, %vm3131_vm5  ;;  %v3871_v2 = vsel %vm8240_vm7, %v3802_v47, 0.0  ;;  %v3090_v51 = vadd.s32 6, %v8829_v42  ;;  %v8263_v59 = vsel %vm797_vm1, %v8153_v35, %v4058_v5 }
 0x1d4   : > { %v8267_v14 = vsel %vm797_vm1, %v3893_v49, %v7777_v0  ;;  %v4146_v63 = vshll.u32 %v8252_v32, 16  ;;  %v4159_v41 = vor.u32 %v4158_v56, %v4154_v3  ;;  %vm3181_vm9 = vmand %vm8240_vm7, %vm3166_vm11  ;;  %v3870_v22 = vsel %vm3146_vm8, %v7722_v38, 0.0 }
 0x1d5   : > { %v4150_v53 = vshll.u32 %v8267_v14, 16  ;;  %v3872_v60 = vsel %vm3181_vm9, %v3801_v9, 0.0  ;;  %v4176_v35 = vshll.u32 %v7847_v12, 16  ;;  %v4144_v10 = vshrl.u32 %v8252_v32, 16 }
 0x1d6   : > { %v4148_v28 = vrot.slane %v4146_v63, 1  ;;  %v3896_v0 = vpack.c.bf16 %v3871_v2, %v3870_v22  ;;  %v3897_v4 = vpack.c.bf16 %v3872_v60, %v3872_v60  ;;  %v4928_v55 = vsel %vm4237_vm4, %v8090_v45, 0  ;;  %v8912_v2 = vld [vmem:[#allocation5_spill] sm:$0xff] }
 0x1d7   : > { %vm3107_vm0 = vcmp.ge.s32.totalorder %v3090_v51, 0  ;;  %vm3117_vm10 = vcmp.lt.s32.totalorder %v3090_v51, 16  ;;  %v3811_v20 = vrot.slane %v8224_v61, 1  ;;  %v4152_v23 = vrot.slane %v4150_v53, 1 }
 0x1d8   : > { %v4149_v24 = vor.u32 %v4148_v28, %v4144_v10  ;;  %v8283_v38 = vsel %vm797_vm1, %v3896_v0, %v7821_v52  ;;  %v8287_v27 = vsel %vm797_vm1, %v3897_v4, %v7869_v54  ;;  %vm8289_vm3 = vmand %vm3107_vm0, %vm3117_vm10  ;;  %v8295_v45 = vsel %vm4123_vm14, %v4159_v41, %v8910_v30  ;;  %v8308_v54 = vld [vmem:[%s8731_s4 + $0x30] sm:$0x3f]   ;;  %v4060_v41 = vpop.permute.xlu1 %4059 }
 0x1d9   : > { %v4166_v61 = vshll.u32 %v8283_v38, 16  ;;  %v4170_v16 = vshll.u32 %v8287_v27, 16  ;;  %vm3152_vm12 = vmand %vm8289_vm3, %vm3131_vm5  ;;  %v3812_v52 = vsel %vm3777_vm6, %v7953_v43, %v3811_v20  ;;  %v4178_v44 = vrot.slane %v4176_v35, 1  ;;  %v8351_v10 = vld [vmem:[%s8731_s4 + $0x10] sm:$0x3f]  }
 0x1da   : > { %v8311_v26 = vsel %vm4123_vm14, %v4149_v24, %v4152_v23  ;;  %vm3187_vm13 = vmand %vm8289_vm3, %vm3166_vm11  ;;  %v3876_v56 = vsel %vm3152_vm12, %v8911_v33, 0.0  ;;  %v3877_v9 = vsel %vm8289_vm3, %v3812_v52, 0.0  ;;  %v4164_v43 = vshrl.u32 %v8283_v38, 16  ;;  %v8916_v23 = vld [vmem:[#allocation19_spill] sm:$0xff] }
 0x1db   : > { %6148 = vmatprep.mubr.msk.bf16.mxu1 %vm4212_vm15, %v8311_v26  ;;  %6217 = vmatmul.mubr.msk.bf16.vlgmr.msra.gmra.mrb[8].mxu0 %vm4212_vm15, %v8311_v26  ;;  %v4168_v5 = vrot.slane %v4166_v61, 1  ;;  %v3878_v29 = vsel %vm3187_vm13, %v3811_v20, 0.0  ;;  %v3900_v7 = vpack.c.bf16 %v3877_v9, %v3876_v56  ;;  %v5171_v37 = vshll.u32 %v8263_v59, 16  ;;  %v8917_v56 = vld [vmem:[#allocation4_spill] sm:$0xff] }
 0x1dc   : > { %6233 = vmatpush3.bf16.msra.mxu0 %v4928_v55  ;;  %6220 = vmatprep.mubr.msk.bf16.mxu0 %vm4212_vm15, %v8295_v45  ;;  %v4174_v49 = vshrl.u32 %v7847_v12, 16  ;;  %v3901_v3 = vpack.c.bf16 %v3878_v29, %v3878_v29  ;;  %v3092_v50 = vadd.s32 8, %v8829_v42  ;;  %v4172_v25 = vrot.slane %v4170_v16, 1  ;;  %v8913_v42 = vld [vmem:[#allocation7_spill] sm:$0xff] }
 0x1dd   : > { %6149 = vmatmul.mubr.msk.bf16.gmra.mrb[28].mxu1 %vm4212_vm15, %v8295_v45  ;;  %v4169_v47 = vor.u32 %v4168_v5, %v4164_v43  ;;  %v8334_v51 = vsel %vm797_vm1, %v3900_v7, %v8912_v2  ;;  %v3822_v63 = vsel %vm3777_vm6, %v8092_v21, %v3821_v17  ;;  %6442 = vmatprep.subr.msk.bf16.mxu0 %vm4237_vm4, %v8308_v54  ;;  %v4196_v35 = vshll.u32 %v8198_v62, 16 }
 0x1de   : > { %v4179_v53 = vor.u32 %v4178_v44, %v4174_v49  ;;  %v8344_v22 = vsel %vm797_vm1, %v3901_v3, %v8913_v42  ;;  %v4186_v60 = vshll.u32 %v8334_v51, 16  ;;  %vm3109_vm7 = vcmp.ge.s32.totalorder %v3092_v50, 0 }
 0x1df   : > { %v8354_v21 = vsel %vm4123_vm14, %v4169_v47, %v4172_v25  ;;  %v4190_v28 = vshll.u32 %v8344_v22, 16  ;;  %vm3119_vm8 = vcmp.lt.s32.totalorder %v3092_v50, 16  ;;  %v4182_v0 = vrot.slane %v4180_v11, 1  ;;  %v8918_v25 = vld [vmem:[#allocation20_spill] sm:$0xff] }
 0x1e0   : > { %6152 = vmatprep.mubr.msk.bf16.mxu1 %vm4212_vm15, %v8354_v21  ;;  %v4184_v4 = vshrl.u32 %v8334_v51, 16  ;;  %v4188_v55 = vrot.slane %v4186_v60, 1  ;;  %vm8362_vm9 = vmand %vm3109_vm7, %vm3119_vm8  ;;  %v4360_v24 = vsel %vm4237_vm4, %v8150_v8, 0  ;;  %v8373_v34 = vsel %vm797_vm1, %v3903_v13, %v8916_v23 }
 0x1e1   : > { %v4120_v11 = vsel %vm797_vm1, %v3907_v18, %v4060_v41  ;;  %v4192_v30 = vrot.slane %v4190_v28, 1  ;;  %vm3158_vm0 = vmand %vm8362_vm9, %vm3131_vm5  ;;  %v3883_v8 = vsel %vm8362_vm9, %v3822_v63, 0.0  ;;  %6161 = vmatpush3.bf16.msra.mxu1 %v4360_v24  ;;  %v5173_v61 = vrot.slane %v5171_v37, 1 }
 0x1e2   : > { %v4189_v46 = vor.u32 %v4188_v55, %v4184_v4  ;;  %vm3193_vm10 = vmand %vm8362_vm9, %vm3166_vm11  ;;  %v3882_v13 = vsel %vm3158_vm0, %v8117_v58, 0.0  ;;  %6438 = vmatprep.subr.msk.bf16.mxu1 %vm4237_vm4, %v8351_v10  ;;  %v8395_v39 = vsel %vm4123_vm14, %v4179_v53, %v4182_v0  ;;  %v4198_v36 = vrot.slane %v4196_v35, 1 }
 0x1e3   : > { %6221 = vmatmul.mubr.msk.bf16.gmra.mrb[12].mxu0 %vm4212_vm15, %v8354_v21  ;;  %v3884_v18 = vsel %vm3193_vm10, %v3821_v17, 0.0  ;;  %v3904_v16 = vpack.c.bf16 %v3883_v8, %v3882_v13  ;;  %v4200_v31 = vshll.u32 %v8373_v34, 16  ;;  %v4476_v52 = vrot.slane %v8052_v57, 1 }
 0x1e4   : > { %v5175_v44 = vshll.u32 %v4120_v11, 16  ;;  %v5169_v58 = vshrl.u32 %v8263_v59, 16  ;;  %6224 = vmatprep.mubr.msk.bf16.mxu0 %vm4212_vm15, %v8395_v39  ;;  %v8407_v33 = vsel %vm4123_vm14, %v4189_v46, %v4192_v30  ;;  %v4194_v1 = vshrl.u32 %v8198_v62, 16 }
 0x1e5   : > { %6153 = vmatmul.mubr.msk.bf16.gmra.mrb[32].mxu1 %vm4212_vm15, %v8395_v39  ;;  %v3905_v17 = vpack.c.bf16 %v3884_v18, %v3884_v18  ;;  %v8412_v9 = vsel %vm797_vm1, %v3904_v16, %v8917_v56  ;;  %v4477_v43 = vrot.slane %v8073_v19, 1  ;;  %v5308_v7 = vrot.slane %v8263_v59, 1 }
 0x1e6   : > { %6156 = vmatprep.mubr.msk.bf16.mxu1 %vm4212_vm15, %v8407_v33  ;;  %v4776_v5 = vshll.u32 %v8412_v9, 16  ;;  %v5174_v29 = vor.u32 %v5173_v61, %v5169_v58  ;;  %v4199_v37 = vor.u32 %v4198_v36, %v4194_v1  ;;  %v4202_v3 = vrot.slane %v4200_v31, 1  ;;  %v6516_v61 = vld [vmem:[%s8731_s4 + $0x38] sm:$0x3f]  }
 0x1e7   : > { %v4478_v49 = vsel %vm3777_vm6, %v4476_v52, %v4477_v43  ;;  %v5177_v50 = vrot.slane %v5175_v44, 1  ;;  %v5309_v47 = vrot.slane %v4120_v11, 1  ;;  %v8422_v2 = vsel %vm797_vm1, %v3905_v17, %v8918_v25  ;;  %v8919_v11 = vld [vmem:[#allocation28_spill] sm:$0xff] }
 0x1e8   : > { %v4774_v19 = vshrl.u32 %v8412_v9, 16  ;;  %v4778_v63 = vrot.slane %v4776_v5, 1  ;;  %v8428_v41 = vsel %vm4123_vm14, %v4199_v37, %v4202_v3  ;;  %v4780_v60 = vshll.u32 %v8422_v2, 16  ;;  %v6518_v5 = vld [vmem:[%s8731_s4 + $0x40] sm:$0x3f]  }
 0x1e9   : > { %v8431_v53 = vsel %vm4123_vm14, %v5174_v29, %v5177_v50  ;;  %v8434_v42 = vsel %vm3777_vm6, %v5308_v7, %v5309_v47  ;;  %v4479_v28 = vrot.slane %v8202_v48, 1  ;;  %v4480_v4 = vrot.slane %v8214_v40, 1  ;;  %v8610_v3 = vld [vmem:[%s8732_s5] ss:$0 sm:$0xff] }
 0x1ea   : > { %v4779_v35 = vor.u32 %v4778_v63, %v4774_v19  ;;  %v4782_v0 = vrot.slane %v4780_v60, 1  ;;  %v4533_v24 = vsel %vm4237_vm4, %v8351_v10, 0  ;;  %v4482_v40 = vrot.slane %v8252_v32, 1 }
 0x1eb   : > { %6225 = vmatmul.mubr.msk.bf16.gmra.mrb[16].mxu0 %vm4212_vm15, %v8407_v33  ;;  %v4481_v20 = vsel %vm3777_vm6, %v4479_v28, %v4480_v4  ;;  %v4485_v23 = vrot.slane %v7826_v6, 1  ;;  %v4483_v10 = vrot.slane %v8267_v14, 1  ;;  %v4486_v30 = vrot.slane %v8919_v11, 1 }
 0x1ec   : > { %6228 = vmatprep.mubr.msk.bf16.mxu0 %vm4212_vm15, %v8428_v41  ;;  %v8446_v55 = vsel %vm4123_vm14, %v4779_v35, %v4782_v0  ;;  %v5054_v8 = vsel %vm4237_vm4, %v8308_v54, 0  ;;  %v4488_v14 = vrot.slane %v8283_v38, 1  ;;  %v4492_v54 = vrot.slane %v8070_v15, 1 }
 0x1ed   : > { %6157 = vmatmul.mubr.msk.bf16.gmra.mrb[36].mxu1 %vm4212_vm15, %v8428_v41  ;;  %v8472_v46 = vsel %vm3777_vm6, %v4482_v40, %v4483_v10  ;;  %v8477_v13 = vsel %vm3777_vm6, %v4485_v23, %v4486_v30  ;;  %v4491_v36 = vrot.slane %v7847_v12, 1  ;;  %v4489_v18 = vrot.slane %v8287_v27, 1 }
 0x1ee   : > { %6162 = vmatprep.mubr.msk.bf16.mxu1 %vm4212_vm15, %v8052_v57  ;;  %v6517_v57 = vld [vmem:[%s8731_s4 + $0x18] sm:$0x3f]   ;;  %v4494_v15 = vrot.slane %v8334_v51, 1  ;;  %v4495_v52 = vrot.slane %v8344_v22, 1  ;;  %v4497_v27 = vrot.slane %v8198_v62, 1  ;;  %v4498_v44 = vrot.slane %v8373_v34, 1 }
 0x1ef   : > { %v4490_v16 = vsel %vm3777_vm6, %v4488_v14, %v4489_v18  ;;  %v4493_v31 = vsel %vm3777_vm6, %v4491_v36, %v4492_v54  ;;  %v4913_v17 = vrot.slane %v8412_v9, 1  ;;  %v4914_v22 = vrot.slane %v8422_v2, 1 }
 0x1f0   : > { %v4496_v58 = vsel %vm3777_vm6, %v4494_v15, %v4495_v52  ;;  %v4499_v1 = vsel %vm3777_vm6, %v4497_v27, %v4498_v44  ;;  %v4659_v34 = vsel %vm4237_vm4, %v6517_v57, 0  ;;  %v5191_v43 = vsel %vm4237_vm4, %v6516_v61, 0 }
 0x1f1   : > { %v4915_v56 = vsel %vm3777_vm6, %v4913_v17, %v4914_v22  ;;  %v5323_v29 = vsel %vm4237_vm4, %v6518_v5, 0  ;;  %vm5525_vm5 = vcmask 60416  }
 0x1f3   : > { %6229 = vmatmul.mubr.msk.bf16.gmra.mrb[20].mxu0 %vm4212_vm15, %v8446_v55 }
 0x1f4   : > { %6234 = vmatprep.mubr.msk.bf16.mxu0 %vm4212_vm15, %v4481_v20 }
 0x1f5   : > { %6163 = vmatmul.mubr.msk.bf16.vlgmr.msra.gmra.mrb[24].mxu1 %vm4212_vm15, %v8202_v48 }
 0x1f6   : > { %6166 = vmatprep.mubr.msk.bf16.mxu1 %vm4212_vm15, %v8252_v32  ;;  %6179 = vmatpush3.bf16.msra.mxu1 %v4533_v24 }
 0x1f7   : > { %6439 = vmatprep.subr.msk.bf16.mxu1 %vm4237_vm4, %v6517_v57 }
 0x1fb   : > { %6235 = vmatmul.mubr.msk.bf16.vlgmr.msra.gmra.mrb[8].mxu0 %vm4212_vm15, %v8472_v46 }
 0x1fc   : > { %6251 = vmatpush3.bf16.msra.mxu0 %v5054_v8  ;;  %6238 = vmatprep.mubr.msk.bf16.mxu0 %vm4212_vm15, %v8477_v13 }
 0x1fd   : > { %6167 = vmatmul.mubr.msk.bf16.gmra.mrb[28].mxu1 %vm4212_vm15, %v7826_v6  ;;  %6443 = vmatprep.subr.msk.bf16.mxu0 %vm4237_vm4, %v6516_v61 }
 0x1fe   : > { %6170 = vmatprep.mubr.msk.bf16.mxu1 %vm4212_vm15, %v8283_v38 }
 0x203   : > { %6239 = vmatmul.mubr.msk.bf16.gmra.mrb[12].mxu0 %vm4212_vm15, %v4490_v16 }
 0x204   : > { %6242 = vmatprep.mubr.msk.bf16.mxu0 %vm4212_vm15, %v4493_v31 }
 0x205   : > { %6171 = vmatmul.mubr.msk.bf16.gmra.mrb[32].mxu1 %vm4212_vm15, %v7847_v12 }
 0x206   : > { %6174 = vmatprep.mubr.msk.bf16.mxu1 %vm4212_vm15, %v8334_v51 }
 0x20b   : > { %6243 = vmatmul.mubr.msk.bf16.gmra.mrb[16].mxu0 %vm4212_vm15, %v4496_v58 }
 0x20c   : > { %6246 = vmatprep.mubr.msk.bf16.mxu0 %vm4212_vm15, %v4499_v1 }
 0x20d   : > { %6175 = vmatmul.mubr.msk.bf16.gmra.mrb[36].mxu1 %vm4212_vm15, %v8198_v62 }
 0x20e   : > { %6180 = vmatprep.mubr.msk.bf16.mxu1 %vm4212_vm15, %v4478_v49 }
 0x213   : > { %6247 = vmatmul.mubr.msk.bf16.gmra.mrb[20].mxu0 %vm4212_vm15, %v4915_v56 }
 0x214   : > { %6252 = vmatprep.mubr.msk.bf16.mxu0 %vm4212_vm15, %v8252_v32 }
 0x215   : > { %6181 = vmatmul.mubr.msk.bf16.vlgmr.msra.gmra.mrb[24].mxu1 %vm4212_vm15, %v4481_v20 }
 0x216   : > { %6184 = vmatprep.mubr.msk.bf16.mxu1 %vm4212_vm15, %v8472_v46  ;;  %6197 = vmatpush3.bf16.msra.mxu1 %v4659_v34 }
 0x21b   : > { %6253 = vmatmul.mubr.msk.bf16.vlgmr.msra.gmra.mrb[8].mxu0 %vm4212_vm15, %v7826_v6 }
 0x21c   : > { %6269 = vmatpush3.bf16.msra.mxu0 %v5191_v43  ;;  %6256 = vmatprep.mubr.msk.bf16.mxu0 %vm4212_vm15, %v8283_v38 }
 0x21d   : > { %6185 = vmatmul.mubr.msk.bf16.gmra.mrb[28].mxu1 %vm4212_vm15, %v8477_v13  ;;  %6444 = vmatprep.subr.msk.bf16.mxu0 %vm4237_vm4, %v6518_v5 }
 0x21e   : > { %6188 = vmatprep.mubr.msk.bf16.mxu1 %vm4212_vm15, %v4490_v16 }
 0x223   : > { %6257 = vmatmul.mubr.msk.bf16.gmra.mrb[12].mxu0 %vm4212_vm15, %v7847_v12 }
 0x224   : > { %6260 = vmatprep.mubr.msk.bf16.mxu0 %vm4212_vm15, %v8334_v51 }
 0x225   : > { %6189 = vmatmul.mubr.msk.bf16.gmra.mrb[32].mxu1 %vm4212_vm15, %v4493_v31 }
 0x226   : > { %6192 = vmatprep.mubr.msk.bf16.mxu1 %vm4212_vm15, %v4496_v58 }
 0x22b   : > { %6261 = vmatmul.mubr.msk.bf16.gmra.mrb[16].mxu0 %vm4212_vm15, %v8198_v62 }
 0x22c   : > { %6264 = vmatprep.mubr.msk.bf16.mxu0 %vm4212_vm15, %v8412_v9 }
 0x22d   : > { %6193 = vmatmul.mubr.msk.bf16.gmra.mrb[36].mxu1 %vm4212_vm15, %v4499_v1 }
 0x22e   : > { %6198 = vmatprep.mubr.msk.bf16.mxu1 %vm4212_vm15, %v8202_v48 }
 0x233   : > { %6265 = vmatmul.mubr.msk.bf16.gmra.mrb[20].mxu0 %vm4212_vm15, %v8263_v59 }
 0x234   : > { %6270 = vmatprep.mubr.msk.bf16.mxu0 %vm4212_vm15, %v8311_v26 }
 0x235   : > { %6199 = vmatmul.mubr.msk.bf16.vlgmr.msra.gmra.mrb[24].mxu1 %vm4212_vm15, %v8252_v32 }
 0x236   : > { %6202 = vmatprep.mubr.msk.bf16.mxu1 %vm4212_vm15, %v7826_v6 }
 0x23b   : > { %6271 = vmatmul.mubr.msk.bf16.vlgmr.msra.gmra.mrb[8].mxu0 %vm4212_vm15, %v8295_v45 }
 0x23c   : > { %6287 = vmatpush3.bf16.msra.mxu0 %v5323_v29  ;;  %6274 = vmatprep.mubr.msk.bf16.mxu0 %vm4212_vm15, %v8354_v21 }
 0x23d   : > { %6203 = vmatmul.mubr.msk.bf16.gmra.mrb[28].mxu1 %vm4212_vm15, %v8283_v38 }
 0x23e   : > { %6206 = vmatprep.mubr.msk.bf16.mxu1 %vm4212_vm15, %v7847_v12 }
 0x243   : > { %6275 = vmatmul.mubr.msk.bf16.gmra.mrb[12].mxu0 %vm4212_vm15, %v8395_v39 }
 0x244   : > { %6278 = vmatprep.mubr.msk.bf16.mxu0 %vm4212_vm15, %v8407_v33 }
 0x245   : > { %6207 = vmatmul.mubr.msk.bf16.gmra.mrb[32].mxu1 %vm4212_vm15, %v8334_v51 }
 0x246   : > { %6210 = vmatprep.mubr.msk.bf16.mxu1 %vm4212_vm15, %v8198_v62 }
 0x24b   : > { %6279 = vmatmul.mubr.msk.bf16.gmra.mrb[16].mxu0 %vm4212_vm15, %v8428_v41 }
 0x24c   : > { %6282 = vmatprep.mubr.msk.bf16.mxu0 %vm4212_vm15, %v8446_v55 }
 0x24d   : > { %6211 = vmatmul.mubr.msk.bf16.gmra.mrb[36].mxu1 %vm4212_vm15, %v8412_v9 }
 0x253   : > { %6283 = vmatmul.mubr.msk.bf16.gmra.mrb[20].mxu0 %vm4212_vm15, %v8431_v53 }
 0x254   : > { %6288 = vmatprep.mubr.msk.bf16.mxu0 %vm4212_vm15, %v8472_v46 }
 0x25b   : > { %6289 = vmatmul.mubr.msk.bf16.vlgmr.msra.gmra.mrb[8].mxu0 %vm4212_vm15, %v8477_v13 }
 0x25c   : > { %6292 = vmatprep.mubr.msk.bf16.mxu0 %vm4212_vm15, %v4490_v16 }
 0x263   : > { %6293 = vmatmul.mubr.msk.bf16.gmra.mrb[12].mxu0 %vm4212_vm15, %v4493_v31 }
 0x264   : > { %6296 = vmatprep.mubr.msk.bf16.mxu0 %vm4212_vm15, %v4496_v58 }
 0x26b   : > { %6297 = vmatmul.mubr.msk.bf16.gmra.mrb[16].mxu0 %vm4212_vm15, %v4499_v1 }
 0x26c   : > { %6300 = vmatprep.mubr.msk.bf16.mxu0 %vm4212_vm15, %v4915_v56 }
 0x273   : > { %6301 = vmatmul.mubr.msk.bf16.gmra.mrb[20].mxu0 %vm4212_vm15, %v8434_v42 }
 0x308   : > { %v6200_v6 = vpop.f32.mrb[24].mxu1 }
 0x309   : > { %v4695_v12 = vpop.f32.mrb[25].mxu1 }
 0x30a   : > { %v6201_v62 = vpop.f32.mrb[26].mxu1 }
 0x30b   : > { %v4698_v48 = vpop.f32.mrb[27].mxu1 }
 0x310   : > { %v6204_v32 = vpop.f32.mrb[28].mxu1 }
 0x311   : > { %v4711_v59 = vpop.f32.mrb[29].mxu1 }
 0x312   : > { %v6205_v38 = vpop.f32.mrb[30].mxu1 }
 0x313   : > { %v4714_v45 = vpop.f32.mrb[31].mxu1 }
 0x318   : > { %v8588_v26 = vpop.f32.mrb[32].mxu1 }
 0x319   : > { %v8590_v51 = vpop.f32.mrb[33].mxu1 }
 0x31a   : > { %v8592_v21 = vpop.f32.mrb[34].mxu1 }
 0x31b   : > { %v8594_v39 = vpop.f32.mrb[35].mxu1 }
 0x320   : > { %v8596_v33 = vpop.f32.mrb[36].mxu1 }
 0x321   : > { %v8599_v9 = vpop.f32.mrb[37].mxu1 }
 0x322   : > { %v8601_v7 = vpop.f32.mrb[38].mxu1 }
 0x323   : > { %v8603_v37 = vpop.f32.mrb[39].mxu1 }
 0x32e   : > { %v6290_v49 = vpop.f32.mrb[8].mxu0 }
 0x32f   : > { %v6304_v50 = vadd.f32 %v6290_v49, %v6200_v6  ;;  %v5359_v47 = vpop.f32.mrb[9].mxu0 }
 0x330   : > { %v6305_v25 = vadd.f32 %v5359_v47, %v4695_v12  ;;  %v6291_v2 = vpop.f32.mrb[10].mxu0 }
 0x331   : > { %v5447_v19 = vadd.f32 %v6304_v50, %v8610_v3  ;;  %v6306_v63 = vadd.f32 %v6291_v2, %v6201_v62  ;;  %v5362_v41 = vpop.f32.mrb[11].mxu0 }
 0x332   : > { %v5445_v53 = vadd.f32 %v6305_v25, %v8610_v3  ;;  %v6307_v42 = vadd.f32 %v5362_v41, %v4698_v48 }
 0x333   : > { %v5987_v60 = vpack.c.bf16 %v5447_v19, %v5447_v19  ;;  %v5448_v35 = vadd.f32 %v6306_v63, %v8610_v3  ;;  %v5581_v55 = vmul.f32 %v5447_v19, %v5447_v19  ;;  %v5545_v46 = vsel %vm797_vm1, %v5447_v19, 0.0 }
 0x334   : > { %v5985_v28 = vpack.c.bf16 %v5445_v53, %v5445_v53  ;;  %v5579_v0 = vmul.f32 %v5445_v53, %v5445_v53  ;;  %v5446_v4 = vadd.f32 %v6307_v42, %v8610_v3  ;;  %v5542_v24 = vsel %vm797_vm1, %v5445_v53, 0.0 }
 0x335   : > { %5528 = vst.msk [vmem:[%s8616_s15 + $0x8] sm:$0xf] %vm5525_vm5, %v5987_v60  ;;  %v5988_v20 = vpack.c.bf16 %v5448_v35, %v5448_v35  ;;  %v5582_v11 = vmul.f32 %v5448_v35, %v5448_v35  ;;  %v5598_v27 = vsel %vm797_vm1, %v5581_v55, 0.0  ;;  %v5547_v1 = vsel %vm797_vm1, %v5448_v35, 0.0 }
 0x336   : > { %5526 = vst.msk [vmem:[%s8616_s15] sm:$0xf] %vm5525_vm5, %v5985_v28  ;;  %v5986_v57 = vpack.c.bf16 %v5446_v4, %v5446_v4  ;;  %v5543_v40 = vsel %vm797_vm1, %v5446_v4, 0.0  ;;  %v5580_v23 = vmul.f32 %v5446_v4, %v5446_v4  ;;  %v6294_v10 = vpop.f32.mrb[12].mxu0  ;;  %v5595_v13 = vsel %vm797_vm1, %v5579_v0, 0.0 }
 0x337   : > { %5529 = vst.msk [vmem:[%s8616_s15 + $0xc] sm:$0xf] %vm5525_vm5, %v5988_v20  ;;  %v5544_v30 = vadd.f32 %v5543_v40, %v5542_v24  ;;  %v6308_v8 = vadd.f32 %v6294_v10, %v6204_v32  ;;  %v5375_v61 = vpop.f32.mrb[13].mxu0  ;;  %v5600_v17 = vsel %vm797_vm1, %v5582_v11, 0.0 }
 0x338   : > { %5527 = vst.msk [vmem:[%s8616_s15 + $0x4] sm:$0xf] %vm5525_vm5, %v5986_v57  ;;  %v5596_v14 = vsel %vm797_vm1, %v5580_v23, 0.0  ;;  %v6309_v54 = vadd.f32 %v5375_v61, %v4711_v59  ;;  %v6295_v36 = vpop.f32.mrb[14].mxu0 }
 0x339   : > { %v5546_v18 = vadd.f32 %v5545_v46, %v5544_v30  ;;  %v5597_v16 = vadd.f32 %v5596_v14, %v5595_v13  ;;  %v5451_v31 = vadd.f32 %v6308_v8, %v8610_v3  ;;  %v6310_v15 = vadd.f32 %v6295_v36, %v6205_v38  ;;  %v5378_v52 = vpop.f32.mrb[15].mxu0 }
 0x33a   : > { %v5449_v44 = vadd.f32 %v6309_v54, %v8610_v3  ;;  %v6311_v58 = vadd.f32 %v5378_v52, %v4714_v45 }
 0x33b   : > { %v5599_v22 = vadd.f32 %v5598_v27, %v5597_v16  ;;  %v5991_v56 = vpack.c.bf16 %v5451_v31, %v5451_v31  ;;  %v5548_v43 = vadd.f32 %v5547_v1, %v5546_v18  ;;  %v5452_v12 = vadd.f32 %v6310_v15, %v8610_v3 }
 0x33c   : > { %v5989_v34 = vpack.c.bf16 %v5449_v44, %v5449_v44  ;;  %v5549_v5 = vsel %vm797_vm1, %v5449_v44, 0.0  ;;  %v5583_v29 = vmul.f32 %v5449_v44, %v5449_v44  ;;  %v5450_v62 = vadd.f32 %v6311_v58, %v8610_v3 }
 0x33d   : > { %5532 = vst.msk [vmem:[%s8616_s15 + $0x18] sm:$0xf] %vm5525_vm5, %v5991_v56  ;;  %v5601_v6 = vadd.f32 %v5600_v17, %v5599_v22  ;;  %v5550_v48 = vadd.f32 %v5549_v5, %v5548_v43  ;;  %v5585_v38 = vmul.f32 %v5451_v31, %v5451_v31  ;;  %v5992_v49 = vpack.c.bf16 %v5452_v12, %v5452_v12 }
 0x33e   : > { %5530 = vst.msk [vmem:[%s8616_s15 + $0x10] sm:$0xf] %vm5525_vm5, %v5989_v34  ;;  %v5602_v32 = vsel %vm797_vm1, %v5583_v29, 0.0  ;;  %v6298_v59 = vpop.f32.mrb[16].mxu0  ;;  %v5990_v47 = vpack.c.bf16 %v5450_v62, %v5450_v62  ;;  %v5551_v25 = vsel %vm797_vm1, %v5450_v62, 0.0  ;;  %v5584_v2 = vmul.f32 %v5450_v62, %v5450_v62 }
 0x33f   : > { %v5603_v45 = vadd.f32 %v5602_v32, %v5601_v6  ;;  %v5391_v50 = vpop.f32.mrb[17].mxu0  ;;  %v6312_v19 = vadd.f32 %v6298_v59, %v8588_v26  ;;  %v5553_v41 = vsel %vm797_vm1, %v5451_v31, 0.0  ;;  %5533 = vst.msk [vmem:[%s8616_s15 + $0x1c] sm:$0xf] %vm5525_vm5, %v5992_v49  ;;  %v5552_v53 = vadd.f32 %v5551_v25, %v5550_v48 }
 0x340   : > { %v6299_v63 = vpop.f32.mrb[18].mxu0  ;;  %v6313_v42 = vadd.f32 %v5391_v50, %v8590_v51  ;;  %v5586_v28 = vmul.f32 %v5452_v12, %v5452_v12  ;;  %5531 = vst.msk [vmem:[%s8616_s15 + $0x14] sm:$0xf] %vm5525_vm5, %v5990_v47  ;;  %v5604_v0 = vsel %vm797_vm1, %v5584_v2, 0.0  ;;  %v5606_v51 = vsel %vm797_vm1, %v5585_v38, 0.0 }
 0x341   : > { %v6314_v60 = vadd.f32 %v6299_v63, %v8592_v21  ;;  %v5394_v35 = vpop.f32.mrb[19].mxu0  ;;  %v5455_v4 = vadd.f32 %v6312_v19, %v8610_v3  ;;  %v5554_v55 = vadd.f32 %v5553_v41, %v5552_v53  ;;  %v5605_v20 = vadd.f32 %v5604_v0, %v5603_v45 }
 0x342   : > { %v6315_v26 = vadd.f32 %v5394_v35, %v8594_v39  ;;  %v5453_v24 = vadd.f32 %v6313_v42, %v8610_v3  ;;  %v5555_v21 = vsel %vm797_vm1, %v5452_v12, 0.0  ;;  %v5608_v8 = vsel %vm797_vm1, %v5586_v28, 0.0 }
 0x343   : > { %v5456_v57 = vadd.f32 %v6314_v60, %v8610_v3  ;;  %v5995_v40 = vpack.c.bf16 %v5455_v4, %v5455_v4  ;;  %v5607_v10 = vadd.f32 %v5606_v51, %v5605_v20  ;;  %v5556_v30 = vadd.f32 %v5555_v21, %v5554_v55 }
 0x344   : > { %v5454_v23 = vadd.f32 %v6315_v26, %v8610_v3  ;;  %v5993_v11 = vpack.c.bf16 %v5453_v24, %v5453_v24  ;;  %v5557_v39 = vsel %vm797_vm1, %v5453_v24, 0.0  ;;  %v5561_v61 = vsel %vm797_vm1, %v5455_v4, 0.0 }
 0x345   : > { %5536 = vst.msk [vmem:[%s8616_s15 + $0x28] sm:$0xf] %vm5525_vm5, %v5995_v40  ;;  %v5587_v46 = vmul.f32 %v5453_v24, %v5453_v24  ;;  %v5996_v13 = vpack.c.bf16 %v5456_v57, %v5456_v57  ;;  %v5589_v54 = vmul.f32 %v5455_v4, %v5455_v4  ;;  %v5558_v36 = vadd.f32 %v5557_v39, %v5556_v30 }
 0x346   : > { %v6302_v14 = vpop.f32.mrb[20].mxu0  ;;  %5534 = vst.msk [vmem:[%s8616_s15 + $0x20] sm:$0xf] %vm5525_vm5, %v5993_v11  ;;  %v5609_v18 = vadd.f32 %v5608_v8, %v5607_v10  ;;  %v5994_v16 = vpack.c.bf16 %v5454_v23, %v5454_v23  ;;  %v5559_v52 = vsel %vm797_vm1, %v5454_v23, 0.0  ;;  %v5588_v27 = vmul.f32 %v5454_v23, %v5454_v23 }
 0x347   : > { %v5407_v31 = vpop.f32.mrb[21].mxu0  ;;  %v5610_v15 = vsel %vm797_vm1, %v5587_v46, 0.0  ;;  %5537 = vst.msk [vmem:[%s8616_s15 + $0x2c] sm:$0xf] %vm5525_vm5, %v5996_v13  ;;  %v6316_v44 = vadd.f32 %v6302_v14, %v8596_v33  ;;  %v5590_v17 = vmul.f32 %v5456_v57, %v5456_v57  ;;  %v5560_v22 = vadd.f32 %v5559_v52, %v5558_v36 }
 0x348   : > { %v6303_v58 = vpop.f32.mrb[22].mxu0  ;;  %v5611_v1 = vadd.f32 %v5610_v15, %v5609_v18  ;;  %5535 = vst.msk [vmem:[%s8616_s15 + $0x24] sm:$0xf] %vm5525_vm5, %v5994_v16  ;;  %v6317_v56 = vadd.f32 %v5407_v31, %v8599_v9  ;;  %v5612_v43 = vsel %vm797_vm1, %v5588_v27, 0.0  ;;  %v5614_v48 = vsel %vm797_vm1, %v5589_v54, 0.0 }
 0x349   : > { %v5410_v34 = vpop.f32.mrb[23].mxu0  ;;  %v5459_v5 = vadd.f32 %v6316_v44, %v8610_v3  ;;  %v6318_v29 = vadd.f32 %v6303_v58, %v8601_v7  ;;  %v5562_v33 = vadd.f32 %v5561_v61, %v5560_v22  ;;  %v5563_v32 = vsel %vm797_vm1, %v5456_v57, 0.0 }
 0x34a   : > { %v6319_v6 = vadd.f32 %v5410_v34, %v8603_v37  ;;  %v5613_v12 = vadd.f32 %v5612_v43, %v5611_v1  ;;  %v5457_v62 = vadd.f32 %v6317_v56, %v8610_v3  ;;  %v5616_v37 = vsel %vm797_vm1, %v5590_v17, 0.0 }
 0x34b   : > { %v5999_v9 = vpack.c.bf16 %v5459_v5, %v5459_v5  ;;  %v5460_v59 = vadd.f32 %v6318_v29, %v8610_v3  ;;  %v5564_v49 = vadd.f32 %v5563_v32, %v5562_v33  ;;  %v5593_v60 = vmul.f32 %v5459_v5, %v5459_v5 }
 0x34c   : > { %v5615_v38 = vadd.f32 %v5614_v48, %v5613_v12  ;;  %v5997_v45 = vpack.c.bf16 %v5457_v62, %v5457_v62  ;;  %v5565_v7 = vsel %vm797_vm1, %v5457_v62, 0.0  ;;  %v5591_v50 = vmul.f32 %v5457_v62, %v5457_v62 }
 0x34d   : > { %5540 = vst.msk [vmem:[%s8616_s15 + $0x38] sm:$0xf] %vm5525_vm5, %v5999_v9  ;;  %v6000_v47 = vpack.c.bf16 %v5460_v59, %v5460_v59  ;;  %v5566_v25 = vadd.f32 %v5565_v7, %v5564_v49  ;;  %v5458_v19 = vadd.f32 %v6319_v6, %v8610_v3  ;;  %v5569_v0 = vsel %vm797_vm1, %v5459_v5, 0.0 }
 0x34e   : > { %5538 = vst.msk [vmem:[%s8616_s15 + $0x30] sm:$0xf] %vm5525_vm5, %v5997_v45  ;;  %v5617_v2 = vadd.f32 %v5616_v37, %v5615_v38  ;;  %v5618_v63 = vsel %vm797_vm1, %v5591_v50, 0.0  ;;  %v5594_v4 = vmul.f32 %v5460_v59, %v5460_v59  ;;  %v5571_v55 = vsel %vm797_vm1, %v5460_v59, 0.0 }
 0x34f   : > { %5541 = vst.msk [vmem:[%s8616_s15 + $0x3c] sm:$0xf] %vm5525_vm5, %v6000_v47  ;;  %v5998_v53 = vpack.c.bf16 %v5458_v19, %v5458_v19  ;;  %v5567_v42 = vsel %vm797_vm1, %v5458_v19, 0.0  ;;  %v5592_v28 = vmul.f32 %v5458_v19, %v5458_v19  ;;  %v5622_v24 = vsel %vm797_vm1, %v5593_v60, 0.0 }
 0x350   : > { %v5619_v41 = vadd.f32 %v5618_v63, %v5617_v2  ;;  %v5568_v35 = vadd.f32 %v5567_v42, %v5566_v25  ;;  %v5624_v21 = vsel %vm797_vm1, %v5594_v4, 0.0 }
 0x351   : > { %5539 = vst.msk [vmem:[%s8616_s15 + $0x34] sm:$0xf] %vm5525_vm5, %v5998_v53  ;;  %v5620_v26 = vsel %vm797_vm1, %v5592_v28, 0.0  ;;  %vm5633_vm1 = vcmask 58368  }
 0x352   : > { %v5570_v3 = vadd.f32 %v5569_v0, %v5568_v35  ;;  %v5621_v20 = vadd.f32 %v5620_v26, %v5619_v41 }
 0x354   : > { %v5572_v57 = vadd.f32 %v5571_v55, %v5570_v3  ;;  %v5623_v51 = vadd.f32 %v5622_v24, %v5621_v20 }
 0x356   : > { %v5573_v40 = vrot.slane %v5572_v57, 4  ;;  %v5625_v23 = vadd.f32 %v5624_v21, %v5623_v51 }
 0x358   : > { %v5574_v10 = vadd.f32 %v5573_v40, %v5572_v57  ;;  %v5626_v11 = vrot.slane %v5625_v23, 4 }
 0x35a   : > { %v5575_v30 = vrot.slane %v5574_v10, 2  ;;  %v5627_v39 = vadd.f32 %v5626_v11, %v5625_v23 }
 0x35c   : > { %v5576_v8 = vadd.f32 %v5575_v30, %v5574_v10  ;;  %v5628_v61 = vrot.slane %v5627_v39, 2 }
 0x35e   : > { %v5577_v46 = vrot.slane %v5576_v8, 1  ;;  %v5629_v13 = vadd.f32 %v5628_v61, %v5627_v39 }
 0x360   : > { %v5630_v14 = vrot.slane %v5629_v13, 1  ;;  %v5578_v54 = vadd.f32 %v5577_v46, %v5576_v8 }
 0x362   : > { %v5631_v36 = vadd.f32 %v5630_v14, %v5629_v13 }
 0x364   : > { %v5632_v18 = vsel %vm1897_vm2, %v5578_v54, %v5631_v36 }
 0x365   : > { %5634 = vst.msk [vmem:[%s344_s20] sm:$0x3] %vm5633_vm1, %v5632_v18 }
 0x366 PF: > { %s18_s28 = sadd.s32 1, %s6558_s28   ;;  %s8920_s24 = smov %s6550_s26 }
 0x367   : > { %p15_p8 = scmp.ge.s32.totalorder %s18_s28, 6   ;;  %s8921_s25 = smov %s6554_s27 }
 0x368   : > { %s8922_s26 = smov %s8925_s29  ;;  %s8923_s27 = smov %s8929_s30 }
 0x369   :  { %17 = sbr.rel (!%p15_p8) target bundleno = 3 (0x3), region = 102 }

</bundles_post_ra>
